<compile_context>
chip_gen: v7x
topology: tpu7x:2x2x1
jax: 0.10.0
libtpu: 0.0.40
codegen_flags: <defaults>
</compile_context>

<pallas_src>
import functools

import jax
import jax.numpy as jnp
from jax import lax
from jax.experimental import pallas as pl
from jax.experimental.pallas import tpu as pltpu


# -----------------------------------------------------------------------------
# Fused kernel: elastic-coefficient prep (elementwise part of fd2d.forward)
# + staggered-grid velocity-stress propagator, one shot per grid step.
# TODO(synk): staggeredfd_py_cuda is an external CUDA extension whose source is
# unavailable; the propagator below is a standard 2nd-order velocity-stress
# staggered-grid scheme with the same I/O contract (uu, seismo_v, illum_div).
# -----------------------------------------------------------------------------
def _fd2d_kernel(s_ref, srcx_ref, vp_ref, vs_ref, den_ref, denm0_ref, denm2_ref,
                 uu_ref, seis_ref, illum_ref,
                 cl_s, cacl_s, cm_s, b_s,
                 msrc_s, mnfc_s, mnlc_s, mnfr_s, mnlr_s,
                 *, dtx, nt, pad_top, src_z, rec_z, unroll):
    NZ, NX = vp_ref.shape

    # ---------------- coefficient / mask prologue (runs once per shot) -------
    vp = vp_ref[...]
    vs = vs_ref[...]
    den = den_ref[...]

    ca = vp * vp * den                        # torch.mul(vp1 ** 2, den)
    cm = vs * vs * den                        # torch.mul(vs1 ** 2, den)
    cl = (ca - 2.0 * cm) * denm0_ref[...]     # cl uses ca BEFORE free-surface fix

    row = lax.broadcasted_iota(jnp.int32, (NZ, NX), 0)
    col = lax.broadcasted_iota(jnp.int32, (NZ, NX), 1)

    # free-surface row: ca + (2*cm - ca) == 2*cm on row pad_top-1
    ca = jnp.where(row == (pad_top - 1), 2.0 * cm, ca)

    # fold dtx into the stress-update coefficients once; keep (ca - cl) so the
    # stress update can share the cl*div term between txx and tzz.
    cl_s[...] = dtx * cl
    cacl_s[...] = dtx * (ca - cl)
    cm_s[...] = dtx * cm
    # b = dtx * reciprocal(den) * denm2 (exact divide; runs once per shot)
    b_s[...] = (dtx / den) * denm2_ref[...]

    # loop-invariant masks as f32 0/1 fields in VMEM: kept out of the
    # loop-carried vreg set, their reloads land on otherwise-idle vld slots.
    src_x = srcx_ref[pl.program_id(0)]        # per-shot source column (SMEM)
    msrc_s[...] = ((row == src_z) & (col == src_x)).astype(jnp.float32)
    mnfc_s[...] = (col > 0).astype(jnp.float32)
    mnlc_s[...] = (col < (NX - 1)).astype(jnp.float32)
    mnfr_s[...] = (row > 0).astype(jnp.float32)
    mnlr_s[...] = (row < (NZ - 1)).astype(jnp.float32)

    zero = jnp.zeros((NZ, NX), jnp.float32)

    # O(2) staggered-grid differences via XLU rolls + VPU edge-mask multiplies.
    # TODO(synk): if a bundle dump shows the 2 XLU units binding on v6e/v7x,
    # switch dzf/dzb to shifted VMEM reads of a mirrored state buffer instead.
    def dxf(a):   # a[:, i+1] - a[:, i]
        return mnlc_s[...] * (pltpu.roll(a, NX - 1, axis=1) - a)

    def dxb(a):   # a[:, i] - a[:, i-1]
        return mnfc_s[...] * (a - pltpu.roll(a, 1, axis=1))

    def dzf(a):   # a[i+1, :] - a[i, :]
        return mnlr_s[...] * (pltpu.roll(a, NZ - 1, axis=0) - a)

    def dzb(a):   # a[i, :] - a[i-1, :]
        return mnfr_s[...] * (a - pltpu.roll(a, 1, axis=0))

    def step(t, carry):
        vx, vz, txx, tzz, txz, illum = carry

        # Coefficients re-loaded from VMEM each step (vld slots are idle in
        # this MXU-free kernel); keeps 16 vregs out of the carried live set.
        # TODO(synk): on v5e (tightest ld/st budget) keep cm_d and b as loop
        # carries and reload only cl_d/cacl_d.
        cl_d = cl_s[...]
        cacl_d = cacl_s[...]
        cm_d = cm_s[...]
        b = b_s[...]

        # velocity update (b already carries dtx and the density reciprocal)
        vx = vx + b * (dxb(txx) + dzb(txz))
        vz = vz + b * (dxf(txz) + dzf(tzz))

        dvx_dx = dxf(vx)
        dvz_dz = dzb(vz)
        div = dvx_dx + dvz_dz
        illum = illum + div * div             # carried; stored once after loop

        # stress update; dtx already folded into cl_d/cacl_d/cm_d, and the
        # cl*div + source-injection term is shared between txx and tzz.
        shared = cl_d * div + msrc_s[...] * s_ref[t]
        txx = txx + shared + cacl_d * dvx_dx
        tzz = tzz + shared + cacl_d * dvz_dz
        txz = txz + cm_d * (dzf(vx) + dxb(vz))

        # record vertical velocity at the receiver depth (output block is
        # VMEM-resident for the whole kernel; one masked (1, NX) store/step).
        # TODO(synk): verify the record-after-velocity-update convention
        # against the reference propagator's time staggering.
        seis_ref[pl.ds(t, 1), :] = vz[rec_z:rec_z + 1, :]
        return (vx, vz, txx, tzz, txz, illum)

    vx, vz, txx, tzz, txz, illum = lax.fori_loop(
        0, nt, step, (zero, zero, zero, zero, zero, zero), unroll=unroll)

    uu_ref[...] = vz
    illum_ref[...] = illum


def fd2d_forward_pallas(vp1, vs1, den, denm0, denm2, s, src_cols, *, dtx,
                        pad_top, src_z, rec_z):
    NZ, NX = vp1.shape
    nt = int(s.shape[0])
    n_shots = int(src_cols.shape[0])
    # fully unroll the short demo loop; with masks/coeffs/illum out of the
    # carried set a deeper factor stays spill-free for long nt (re-sweep with
    # a bundle dump if nt grows).
    unroll = True if nt <= 16 else 8
    kern = functools.partial(
        _fd2d_kernel, dtx=float(dtx), nt=nt, pad_top=int(pad_top),
        src_z=int(src_z), rec_z=int(rec_z), unroll=unroll)

    shared2d = pl.BlockSpec((NZ, NX), lambda i: (0, 0))   # same model every shot
    return pl.pallas_call(
        kern,
        out_shape=(jax.ShapeDtypeStruct((n_shots, NZ, NX), jnp.float32),   # uu1
                   jax.ShapeDtypeStruct((n_shots, nt, NX), jnp.float32),   # seismo_v_d
                   jax.ShapeDtypeStruct((n_shots, NZ, NX), jnp.float32)),  # illum_div1
        grid=(n_shots,),
        in_specs=[pl.BlockSpec(memory_space=pltpu.SMEM),   # wavelet s (shared)
                  pl.BlockSpec(memory_space=pltpu.SMEM),   # per-shot source col
                  shared2d, shared2d, shared2d, shared2d, shared2d],
        out_specs=(pl.BlockSpec((None, NZ, NX), lambda i: (i, 0, 0)),
                   pl.BlockSpec((None, nt, NX), lambda i: (i, 0, 0)),
                   pl.BlockSpec((None, NZ, NX), lambda i: (i, 0, 0))),
        scratch_shapes=[pltpu.VMEM((NZ, NX), jnp.float32)  # cl, ca-cl, cm, b,
                        for _ in range(9)],                # src + 4 edge masks
        compiler_params=pltpu.CompilerParams(
            # shots are independent: uses both TensorCores on v7x, amortizes
            # dispatch / per-step pipeline overhead on v5e/v6e.
            dimension_semantics=("parallel",),
            # demo grid needs ~0.3 MiB; raise the scoped limit so the
            # all-resident design keeps working for production model sizes.
            # TODO(synk): add a z-tiled variant with halo rows once NZ*NX
            # exceeds ~1.6M points (v7x 64 MiB VMEM, per-TC).
            vmem_limit_bytes=32 * 1024 * 1024),
    )(s, src_cols, vp1, vs1, den, denm0, denm2)


# -----------------------------------------------------------------------------
# Glue mirroring fd2d (parameters + forward).
# -----------------------------------------------------------------------------
def pad_model(m, nbc, pad_top):
    # `pad` is not defined in the source file; standard FWI edge-replicate
    # padding: pad_top rows on top, nbc rows at bottom, nbc columns each side.
    return jnp.pad(m, ((pad_top, nbc), (nbc, nbc)), mode="edge")


class FD2D:
    """JAX/Pallas port of the PyTorch fd2d module."""

    def __init__(self, vp0, vs0, denm0, denm2):
        self.params1 = jnp.asarray(vp0, jnp.float32)   # (26, 120)
        self.params2 = jnp.asarray(vs0, jnp.float32)   # (26, 120)
        self.denm0 = jnp.asarray(denm0, jnp.float32)
        self.denm2 = jnp.asarray(denm2, jnp.float32)

    def _run(self, sx_model, input_vector, s, den):
        nbc = int(input_vector[16])
        pad_top = int(input_vector[17])
        dtx = float(input_vector[3])
        vp1 = pad_model(self.params1, nbc, pad_top)
        vs1 = pad_model(self.params2, nbc, pad_top)
        src_cols = sx_model + nbc                       # column in padded grid
        return fd2d_forward_pallas(
            vp1, vs1, den, self.denm0, self.denm2, s, src_cols,
            dtx=dtx, pad_top=pad_top, src_z=pad_top, rec_z=pad_top)

    def forward(self, sx, rank, input_vector, temp, s, den):
        """Per-rank API mirroring the PyTorch module (single shot)."""
        del temp  # workspace tensor in the original API; unused here
        src_x_model = int(sx[rank])
        input_vector = input_vector.at[6].set(src_x_model)   # mirrors in-place set
        uu, seis, illum = self._run(
            jnp.array([src_x_model], jnp.int32), input_vector, s, den)
        return uu[0], seis[0], illum[0]

    def forward_shots(self, sx, input_vector, temp, s, den):
        """All shots in ONE pallas_call: grid=(n_shots,), parallel axis."""
        del temp
        return self._run(jnp.asarray(sx, jnp.int32), input_vector, s, den)


# -----------------------------------------------------------------------------
if __name__ == "__main__":
    key = jax.random.PRNGKey(0)
    k1, k2 = jax.random.split(key, 2)

    nz, nx = 26, 120            # model size fixed by the module's Parameter shape
    nbc, pad_top = 4, 2
    NZ, NX = nz + pad_top + nbc, nx + 2 * nbc   # (32, 128)
    nt = 8

    vp0 = 2000.0 + 50.0 * jax.random.normal(k1, (nz, nx), dtype=jnp.float32)
    vs0 = vp0 / 1.73
    den = 2.0 + 0.05 * jax.random.normal(k2, (NZ, NX), dtype=jnp.float32)
    denm0 = jnp.ones((NZ, NX), jnp.float32)
    denm2 = jnp.ones((NZ, NX), jnp.float32)

    dt, dx = 5e-4, 10.0
    input_vector = jnp.zeros((20,), jnp.float32)
    input_vector = input_vector.at[3].set(dt / dx)   # dtx
    input_vector = input_vector.at[16].set(nbc)      # nbc
    input_vector = input_vector.at[17].set(pad_top)  # pad_top

    sx = jnp.array([60, 64, 68, 72], dtype=jnp.int32)
    n_shots = int(sx.shape[0])

    # Ricker source wavelet (deterministic)
    t_axis = jnp.arange(nt, dtype=jnp.float32) * dt
    f0 = 25.0
    arg = (jnp.pi * f0 * (t_axis - 1.0 / f0)) ** 2
    s = (1.0 - 2.0 * arg) * jnp.exp(-arg)

    temp = jnp.zeros((NZ, NX), jnp.float32)

    model = FD2D(vp0, vs0, denm0, denm2)
    # Batched multi-shot forward: one pallas_call, shot grid axis marked
    # "parallel" (both TensorCores on v7x; amortized overhead on v5e/v6e).
    uu1, seismo_v_d, illum_div1 = model.forward_shots(
        sx, input_vector, temp, s, den)
    jax.block_until_ready((uu1, seismo_v_d, illum_div1))

    assert uu1.shape == (n_shots, NZ, NX)
    assert seismo_v_d.shape == (n_shots, nt, NX)
    assert illum_div1.shape == (n_shots, NZ, NX)
    assert bool(jnp.all(jnp.isfinite(uu1)))
    assert bool(jnp.all(jnp.isfinite(seismo_v_d)))
    assert bool(jnp.all(jnp.isfinite(illum_div1)))
    print("KERNEL_OK")
</pallas_src>

<mosaic_0001>
module attributes {stable_mosaic.version = 11 : i64} {
  func.func @_fd2d_kernel(%arg0: i32, %arg1: memref<8xf32, #tpu.memory_space<smem>>, %arg2: memref<4xi32, #tpu.memory_space<smem>>, %arg3: memref<32x128xf32, #tpu.memory_space<vmem>>, %arg4: memref<32x128xf32, #tpu.memory_space<vmem>>, %arg5: memref<32x128xf32, #tpu.memory_space<vmem>>, %arg6: memref<32x128xf32, #tpu.memory_space<vmem>>, %arg7: memref<32x128xf32, #tpu.memory_space<vmem>>, %arg8: memref<1x32x128xf32, #tpu.memory_space<vmem>>, %arg9: memref<1x8x128xf32, #tpu.memory_space<vmem>>, %arg10: memref<1x32x128xf32, #tpu.memory_space<vmem>>, %arg11: memref<32x128xf32, #tpu.memory_space<vmem>>, %arg12: memref<32x128xf32, #tpu.memory_space<vmem>>, %arg13: memref<32x128xf32, #tpu.memory_space<vmem>>, %arg14: memref<32x128xf32, #tpu.memory_space<vmem>>, %arg15: memref<32x128xf32, #tpu.memory_space<vmem>>, %arg16: memref<32x128xf32, #tpu.memory_space<vmem>>, %arg17: memref<32x128xf32, #tpu.memory_space<vmem>>, %arg18: memref<32x128xf32, #tpu.memory_space<vmem>>, %arg19: memref<32x128xf32, #tpu.memory_space<vmem>>) attributes {dimension_semantics = [#tpu.dimension_semantics<parallel>], iteration_bounds = array<i64: 4>, scalar_prefetch = 0 : i64, scratch_operands = 9 : i64, tpu.core_type = #tpu.core_type<tc>, window_params = [{transform_indices = @transform_0, window_bounds = array<i64: 8>}, {transform_indices = @transform_1, window_bounds = array<i64: 4>}, {pipeline_mode = #tpu.pipeline_mode<synchronous>, transform_indices = @transform_2, window_bounds = array<i64: 32, 128>}, {pipeline_mode = #tpu.pipeline_mode<synchronous>, transform_indices = @transform_3, window_bounds = array<i64: 32, 128>}, {pipeline_mode = #tpu.pipeline_mode<synchronous>, transform_indices = @transform_4, window_bounds = array<i64: 32, 128>}, {pipeline_mode = #tpu.pipeline_mode<synchronous>, transform_indices = @transform_5, window_bounds = array<i64: 32, 128>}, {pipeline_mode = #tpu.pipeline_mode<synchronous>, transform_indices = @transform_6, window_bounds = array<i64: 32, 128>}, {transform_indices = @transform_7, window_bounds = array<i64: 1, 32, 128>}, {transform_indices = @transform_8, window_bounds = array<i64: 1, 8, 128>}, {transform_indices = @transform_9, window_bounds = array<i64: 1, 32, 128>}]} {
    %c0 = arith.constant 0 : index
    %c0_0 = arith.constant 0 : index
    %0 = vector.load %arg3[%c0, %c0_0] : memref<32x128xf32, #tpu.memory_space<vmem>>, vector<32x128xf32>
    %c0_1 = arith.constant 0 : index
    %c0_2 = arith.constant 0 : index
    %1 = vector.load %arg4[%c0_1, %c0_2] : memref<32x128xf32, #tpu.memory_space<vmem>>, vector<32x128xf32>
    %c0_3 = arith.constant 0 : index
    %c0_4 = arith.constant 0 : index
    %2 = vector.load %arg5[%c0_3, %c0_4] : memref<32x128xf32, #tpu.memory_space<vmem>>, vector<32x128xf32>
    %3 = arith.mulf %0, %0 : vector<32x128xf32>
    %4 = arith.mulf %3, %2 : vector<32x128xf32>
    %5 = arith.mulf %1, %1 : vector<32x128xf32>
    %6 = arith.mulf %5, %2 : vector<32x128xf32>
    %cst = arith.constant 2.000000e+00 : f32
    %7 = vector.broadcast %cst : f32 to vector<32x128xf32>
    %8 = arith.mulf %7, %6 : vector<32x128xf32>
    %9 = arith.subf %4, %8 : vector<32x128xf32>
    %c0_5 = arith.constant 0 : index
    %c0_6 = arith.constant 0 : index
    %10 = vector.load %arg6[%c0_5, %c0_6] : memref<32x128xf32, #tpu.memory_space<vmem>>, vector<32x128xf32>
    %11 = arith.mulf %9, %10 : vector<32x128xf32>
    %12 = tpu.iota {dimensions = array<i32: 0>} : vector<32x128xi32>
    %13 = tpu.iota {dimensions = array<i32: 1>} : vector<32x128xi32>
    %c1_i32 = arith.constant 1 : i32
    %14 = vector.broadcast %c1_i32 : i32 to vector<32x128xi32>
    %15 = arith.cmpi eq, %12, %14 : vector<32x128xi32>
    %cst_7 = arith.constant 2.000000e+00 : f32
    %16 = vector.broadcast %cst_7 : f32 to vector<32x128xf32>
    %17 = arith.mulf %16, %6 : vector<32x128xf32>
    %18 = arith.select %15, %17, %4 : vector<32x128xi1>, vector<32x128xf32>
    %cst_8 = arith.constant 5.000000e-05 : f32
    %19 = vector.broadcast %cst_8 : f32 to vector<32x128xf32>
    %20 = arith.mulf %19, %11 : vector<32x128xf32>
    %c0_9 = arith.constant 0 : index
    %c0_10 = arith.constant 0 : index
    %21 = vector.load %arg11[%c0_9, %c0_10] : memref<32x128xf32, #tpu.memory_space<vmem>>, vector<32x128xf32>
    tpu.vector_store %arg11[%c0_9, %c0_10], %20 {strides = array<i32>} : memref<32x128xf32, #tpu.memory_space<vmem>>, vector<32x128xf32>,
    %22 = arith.subf %18, %11 : vector<32x128xf32>
    %cst_11 = arith.constant 5.000000e-05 : f32
    %23 = vector.broadcast %cst_11 : f32 to vector<32x128xf32>
    %24 = arith.mulf %23, %22 : vector<32x128xf32>
    %c0_12 = arith.constant 0 : index
    %c0_13 = arith.constant 0 : index
    %25 = vector.load %arg12[%c0_12, %c0_13] : memref<32x128xf32, #tpu.memory_space<vmem>>, vector<32x128xf32>
    tpu.vector_store %arg12[%c0_12, %c0_13], %24 {strides = array<i32>} : memref<32x128xf32, #tpu.memory_space<vmem>>, vector<32x128xf32>,
    %cst_14 = arith.constant 5.000000e-05 : f32
    %26 = vector.broadcast %cst_14 : f32 to vector<32x128xf32>
    %27 = arith.mulf %26, %6 : vector<32x128xf32>
    %c0_15 = arith.constant 0 : index
    %c0_16 = arith.constant 0 : index
    %28 = vector.load %arg13[%c0_15, %c0_16] : memref<32x128xf32, #tpu.memory_space<vmem>>, vector<32x128xf32>
    tpu.vector_store %arg13[%c0_15, %c0_16], %27 {strides = array<i32>} : memref<32x128xf32, #tpu.memory_space<vmem>>, vector<32x128xf32>,
    %cst_17 = arith.constant 5.000000e-05 : f32
    %29 = vector.broadcast %cst_17 : f32 to vector<32x128xf32>
    %30 = arith.divf %29, %2 : vector<32x128xf32>
    %c0_18 = arith.constant 0 : index
    %c0_19 = arith.constant 0 : index
    %31 = vector.load %arg7[%c0_18, %c0_19] : memref<32x128xf32, #tpu.memory_space<vmem>>, vector<32x128xf32>
    %32 = arith.mulf %30, %31 : vector<32x128xf32>
    %c0_20 = arith.constant 0 : index
    %c0_21 = arith.constant 0 : index
    %33 = vector.load %arg14[%c0_20, %c0_21] : memref<32x128xf32, #tpu.memory_space<vmem>>, vector<32x128xf32>
    tpu.vector_store %arg14[%c0_20, %c0_21], %32 {strides = array<i32>} : memref<32x128xf32, #tpu.memory_space<vmem>>, vector<32x128xf32>,
    %34 = arith.index_cast %arg0 : i32 to index
    %35 = memref.load %arg2[%34] : memref<4xi32, #tpu.memory_space<smem>>
    %c2_i32 = arith.constant 2 : i32
    %36 = vector.broadcast %c2_i32 : i32 to vector<32x128xi32>
    %37 = arith.cmpi eq, %12, %36 : vector<32x128xi32>
    %38 = vector.broadcast %35 : i32 to vector<32x128xi32>
    %39 = arith.cmpi eq, %13, %38 : vector<32x128xi32>
    %40 = arith.andi %37, %39 : vector<32x128xi1>
    %41 = arith.extui %40 : vector<32x128xi1> to vector<32x128xi32>
    %42 = arith.sitofp %41 : vector<32x128xi32> to vector<32x128xf32>
    %c0_22 = arith.constant 0 : index
    %c0_23 = arith.constant 0 : index
    %43 = vector.load %arg15[%c0_22, %c0_23] : memref<32x128xf32, #tpu.memory_space<vmem>>, vector<32x128xf32>
    tpu.vector_store %arg15[%c0_22, %c0_23], %42 {strides = array<i32>} : memref<32x128xf32, #tpu.memory_space<vmem>>, vector<32x128xf32>,
    %c0_i32 = arith.constant 0 : i32
    %44 = vector.broadcast %c0_i32 : i32 to vector<32x128xi32>
    %45 = arith.cmpi sgt, %13, %44 : vector<32x128xi32>
    %46 = arith.extui %45 : vector<32x128xi1> to vector<32x128xi32>
    %47 = arith.sitofp %46 : vector<32x128xi32> to vector<32x128xf32>
    %c0_24 = arith.constant 0 : index
    %c0_25 = arith.constant 0 : index
    %48 = vector.load %arg16[%c0_24, %c0_25] : memref<32x128xf32, #tpu.memory_space<vmem>>, vector<32x128xf32>
    tpu.vector_store %arg16[%c0_24, %c0_25], %47 {strides = array<i32>} : memref<32x128xf32, #tpu.memory_space<vmem>>, vector<32x128xf32>,
    %c127_i32 = arith.constant 127 : i32
    %49 = vector.broadcast %c127_i32 : i32 to vector<32x128xi32>
    %50 = arith.cmpi slt, %13, %49 : vector<32x128xi32>
    %51 = arith.extui %50 : vector<32x128xi1> to vector<32x128xi32>
    %52 = arith.sitofp %51 : vector<32x128xi32> to vector<32x128xf32>
    %c0_26 = arith.constant 0 : index
    %c0_27 = arith.constant 0 : index
    %53 = vector.load %arg17[%c0_26, %c0_27] : memref<32x128xf32, #tpu.memory_space<vmem>>, vector<32x128xf32>
    tpu.vector_store %arg17[%c0_26, %c0_27], %52 {strides = array<i32>} : memref<32x128xf32, #tpu.memory_space<vmem>>, vector<32x128xf32>,
    %c0_i32_28 = arith.constant 0 : i32
    %54 = vector.broadcast %c0_i32_28 : i32 to vector<32x128xi32>
    %55 = arith.cmpi sgt, %12, %54 : vector<32x128xi32>
    %56 = arith.extui %55 : vector<32x128xi1> to vector<32x128xi32>
    %57 = arith.sitofp %56 : vector<32x128xi32> to vector<32x128xf32>
    %c0_29 = arith.constant 0 : index
    %c0_30 = arith.constant 0 : index
    %58 = vector.load %arg18[%c0_29, %c0_30] : memref<32x128xf32, #tpu.memory_space<vmem>>, vector<32x128xf32>
    tpu.vector_store %arg18[%c0_29, %c0_30], %57 {strides = array<i32>} : memref<32x128xf32, #tpu.memory_space<vmem>>, vector<32x128xf32>,
    %c31_i32 = arith.constant 31 : i32
    %59 = vector.broadcast %c31_i32 : i32 to vector<32x128xi32>
    %60 = arith.cmpi slt, %12, %59 : vector<32x128xi32>
    %61 = arith.extui %60 : vector<32x128xi1> to vector<32x128xi32>
    %62 = arith.sitofp %61 : vector<32x128xi32> to vector<32x128xf32>
    %c0_31 = arith.constant 0 : index
    %c0_32 = arith.constant 0 : index
    %63 = vector.load %arg19[%c0_31, %c0_32] : memref<32x128xf32, #tpu.memory_space<vmem>>, vector<32x128xf32>
    tpu.vector_store %arg19[%c0_31, %c0_32], %62 {strides = array<i32>} : memref<32x128xf32, #tpu.memory_space<vmem>>, vector<32x128xf32>,
    %cst_33 = arith.constant 0.000000e+00 : f32
    %64 = vector.broadcast %cst_33 : f32 to vector<32x128xf32>
    %c0_i32_34 = arith.constant 0 : i32
    %c0_35 = arith.constant 0 : index
    %c0_36 = arith.constant 0 : index
    %65 = vector.load %arg11[%c0_35, %c0_36] : memref<32x128xf32, #tpu.memory_space<vmem>>, vector<32x128xf32>
    %c0_37 = arith.constant 0 : index
    %c0_38 = arith.constant 0 : index
    %66 = vector.load %arg12[%c0_37, %c0_38] : memref<32x128xf32, #tpu.memory_space<vmem>>, vector<32x128xf32>
    %c0_39 = arith.constant 0 : index
    %c0_40 = arith.constant 0 : index
    %67 = vector.load %arg13[%c0_39, %c0_40] : memref<32x128xf32, #tpu.memory_space<vmem>>, vector<32x128xf32>
    %c0_41 = arith.constant 0 : index
    %c0_42 = arith.constant 0 : index
    %68 = vector.load %arg14[%c0_41, %c0_42] : memref<32x128xf32, #tpu.memory_space<vmem>>, vector<32x128xf32>
    %c0_43 = arith.constant 0 : index
    %c0_44 = arith.constant 0 : index
    %69 = vector.load %arg16[%c0_43, %c0_44] : memref<32x128xf32, #tpu.memory_space<vmem>>, vector<32x128xf32>
    %c1_i32_45 = arith.constant 1 : i32
    %70 = tpu.dynamic_rotate %64 by %c1_i32_45 dim 1 : vector<32x128xf32>, i32 -> vector<32x128xf32>
    %71 = arith.subf %64, %70 : vector<32x128xf32>
    %72 = arith.mulf %69, %71 : vector<32x128xf32>
    %c0_46 = arith.constant 0 : index
    %c0_47 = arith.constant 0 : index
    %73 = vector.load %arg18[%c0_46, %c0_47] : memref<32x128xf32, #tpu.memory_space<vmem>>, vector<32x128xf32>
    %c1_i32_48 = arith.constant 1 : i32
    %74 = tpu.dynamic_rotate %64 by %c1_i32_48 dim 0 : vector<32x128xf32>, i32 -> vector<32x128xf32>
    %75 = arith.subf %64, %74 : vector<32x128xf32>
    %76 = arith.mulf %73, %75 : vector<32x128xf32>
    %77 = arith.addf %72, %76 : vector<32x128xf32>
    %78 = arith.mulf %68, %77 : vector<32x128xf32>
    %79 = arith.addf %64, %78 : vector<32x128xf32>
    %c0_49 = arith.constant 0 : index
    %c0_50 = arith.constant 0 : index
    %80 = vector.load %arg17[%c0_49, %c0_50] : memref<32x128xf32, #tpu.memory_space<vmem>>, vector<32x128xf32>
    %c127_i32_51 = arith.constant 127 : i32
    %81 = tpu.dynamic_rotate %64 by %c127_i32_51 dim 1 : vector<32x128xf32>, i32 -> vector<32x128xf32>
    %82 = arith.subf %81, %64 : vector<32x128xf32>
    %83 = arith.mulf %80, %82 : vector<32x128xf32>
    %c0_52 = arith.constant 0 : index
    %c0_53 = arith.constant 0 : index
    %84 = vector.load %arg19[%c0_52, %c0_53] : memref<32x128xf32, #tpu.memory_space<vmem>>, vector<32x128xf32>
    %c31_i32_54 = arith.constant 31 : i32
    %85 = tpu.dynamic_rotate %64 by %c31_i32_54 dim 0 : vector<32x128xf32>, i32 -> vector<32x128xf32>
    %86 = arith.subf %85, %64 : vector<32x128xf32>
    %87 = arith.mulf %84, %86 : vector<32x128xf32>
    %88 = arith.addf %83, %87 : vector<32x128xf32>
    %89 = arith.mulf %68, %88 : vector<32x128xf32>
    %90 = arith.addf %64, %89 : vector<32x128xf32>
    %c0_55 = arith.constant 0 : index
    %c0_56 = arith.constant 0 : index
    %91 = vector.load %arg17[%c0_55, %c0_56] : memref<32x128xf32, #tpu.memory_space<vmem>>, vector<32x128xf32>
    %c127_i32_57 = arith.constant 127 : i32
    %92 = tpu.dynamic_rotate %79 by %c127_i32_57 dim 1 : vector<32x128xf32>, i32 -> vector<32x128xf32>
    %93 = arith.subf %92, %79 : vector<32x128xf32>
    %94 = arith.mulf %91, %93 : vector<32x128xf32>
    %c0_58 = arith.constant 0 : index
    %c0_59 = arith.constant 0 : index
    %95 = vector.load %arg18[%c0_58, %c0_59] : memref<32x128xf32, #tpu.memory_space<vmem>>, vector<32x128xf32>
    %c1_i32_60 = arith.constant 1 : i32
    %96 = tpu.dynamic_rotate %90 by %c1_i32_60 dim 0 : vector<32x128xf32>, i32 -> vector<32x128xf32>
    %97 = arith.subf %90, %96 : vector<32x128xf32>
    %98 = arith.mulf %95, %97 : vector<32x128xf32>
    %99 = arith.addf %94, %98 : vector<32x128xf32>
    %100 = arith.mulf %99, %99 : vector<32x128xf32>
    %101 = arith.addf %64, %100 : vector<32x128xf32>
    %102 = arith.mulf %65, %99 : vector<32x128xf32>
    %c0_61 = arith.constant 0 : index
    %c0_62 = arith.constant 0 : index
    %103 = vector.load %arg15[%c0_61, %c0_62] : memref<32x128xf32, #tpu.memory_space<vmem>>, vector<32x128xf32>
    %104 = arith.index_cast %c0_i32_34 : i32 to index
    %105 = memref.load %arg1[%104] : memref<8xf32, #tpu.memory_space<smem>>
    %106 = vector.broadcast %105 : f32 to vector<32x128xf32>
    %107 = arith.mulf %103, %106 : vector<32x128xf32>
    %108 = arith.addf %102, %107 : vector<32x128xf32>
    %109 = arith.addf %64, %108 : vector<32x128xf32>
    %110 = arith.mulf %66, %94 : vector<32x128xf32>
    %111 = arith.addf %109, %110 : vector<32x128xf32>
    %112 = arith.addf %64, %108 : vector<32x128xf32>
    %113 = arith.mulf %66, %98 : vector<32x128xf32>
    %114 = arith.addf %112, %113 : vector<32x128xf32>
    %c0_63 = arith.constant 0 : index
    %c0_64 = arith.constant 0 : index
    %115 = vector.load %arg19[%c0_63, %c0_64] : memref<32x128xf32, #tpu.memory_space<vmem>>, vector<32x128xf32>
    %c31_i32_65 = arith.constant 31 : i32
    %116 = tpu.dynamic_rotate %79 by %c31_i32_65 dim 0 : vector<32x128xf32>, i32 -> vector<32x128xf32>
    %117 = arith.subf %116, %79 : vector<32x128xf32>
    %118 = arith.mulf %115, %117 : vector<32x128xf32>
    %c0_66 = arith.constant 0 : index
    %c0_67 = arith.constant 0 : index
    %119 = vector.load %arg16[%c0_66, %c0_67] : memref<32x128xf32, #tpu.memory_space<vmem>>, vector<32x128xf32>
    %c1_i32_68 = arith.constant 1 : i32
    %120 = tpu.dynamic_rotate %90 by %c1_i32_68 dim 1 : vector<32x128xf32>, i32 -> vector<32x128xf32>
    %121 = arith.subf %90, %120 : vector<32x128xf32>
    %122 = arith.mulf %119, %121 : vector<32x128xf32>
    %123 = arith.addf %118, %122 : vector<32x128xf32>
    %124 = arith.mulf %67, %123 : vector<32x128xf32>
    %125 = arith.addf %64, %124 : vector<32x128xf32>
    %126 = vector.extract_strided_slice %90 {offsets = [2, 0], sizes = [1, 128], strides = [1, 1]} : vector<32x128xf32> to vector<1x128xf32>
    %c0_69 = arith.constant 0 : index
    %127 = arith.index_cast %c0_i32_34 : i32 to index
    %c0_70 = arith.constant 0 : index
    %128 = vector.load %arg9[%c0_69, %127, %c0_70] : memref<1x8x128xf32, #tpu.memory_space<vmem>>, vector<1x1x128xf32>
    %129 = vector.shape_cast %128 : vector<1x1x128xf32> to vector<1x128xf32>
    %130 = vector.shape_cast %126 : vector<1x128xf32> to vector<1x1x128xf32>
    tpu.vector_store %arg9[%c0_69, %127, %c0_70], %130 {strides = array<i32>} : memref<1x8x128xf32, #tpu.memory_space<vmem>>, vector<1x1x128xf32>,
    %c1_i32_71 = arith.constant 1 : i32
    %c0_72 = arith.constant 0 : index
    %c0_73 = arith.constant 0 : index
    %131 = vector.load %arg11[%c0_72, %c0_73] : memref<32x128xf32, #tpu.memory_space<vmem>>, vector<32x128xf32>
    %c0_74 = arith.constant 0 : index
    %c0_75 = arith.constant 0 : index
    %132 = vector.load %arg12[%c0_74, %c0_75] : memref<32x128xf32, #tpu.memory_space<vmem>>, vector<32x128xf32>
    %c0_76 = arith.constant 0 : index
    %c0_77 = arith.constant 0 : index
    %133 = vector.load %arg13[%c0_76, %c0_77] : memref<32x128xf32, #tpu.memory_space<vmem>>, vector<32x128xf32>
    %c0_78 = arith.constant 0 : index
    %c0_79 = arith.constant 0 : index
    %134 = vector.load %arg14[%c0_78, %c0_79] : memref<32x128xf32, #tpu.memory_space<vmem>>, vector<32x128xf32>
    %c0_80 = arith.constant 0 : index
    %c0_81 = arith.constant 0 : index
    %135 = vector.load %arg16[%c0_80, %c0_81] : memref<32x128xf32, #tpu.memory_space<vmem>>, vector<32x128xf32>
    %c1_i32_82 = arith.constant 1 : i32
    %136 = tpu.dynamic_rotate %111 by %c1_i32_82 dim 1 : vector<32x128xf32>, i32 -> vector<32x128xf32>
    %137 = arith.subf %111, %136 : vector<32x128xf32>
    %138 = arith.mulf %135, %137 : vector<32x128xf32>
    %c0_83 = arith.constant 0 : index
    %c0_84 = arith.constant 0 : index
    %139 = vector.load %arg18[%c0_83, %c0_84] : memref<32x128xf32, #tpu.memory_space<vmem>>, vector<32x128xf32>
    %c1_i32_85 = arith.constant 1 : i32
    %140 = tpu.dynamic_rotate %125 by %c1_i32_85 dim 0 : vector<32x128xf32>, i32 -> vector<32x128xf32>
    %141 = arith.subf %125, %140 : vector<32x128xf32>
    %142 = arith.mulf %139, %141 : vector<32x128xf32>
    %143 = arith.addf %138, %142 : vector<32x128xf32>
    %144 = arith.mulf %134, %143 : vector<32x128xf32>
    %145 = arith.addf %79, %144 : vector<32x128xf32>
    %c0_86 = arith.constant 0 : index
    %c0_87 = arith.constant 0 : index
    %146 = vector.load %arg17[%c0_86, %c0_87] : memref<32x128xf32, #tpu.memory_space<vmem>>, vector<32x128xf32>
    %c127_i32_88 = arith.constant 127 : i32
    %147 = tpu.dynamic_rotate %125 by %c127_i32_88 dim 1 : vector<32x128xf32>, i32 -> vector<32x128xf32>
    %148 = arith.subf %147, %125 : vector<32x128xf32>
    %149 = arith.mulf %146, %148 : vector<32x128xf32>
    %c0_89 = arith.constant 0 : index
    %c0_90 = arith.constant 0 : index
    %150 = vector.load %arg19[%c0_89, %c0_90] : memref<32x128xf32, #tpu.memory_space<vmem>>, vector<32x128xf32>
    %c31_i32_91 = arith.constant 31 : i32
    %151 = tpu.dynamic_rotate %114 by %c31_i32_91 dim 0 : vector<32x128xf32>, i32 -> vector<32x128xf32>
    %152 = arith.subf %151, %114 : vector<32x128xf32>
    %153 = arith.mulf %150, %152 : vector<32x128xf32>
    %154 = arith.addf %149, %153 : vector<32x128xf32>
    %155 = arith.mulf %134, %154 : vector<32x128xf32>
    %156 = arith.addf %90, %155 : vector<32x128xf32>
    %c0_92 = arith.constant 0 : index
    %c0_93 = arith.constant 0 : index
    %157 = vector.load %arg17[%c0_92, %c0_93] : memref<32x128xf32, #tpu.memory_space<vmem>>, vector<32x128xf32>
    %c127_i32_94 = arith.constant 127 : i32
    %158 = tpu.dynamic_rotate %145 by %c127_i32_94 dim 1 : vector<32x128xf32>, i32 -> vector<32x128xf32>
    %159 = arith.subf %158, %145 : vector<32x128xf32>
    %160 = arith.mulf %157, %159 : vector<32x128xf32>
    %c0_95 = arith.constant 0 : index
    %c0_96 = arith.constant 0 : index
    %161 = vector.load %arg18[%c0_95, %c0_96] : memref<32x128xf32, #tpu.memory_space<vmem>>, vector<32x128xf32>
    %c1_i32_97 = arith.constant 1 : i32
    %162 = tpu.dynamic_rotate %156 by %c1_i32_97 dim 0 : vector<32x128xf32>, i32 -> vector<32x128xf32>
    %163 = arith.subf %156, %162 : vector<32x128xf32>
    %164 = arith.mulf %161, %163 : vector<32x128xf32>
    %165 = arith.addf %160, %164 : vector<32x128xf32>
    %166 = arith.mulf %165, %165 : vector<32x128xf32>
    %167 = arith.addf %101, %166 : vector<32x128xf32>
    %168 = arith.mulf %131, %165 : vector<32x128xf32>
    %c0_98 = arith.constant 0 : index
    %c0_99 = arith.constant 0 : index
    %169 = vector.load %arg15[%c0_98, %c0_99] : memref<32x128xf32, #tpu.memory_space<vmem>>, vector<32x128xf32>
    %170 = arith.index_cast %c1_i32_71 : i32 to index
    %171 = memref.load %arg1[%170] : memref<8xf32, #tpu.memory_space<smem>>
    %172 = vector.broadcast %171 : f32 to vector<32x128xf32>
    %173 = arith.mulf %169, %172 : vector<32x128xf32>
    %174 = arith.addf %168, %173 : vector<32x128xf32>
    %175 = arith.addf %111, %174 : vector<32x128xf32>
    %176 = arith.mulf %132, %160 : vector<32x128xf32>
    %177 = arith.addf %175, %176 : vector<32x128xf32>
    %178 = arith.addf %114, %174 : vector<32x128xf32>
    %179 = arith.mulf %132, %164 : vector<32x128xf32>
    %180 = arith.addf %178, %179 : vector<32x128xf32>
    %c0_100 = arith.constant 0 : index
    %c0_101 = arith.constant 0 : index
    %181 = vector.load %arg19[%c0_100, %c0_101] : memref<32x128xf32, #tpu.memory_space<vmem>>, vector<32x128xf32>
    %c31_i32_102 = arith.constant 31 : i32
    %182 = tpu.dynamic_rotate %145 by %c31_i32_102 dim 0 : vector<32x128xf32>, i32 -> vector<32x128xf32>
    %183 = arith.subf %182, %145 : vector<32x128xf32>
    %184 = arith.mulf %181, %183 : vector<32x128xf32>
    %c0_103 = arith.constant 0 : index
    %c0_104 = arith.constant 0 : index
    %185 = vector.load %arg16[%c0_103, %c0_104] : memref<32x128xf32, #tpu.memory_space<vmem>>, vector<32x128xf32>
    %c1_i32_105 = arith.constant 1 : i32
    %186 = tpu.dynamic_rotate %156 by %c1_i32_105 dim 1 : vector<32x128xf32>, i32 -> vector<32x128xf32>
    %187 = arith.subf %156, %186 : vector<32x128xf32>
    %188 = arith.mulf %185, %187 : vector<32x128xf32>
    %189 = arith.addf %184, %188 : vector<32x128xf32>
    %190 = arith.mulf %133, %189 : vector<32x128xf32>
    %191 = arith.addf %125, %190 : vector<32x128xf32>
    %192 = vector.extract_strided_slice %156 {offsets = [2, 0], sizes = [1, 128], strides = [1, 1]} : vector<32x128xf32> to vector<1x128xf32>
    %c0_106 = arith.constant 0 : index
    %193 = arith.index_cast %c1_i32_71 : i32 to index
    %c0_107 = arith.constant 0 : index
    %194 = vector.load %arg9[%c0_106, %193, %c0_107] : memref<1x8x128xf32, #tpu.memory_space<vmem>>, vector<1x1x128xf32>
    %195 = vector.shape_cast %194 : vector<1x1x128xf32> to vector<1x128xf32>
    %196 = vector.shape_cast %192 : vector<1x128xf32> to vector<1x1x128xf32>
    tpu.vector_store %arg9[%c0_106, %193, %c0_107], %196 {strides = array<i32>} : memref<1x8x128xf32, #tpu.memory_space<vmem>>, vector<1x1x128xf32>,
    %c2_i32_108 = arith.constant 2 : i32
    %c0_109 = arith.constant 0 : index
    %c0_110 = arith.constant 0 : index
    %197 = vector.load %arg11[%c0_109, %c0_110] : memref<32x128xf32, #tpu.memory_space<vmem>>, vector<32x128xf32>
    %c0_111 = arith.constant 0 : index
    %c0_112 = arith.constant 0 : index
    %198 = vector.load %arg12[%c0_111, %c0_112] : memref<32x128xf32, #tpu.memory_space<vmem>>, vector<32x128xf32>
    %c0_113 = arith.constant 0 : index
    %c0_114 = arith.constant 0 : index
    %199 = vector.load %arg13[%c0_113, %c0_114] : memref<32x128xf32, #tpu.memory_space<vmem>>, vector<32x128xf32>
    %c0_115 = arith.constant 0 : index
    %c0_116 = arith.constant 0 : index
    %200 = vector.load %arg14[%c0_115, %c0_116] : memref<32x128xf32, #tpu.memory_space<vmem>>, vector<32x128xf32>
    %c0_117 = arith.constant 0 : index
    %c0_118 = arith.constant 0 : index
    %201 = vector.load %arg16[%c0_117, %c0_118] : memref<32x128xf32, #tpu.memory_space<vmem>>, vector<32x128xf32>
    %c1_i32_119 = arith.constant 1 : i32
    %202 = tpu.dynamic_rotate %177 by %c1_i32_119 dim 1 : vector<32x128xf32>, i32 -> vector<32x128xf32>
    %203 = arith.subf %177, %202 : vector<32x128xf32>
    %204 = arith.mulf %201, %203 : vector<32x128xf32>
    %c0_120 = arith.constant 0 : index
    %c0_121 = arith.constant 0 : index
    %205 = vector.load %arg18[%c0_120, %c0_121] : memref<32x128xf32, #tpu.memory_space<vmem>>, vector<32x128xf32>
    %c1_i32_122 = arith.constant 1 : i32
    %206 = tpu.dynamic_rotate %191 by %c1_i32_122 dim 0 : vector<32x128xf32>, i32 -> vector<32x128xf32>
    %207 = arith.subf %191, %206 : vector<32x128xf32>
    %208 = arith.mulf %205, %207 : vector<32x128xf32>
    %209 = arith.addf %204, %208 : vector<32x128xf32>
    %210 = arith.mulf %200, %209 : vector<32x128xf32>
    %211 = arith.addf %145, %210 : vector<32x128xf32>
    %c0_123 = arith.constant 0 : index
    %c0_124 = arith.constant 0 : index
    %212 = vector.load %arg17[%c0_123, %c0_124] : memref<32x128xf32, #tpu.memory_space<vmem>>, vector<32x128xf32>
    %c127_i32_125 = arith.constant 127 : i32
    %213 = tpu.dynamic_rotate %191 by %c127_i32_125 dim 1 : vector<32x128xf32>, i32 -> vector<32x128xf32>
    %214 = arith.subf %213, %191 : vector<32x128xf32>
    %215 = arith.mulf %212, %214 : vector<32x128xf32>
    %c0_126 = arith.constant 0 : index
    %c0_127 = arith.constant 0 : index
    %216 = vector.load %arg19[%c0_126, %c0_127] : memref<32x128xf32, #tpu.memory_space<vmem>>, vector<32x128xf32>
    %c31_i32_128 = arith.constant 31 : i32
    %217 = tpu.dynamic_rotate %180 by %c31_i32_128 dim 0 : vector<32x128xf32>, i32 -> vector<32x128xf32>
    %218 = arith.subf %217, %180 : vector<32x128xf32>
    %219 = arith.mulf %216, %218 : vector<32x128xf32>
    %220 = arith.addf %215, %219 : vector<32x128xf32>
    %221 = arith.mulf %200, %220 : vector<32x128xf32>
    %222 = arith.addf %156, %221 : vector<32x128xf32>
    %c0_129 = arith.constant 0 : index
    %c0_130 = arith.constant 0 : index
    %223 = vector.load %arg17[%c0_129, %c0_130] : memref<32x128xf32, #tpu.memory_space<vmem>>, vector<32x128xf32>
    %c127_i32_131 = arith.constant 127 : i32
    %224 = tpu.dynamic_rotate %211 by %c127_i32_131 dim 1 : vector<32x128xf32>, i32 -> vector<32x128xf32>
    %225 = arith.subf %224, %211 : vector<32x128xf32>
    %226 = arith.mulf %223, %225 : vector<32x128xf32>
    %c0_132 = arith.constant 0 : index
    %c0_133 = arith.constant 0 : index
    %227 = vector.load %arg18[%c0_132, %c0_133] : memref<32x128xf32, #tpu.memory_space<vmem>>, vector<32x128xf32>
    %c1_i32_134 = arith.constant 1 : i32
    %228 = tpu.dynamic_rotate %222 by %c1_i32_134 dim 0 : vector<32x128xf32>, i32 -> vector<32x128xf32>
    %229 = arith.subf %222, %228 : vector<32x128xf32>
    %230 = arith.mulf %227, %229 : vector<32x128xf32>
    %231 = arith.addf %226, %230 : vector<32x128xf32>
    %232 = arith.mulf %231, %231 : vector<32x128xf32>
    %233 = arith.addf %167, %232 : vector<32x128xf32>
    %234 = arith.mulf %197, %231 : vector<32x128xf32>
    %c0_135 = arith.constant 0 : index
    %c0_136 = arith.constant 0 : index
    %235 = vector.load %arg15[%c0_135, %c0_136] : memref<32x128xf32, #tpu.memory_space<vmem>>, vector<32x128xf32>
    %236 = arith.index_cast %c2_i32_108 : i32 to index
    %237 = memref.load %arg1[%236] : memref<8xf32, #tpu.memory_space<smem>>
    %238 = vector.broadcast %237 : f32 to vector<32x128xf32>
    %239 = arith.mulf %235, %238 : vector<32x128xf32>
    %240 = arith.addf %234, %239 : vector<32x128xf32>
    %241 = arith.addf %177, %240 : vector<32x128xf32>
    %242 = arith.mulf %198, %226 : vector<32x128xf32>
    %243 = arith.addf %241, %242 : vector<32x128xf32>
    %244 = arith.addf %180, %240 : vector<32x128xf32>
    %245 = arith.mulf %198, %230 : vector<32x128xf32>
    %246 = arith.addf %244, %245 : vector<32x128xf32>
    %c0_137 = arith.constant 0 : index
    %c0_138 = arith.constant 0 : index
    %247 = vector.load %arg19[%c0_137, %c0_138] : memref<32x128xf32, #tpu.memory_space<vmem>>, vector<32x128xf32>
    %c31_i32_139 = arith.constant 31 : i32
    %248 = tpu.dynamic_rotate %211 by %c31_i32_139 dim 0 : vector<32x128xf32>, i32 -> vector<32x128xf32>
    %249 = arith.subf %248, %211 : vector<32x128xf32>
    %250 = arith.mulf %247, %249 : vector<32x128xf32>
    %c0_140 = arith.constant 0 : index
    %c0_141 = arith.constant 0 : index
    %251 = vector.load %arg16[%c0_140, %c0_141] : memref<32x128xf32, #tpu.memory_space<vmem>>, vector<32x128xf32>
    %c1_i32_142 = arith.constant 1 : i32
    %252 = tpu.dynamic_rotate %222 by %c1_i32_142 dim 1 : vector<32x128xf32>, i32 -> vector<32x128xf32>
    %253 = arith.subf %222, %252 : vector<32x128xf32>
    %254 = arith.mulf %251, %253 : vector<32x128xf32>
    %255 = arith.addf %250, %254 : vector<32x128xf32>
    %256 = arith.mulf %199, %255 : vector<32x128xf32>
    %257 = arith.addf %191, %256 : vector<32x128xf32>
    %258 = vector.extract_strided_slice %222 {offsets = [2, 0], sizes = [1, 128], strides = [1, 1]} : vector<32x128xf32> to vector<1x128xf32>
    %c0_143 = arith.constant 0 : index
    %259 = arith.index_cast %c2_i32_108 : i32 to index
    %c0_144 = arith.constant 0 : index
    %260 = vector.load %arg9[%c0_143, %259, %c0_144] : memref<1x8x128xf32, #tpu.memory_space<vmem>>, vector<1x1x128xf32>
    %261 = vector.shape_cast %260 : vector<1x1x128xf32> to vector<1x128xf32>
    %262 = vector.shape_cast %258 : vector<1x128xf32> to vector<1x1x128xf32>
    tpu.vector_store %arg9[%c0_143, %259, %c0_144], %262 {strides = array<i32>} : memref<1x8x128xf32, #tpu.memory_space<vmem>>, vector<1x1x128xf32>,
    %c3_i32 = arith.constant 3 : i32
    %c0_145 = arith.constant 0 : index
    %c0_146 = arith.constant 0 : index
    %263 = vector.load %arg11[%c0_145, %c0_146] : memref<32x128xf32, #tpu.memory_space<vmem>>, vector<32x128xf32>
    %c0_147 = arith.constant 0 : index
    %c0_148 = arith.constant 0 : index
    %264 = vector.load %arg12[%c0_147, %c0_148] : memref<32x128xf32, #tpu.memory_space<vmem>>, vector<32x128xf32>
    %c0_149 = arith.constant 0 : index
    %c0_150 = arith.constant 0 : index
    %265 = vector.load %arg13[%c0_149, %c0_150] : memref<32x128xf32, #tpu.memory_space<vmem>>, vector<32x128xf32>
    %c0_151 = arith.constant 0 : index
    %c0_152 = arith.constant 0 : index
    %266 = vector.load %arg14[%c0_151, %c0_152] : memref<32x128xf32, #tpu.memory_space<vmem>>, vector<32x128xf32>
    %c0_153 = arith.constant 0 : index
    %c0_154 = arith.constant 0 : index
    %267 = vector.load %arg16[%c0_153, %c0_154] : memref<32x128xf32, #tpu.memory_space<vmem>>, vector<32x128xf32>
    %c1_i32_155 = arith.constant 1 : i32
    %268 = tpu.dynamic_rotate %243 by %c1_i32_155 dim 1 : vector<32x128xf32>, i32 -> vector<32x128xf32>
    %269 = arith.subf %243, %268 : vector<32x128xf32>
    %270 = arith.mulf %267, %269 : vector<32x128xf32>
    %c0_156 = arith.constant 0 : index
    %c0_157 = arith.constant 0 : index
    %271 = vector.load %arg18[%c0_156, %c0_157] : memref<32x128xf32, #tpu.memory_space<vmem>>, vector<32x128xf32>
    %c1_i32_158 = arith.constant 1 : i32
    %272 = tpu.dynamic_rotate %257 by %c1_i32_158 dim 0 : vector<32x128xf32>, i32 -> vector<32x128xf32>
    %273 = arith.subf %257, %272 : vector<32x128xf32>
    %274 = arith.mulf %271, %273 : vector<32x128xf32>
    %275 = arith.addf %270, %274 : vector<32x128xf32>
    %276 = arith.mulf %266, %275 : vector<32x128xf32>
    %277 = arith.addf %211, %276 : vector<32x128xf32>
    %c0_159 = arith.constant 0 : index
    %c0_160 = arith.constant 0 : index
    %278 = vector.load %arg17[%c0_159, %c0_160] : memref<32x128xf32, #tpu.memory_space<vmem>>, vector<32x128xf32>
    %c127_i32_161 = arith.constant 127 : i32
    %279 = tpu.dynamic_rotate %257 by %c127_i32_161 dim 1 : vector<32x128xf32>, i32 -> vector<32x128xf32>
    %280 = arith.subf %279, %257 : vector<32x128xf32>
    %281 = arith.mulf %278, %280 : vector<32x128xf32>
    %c0_162 = arith.constant 0 : index
    %c0_163 = arith.constant 0 : index
    %282 = vector.load %arg19[%c0_162, %c0_163] : memref<32x128xf32, #tpu.memory_space<vmem>>, vector<32x128xf32>
    %c31_i32_164 = arith.constant 31 : i32
    %283 = tpu.dynamic_rotate %246 by %c31_i32_164 dim 0 : vector<32x128xf32>, i32 -> vector<32x128xf32>
    %284 = arith.subf %283, %246 : vector<32x128xf32>
    %285 = arith.mulf %282, %284 : vector<32x128xf32>
    %286 = arith.addf %281, %285 : vector<32x128xf32>
    %287 = arith.mulf %266, %286 : vector<32x128xf32>
    %288 = arith.addf %222, %287 : vector<32x128xf32>
    %c0_165 = arith.constant 0 : index
    %c0_166 = arith.constant 0 : index
    %289 = vector.load %arg17[%c0_165, %c0_166] : memref<32x128xf32, #tpu.memory_space<vmem>>, vector<32x128xf32>
    %c127_i32_167 = arith.constant 127 : i32
    %290 = tpu.dynamic_rotate %277 by %c127_i32_167 dim 1 : vector<32x128xf32>, i32 -> vector<32x128xf32>
    %291 = arith.subf %290, %277 : vector<32x128xf32>
    %292 = arith.mulf %289, %291 : vector<32x128xf32>
    %c0_168 = arith.constant 0 : index
    %c0_169 = arith.constant 0 : index
    %293 = vector.load %arg18[%c0_168, %c0_169] : memref<32x128xf32, #tpu.memory_space<vmem>>, vector<32x128xf32>
    %c1_i32_170 = arith.constant 1 : i32
    %294 = tpu.dynamic_rotate %288 by %c1_i32_170 dim 0 : vector<32x128xf32>, i32 -> vector<32x128xf32>
    %295 = arith.subf %288, %294 : vector<32x128xf32>
    %296 = arith.mulf %293, %295 : vector<32x128xf32>
    %297 = arith.addf %292, %296 : vector<32x128xf32>
    %298 = arith.mulf %297, %297 : vector<32x128xf32>
    %299 = arith.addf %233, %298 : vector<32x128xf32>
    %300 = arith.mulf %263, %297 : vector<32x128xf32>
    %c0_171 = arith.constant 0 : index
    %c0_172 = arith.constant 0 : index
    %301 = vector.load %arg15[%c0_171, %c0_172] : memref<32x128xf32, #tpu.memory_space<vmem>>, vector<32x128xf32>
    %302 = arith.index_cast %c3_i32 : i32 to index
    %303 = memref.load %arg1[%302] : memref<8xf32, #tpu.memory_space<smem>>
    %304 = vector.broadcast %303 : f32 to vector<32x128xf32>
    %305 = arith.mulf %301, %304 : vector<32x128xf32>
    %306 = arith.addf %300, %305 : vector<32x128xf32>
    %307 = arith.addf %243, %306 : vector<32x128xf32>
    %308 = arith.mulf %264, %292 : vector<32x128xf32>
    %309 = arith.addf %307, %308 : vector<32x128xf32>
    %310 = arith.addf %246, %306 : vector<32x128xf32>
    %311 = arith.mulf %264, %296 : vector<32x128xf32>
    %312 = arith.addf %310, %311 : vector<32x128xf32>
    %c0_173 = arith.constant 0 : index
    %c0_174 = arith.constant 0 : index
    %313 = vector.load %arg19[%c0_173, %c0_174] : memref<32x128xf32, #tpu.memory_space<vmem>>, vector<32x128xf32>
    %c31_i32_175 = arith.constant 31 : i32
    %314 = tpu.dynamic_rotate %277 by %c31_i32_175 dim 0 : vector<32x128xf32>, i32 -> vector<32x128xf32>
    %315 = arith.subf %314, %277 : vector<32x128xf32>
    %316 = arith.mulf %313, %315 : vector<32x128xf32>
    %c0_176 = arith.constant 0 : index
    %c0_177 = arith.constant 0 : index
    %317 = vector.load %arg16[%c0_176, %c0_177] : memref<32x128xf32, #tpu.memory_space<vmem>>, vector<32x128xf32>
    %c1_i32_178 = arith.constant 1 : i32
    %318 = tpu.dynamic_rotate %288 by %c1_i32_178 dim 1 : vector<32x128xf32>, i32 -> vector<32x128xf32>
    %319 = arith.subf %288, %318 : vector<32x128xf32>
    %320 = arith.mulf %317, %319 : vector<32x128xf32>
    %321 = arith.addf %316, %320 : vector<32x128xf32>
    %322 = arith.mulf %265, %321 : vector<32x128xf32>
    %323 = arith.addf %257, %322 : vector<32x128xf32>
    %324 = vector.extract_strided_slice %288 {offsets = [2, 0], sizes = [1, 128], strides = [1, 1]} : vector<32x128xf32> to vector<1x128xf32>
    %c0_179 = arith.constant 0 : index
    %325 = arith.index_cast %c3_i32 : i32 to index
    %c0_180 = arith.constant 0 : index
    %326 = vector.load %arg9[%c0_179, %325, %c0_180] : memref<1x8x128xf32, #tpu.memory_space<vmem>>, vector<1x1x128xf32>
    %327 = vector.shape_cast %326 : vector<1x1x128xf32> to vector<1x128xf32>
    %328 = vector.shape_cast %324 : vector<1x128xf32> to vector<1x1x128xf32>
    tpu.vector_store %arg9[%c0_179, %325, %c0_180], %328 {strides = array<i32>} : memref<1x8x128xf32, #tpu.memory_space<vmem>>, vector<1x1x128xf32>,
    %c4_i32 = arith.constant 4 : i32
    %c0_181 = arith.constant 0 : index
    %c0_182 = arith.constant 0 : index
    %329 = vector.load %arg11[%c0_181, %c0_182] : memref<32x128xf32, #tpu.memory_space<vmem>>, vector<32x128xf32>
    %c0_183 = arith.constant 0 : index
    %c0_184 = arith.constant 0 : index
    %330 = vector.load %arg12[%c0_183, %c0_184] : memref<32x128xf32, #tpu.memory_space<vmem>>, vector<32x128xf32>
    %c0_185 = arith.constant 0 : index
    %c0_186 = arith.constant 0 : index
    %331 = vector.load %arg13[%c0_185, %c0_186] : memref<32x128xf32, #tpu.memory_space<vmem>>, vector<32x128xf32>
    %c0_187 = arith.constant 0 : index
    %c0_188 = arith.constant 0 : index
    %332 = vector.load %arg14[%c0_187, %c0_188] : memref<32x128xf32, #tpu.memory_space<vmem>>, vector<32x128xf32>
    %c0_189 = arith.constant 0 : index
    %c0_190 = arith.constant 0 : index
    %333 = vector.load %arg16[%c0_189, %c0_190] : memref<32x128xf32, #tpu.memory_space<vmem>>, vector<32x128xf32>
    %c1_i32_191 = arith.constant 1 : i32
    %334 = tpu.dynamic_rotate %309 by %c1_i32_191 dim 1 : vector<32x128xf32>, i32 -> vector<32x128xf32>
    %335 = arith.subf %309, %334 : vector<32x128xf32>
    %336 = arith.mulf %333, %335 : vector<32x128xf32>
    %c0_192 = arith.constant 0 : index
    %c0_193 = arith.constant 0 : index
    %337 = vector.load %arg18[%c0_192, %c0_193] : memref<32x128xf32, #tpu.memory_space<vmem>>, vector<32x128xf32>
    %c1_i32_194 = arith.constant 1 : i32
    %338 = tpu.dynamic_rotate %323 by %c1_i32_194 dim 0 : vector<32x128xf32>, i32 -> vector<32x128xf32>
    %339 = arith.subf %323, %338 : vector<32x128xf32>
    %340 = arith.mulf %337, %339 : vector<32x128xf32>
    %341 = arith.addf %336, %340 : vector<32x128xf32>
    %342 = arith.mulf %332, %341 : vector<32x128xf32>
    %343 = arith.addf %277, %342 : vector<32x128xf32>
    %c0_195 = arith.constant 0 : index
    %c0_196 = arith.constant 0 : index
    %344 = vector.load %arg17[%c0_195, %c0_196] : memref<32x128xf32, #tpu.memory_space<vmem>>, vector<32x128xf32>
    %c127_i32_197 = arith.constant 127 : i32
    %345 = tpu.dynamic_rotate %323 by %c127_i32_197 dim 1 : vector<32x128xf32>, i32 -> vector<32x128xf32>
    %346 = arith.subf %345, %323 : vector<32x128xf32>
    %347 = arith.mulf %344, %346 : vector<32x128xf32>
    %c0_198 = arith.constant 0 : index
    %c0_199 = arith.constant 0 : index
    %348 = vector.load %arg19[%c0_198, %c0_199] : memref<32x128xf32, #tpu.memory_space<vmem>>, vector<32x128xf32>
    %c31_i32_200 = arith.constant 31 : i32
    %349 = tpu.dynamic_rotate %312 by %c31_i32_200 dim 0 : vector<32x128xf32>, i32 -> vector<32x128xf32>
    %350 = arith.subf %349, %312 : vector<32x128xf32>
    %351 = arith.mulf %348, %350 : vector<32x128xf32>
    %352 = arith.addf %347, %351 : vector<32x128xf32>
    %353 = arith.mulf %332, %352 : vector<32x128xf32>
    %354 = arith.addf %288, %353 : vector<32x128xf32>
    %c0_201 = arith.constant 0 : index
    %c0_202 = arith.constant 0 : index
    %355 = vector.load %arg17[%c0_201, %c0_202] : memref<32x128xf32, #tpu.memory_space<vmem>>, vector<32x128xf32>
    %c127_i32_203 = arith.constant 127 : i32
    %356 = tpu.dynamic_rotate %343 by %c127_i32_203 dim 1 : vector<32x128xf32>, i32 -> vector<32x128xf32>
    %357 = arith.subf %356, %343 : vector<32x128xf32>
    %358 = arith.mulf %355, %357 : vector<32x128xf32>
    %c0_204 = arith.constant 0 : index
    %c0_205 = arith.constant 0 : index
    %359 = vector.load %arg18[%c0_204, %c0_205] : memref<32x128xf32, #tpu.memory_space<vmem>>, vector<32x128xf32>
    %c1_i32_206 = arith.constant 1 : i32
    %360 = tpu.dynamic_rotate %354 by %c1_i32_206 dim 0 : vector<32x128xf32>, i32 -> vector<32x128xf32>
    %361 = arith.subf %354, %360 : vector<32x128xf32>
    %362 = arith.mulf %359, %361 : vector<32x128xf32>
    %363 = arith.addf %358, %362 : vector<32x128xf32>
    %364 = arith.mulf %363, %363 : vector<32x128xf32>
    %365 = arith.addf %299, %364 : vector<32x128xf32>
    %366 = arith.mulf %329, %363 : vector<32x128xf32>
    %c0_207 = arith.constant 0 : index
    %c0_208 = arith.constant 0 : index
    %367 = vector.load %arg15[%c0_207, %c0_208] : memref<32x128xf32, #tpu.memory_space<vmem>>, vector<32x128xf32>
    %368 = arith.index_cast %c4_i32 : i32 to index
    %369 = memref.load %arg1[%368] : memref<8xf32, #tpu.memory_space<smem>>
    %370 = vector.broadcast %369 : f32 to vector<32x128xf32>
    %371 = arith.mulf %367, %370 : vector<32x128xf32>
    %372 = arith.addf %366, %371 : vector<32x128xf32>
    %373 = arith.addf %309, %372 : vector<32x128xf32>
    %374 = arith.mulf %330, %358 : vector<32x128xf32>
    %375 = arith.addf %373, %374 : vector<32x128xf32>
    %376 = arith.addf %312, %372 : vector<32x128xf32>
    %377 = arith.mulf %330, %362 : vector<32x128xf32>
    %378 = arith.addf %376, %377 : vector<32x128xf32>
    %c0_209 = arith.constant 0 : index
    %c0_210 = arith.constant 0 : index
    %379 = vector.load %arg19[%c0_209, %c0_210] : memref<32x128xf32, #tpu.memory_space<vmem>>, vector<32x128xf32>
    %c31_i32_211 = arith.constant 31 : i32
    %380 = tpu.dynamic_rotate %343 by %c31_i32_211 dim 0 : vector<32x128xf32>, i32 -> vector<32x128xf32>
    %381 = arith.subf %380, %343 : vector<32x128xf32>
    %382 = arith.mulf %379, %381 : vector<32x128xf32>
    %c0_212 = arith.constant 0 : index
    %c0_213 = arith.constant 0 : index
    %383 = vector.load %arg16[%c0_212, %c0_213] : memref<32x128xf32, #tpu.memory_space<vmem>>, vector<32x128xf32>
    %c1_i32_214 = arith.constant 1 : i32
    %384 = tpu.dynamic_rotate %354 by %c1_i32_214 dim 1 : vector<32x128xf32>, i32 -> vector<32x128xf32>
    %385 = arith.subf %354, %384 : vector<32x128xf32>
    %386 = arith.mulf %383, %385 : vector<32x128xf32>
    %387 = arith.addf %382, %386 : vector<32x128xf32>
    %388 = arith.mulf %331, %387 : vector<32x128xf32>
    %389 = arith.addf %323, %388 : vector<32x128xf32>
    %390 = vector.extract_strided_slice %354 {offsets = [2, 0], sizes = [1, 128], strides = [1, 1]} : vector<32x128xf32> to vector<1x128xf32>
    %c0_215 = arith.constant 0 : index
    %391 = arith.index_cast %c4_i32 : i32 to index
    %c0_216 = arith.constant 0 : index
    %392 = vector.load %arg9[%c0_215, %391, %c0_216] : memref<1x8x128xf32, #tpu.memory_space<vmem>>, vector<1x1x128xf32>
    %393 = vector.shape_cast %392 : vector<1x1x128xf32> to vector<1x128xf32>
    %394 = vector.shape_cast %390 : vector<1x128xf32> to vector<1x1x128xf32>
    tpu.vector_store %arg9[%c0_215, %391, %c0_216], %394 {strides = array<i32>} : memref<1x8x128xf32, #tpu.memory_space<vmem>>, vector<1x1x128xf32>,
    %c5_i32 = arith.constant 5 : i32
    %c0_217 = arith.constant 0 : index
    %c0_218 = arith.constant 0 : index
    %395 = vector.load %arg11[%c0_217, %c0_218] : memref<32x128xf32, #tpu.memory_space<vmem>>, vector<32x128xf32>
    %c0_219 = arith.constant 0 : index
    %c0_220 = arith.constant 0 : index
    %396 = vector.load %arg12[%c0_219, %c0_220] : memref<32x128xf32, #tpu.memory_space<vmem>>, vector<32x128xf32>
    %c0_221 = arith.constant 0 : index
    %c0_222 = arith.constant 0 : index
    %397 = vector.load %arg13[%c0_221, %c0_222] : memref<32x128xf32, #tpu.memory_space<vmem>>, vector<32x128xf32>
    %c0_223 = arith.constant 0 : index
    %c0_224 = arith.constant 0 : index
    %398 = vector.load %arg14[%c0_223, %c0_224] : memref<32x128xf32, #tpu.memory_space<vmem>>, vector<32x128xf32>
    %c0_225 = arith.constant 0 : index
    %c0_226 = arith.constant 0 : index
    %399 = vector.load %arg16[%c0_225, %c0_226] : memref<32x128xf32, #tpu.memory_space<vmem>>, vector<32x128xf32>
    %c1_i32_227 = arith.constant 1 : i32
    %400 = tpu.dynamic_rotate %375 by %c1_i32_227 dim 1 : vector<32x128xf32>, i32 -> vector<32x128xf32>
    %401 = arith.subf %375, %400 : vector<32x128xf32>
    %402 = arith.mulf %399, %401 : vector<32x128xf32>
    %c0_228 = arith.constant 0 : index
    %c0_229 = arith.constant 0 : index
    %403 = vector.load %arg18[%c0_228, %c0_229] : memref<32x128xf32, #tpu.memory_space<vmem>>, vector<32x128xf32>
    %c1_i32_230 = arith.constant 1 : i32
    %404 = tpu.dynamic_rotate %389 by %c1_i32_230 dim 0 : vector<32x128xf32>, i32 -> vector<32x128xf32>
    %405 = arith.subf %389, %404 : vector<32x128xf32>
    %406 = arith.mulf %403, %405 : vector<32x128xf32>
    %407 = arith.addf %402, %406 : vector<32x128xf32>
    %408 = arith.mulf %398, %407 : vector<32x128xf32>
    %409 = arith.addf %343, %408 : vector<32x128xf32>
    %c0_231 = arith.constant 0 : index
    %c0_232 = arith.constant 0 : index
    %410 = vector.load %arg17[%c0_231, %c0_232] : memref<32x128xf32, #tpu.memory_space<vmem>>, vector<32x128xf32>
    %c127_i32_233 = arith.constant 127 : i32
    %411 = tpu.dynamic_rotate %389 by %c127_i32_233 dim 1 : vector<32x128xf32>, i32 -> vector<32x128xf32>
    %412 = arith.subf %411, %389 : vector<32x128xf32>
    %413 = arith.mulf %410, %412 : vector<32x128xf32>
    %c0_234 = arith.constant 0 : index
    %c0_235 = arith.constant 0 : index
    %414 = vector.load %arg19[%c0_234, %c0_235] : memref<32x128xf32, #tpu.memory_space<vmem>>, vector<32x128xf32>
    %c31_i32_236 = arith.constant 31 : i32
    %415 = tpu.dynamic_rotate %378 by %c31_i32_236 dim 0 : vector<32x128xf32>, i32 -> vector<32x128xf32>
    %416 = arith.subf %415, %378 : vector<32x128xf32>
    %417 = arith.mulf %414, %416 : vector<32x128xf32>
    %418 = arith.addf %413, %417 : vector<32x128xf32>
    %419 = arith.mulf %398, %418 : vector<32x128xf32>
    %420 = arith.addf %354, %419 : vector<32x128xf32>
    %c0_237 = arith.constant 0 : index
    %c0_238 = arith.constant 0 : index
    %421 = vector.load %arg17[%c0_237, %c0_238] : memref<32x128xf32, #tpu.memory_space<vmem>>, vector<32x128xf32>
    %c127_i32_239 = arith.constant 127 : i32
    %422 = tpu.dynamic_rotate %409 by %c127_i32_239 dim 1 : vector<32x128xf32>, i32 -> vector<32x128xf32>
    %423 = arith.subf %422, %409 : vector<32x128xf32>
    %424 = arith.mulf %421, %423 : vector<32x128xf32>
    %c0_240 = arith.constant 0 : index
    %c0_241 = arith.constant 0 : index
    %425 = vector.load %arg18[%c0_240, %c0_241] : memref<32x128xf32, #tpu.memory_space<vmem>>, vector<32x128xf32>
    %c1_i32_242 = arith.constant 1 : i32
    %426 = tpu.dynamic_rotate %420 by %c1_i32_242 dim 0 : vector<32x128xf32>, i32 -> vector<32x128xf32>
    %427 = arith.subf %420, %426 : vector<32x128xf32>
    %428 = arith.mulf %425, %427 : vector<32x128xf32>
    %429 = arith.addf %424, %428 : vector<32x128xf32>
    %430 = arith.mulf %429, %429 : vector<32x128xf32>
    %431 = arith.addf %365, %430 : vector<32x128xf32>
    %432 = arith.mulf %395, %429 : vector<32x128xf32>
    %c0_243 = arith.constant 0 : index
    %c0_244 = arith.constant 0 : index
    %433 = vector.load %arg15[%c0_243, %c0_244] : memref<32x128xf32, #tpu.memory_space<vmem>>, vector<32x128xf32>
    %434 = arith.index_cast %c5_i32 : i32 to index
    %435 = memref.load %arg1[%434] : memref<8xf32, #tpu.memory_space<smem>>
    %436 = vector.broadcast %435 : f32 to vector<32x128xf32>
    %437 = arith.mulf %433, %436 : vector<32x128xf32>
    %438 = arith.addf %432, %437 : vector<32x128xf32>
    %439 = arith.addf %375, %438 : vector<32x128xf32>
    %440 = arith.mulf %396, %424 : vector<32x128xf32>
    %441 = arith.addf %439, %440 : vector<32x128xf32>
    %442 = arith.addf %378, %438 : vector<32x128xf32>
    %443 = arith.mulf %396, %428 : vector<32x128xf32>
    %444 = arith.addf %442, %443 : vector<32x128xf32>
    %c0_245 = arith.constant 0 : index
    %c0_246 = arith.constant 0 : index
    %445 = vector.load %arg19[%c0_245, %c0_246] : memref<32x128xf32, #tpu.memory_space<vmem>>, vector<32x128xf32>
    %c31_i32_247 = arith.constant 31 : i32
    %446 = tpu.dynamic_rotate %409 by %c31_i32_247 dim 0 : vector<32x128xf32>, i32 -> vector<32x128xf32>
    %447 = arith.subf %446, %409 : vector<32x128xf32>
    %448 = arith.mulf %445, %447 : vector<32x128xf32>
    %c0_248 = arith.constant 0 : index
    %c0_249 = arith.constant 0 : index
    %449 = vector.load %arg16[%c0_248, %c0_249] : memref<32x128xf32, #tpu.memory_space<vmem>>, vector<32x128xf32>
    %c1_i32_250 = arith.constant 1 : i32
    %450 = tpu.dynamic_rotate %420 by %c1_i32_250 dim 1 : vector<32x128xf32>, i32 -> vector<32x128xf32>
    %451 = arith.subf %420, %450 : vector<32x128xf32>
    %452 = arith.mulf %449, %451 : vector<32x128xf32>
    %453 = arith.addf %448, %452 : vector<32x128xf32>
    %454 = arith.mulf %397, %453 : vector<32x128xf32>
    %455 = arith.addf %389, %454 : vector<32x128xf32>
    %456 = vector.extract_strided_slice %420 {offsets = [2, 0], sizes = [1, 128], strides = [1, 1]} : vector<32x128xf32> to vector<1x128xf32>
    %c0_251 = arith.constant 0 : index
    %457 = arith.index_cast %c5_i32 : i32 to index
    %c0_252 = arith.constant 0 : index
    %458 = vector.load %arg9[%c0_251, %457, %c0_252] : memref<1x8x128xf32, #tpu.memory_space<vmem>>, vector<1x1x128xf32>
    %459 = vector.shape_cast %458 : vector<1x1x128xf32> to vector<1x128xf32>
    %460 = vector.shape_cast %456 : vector<1x128xf32> to vector<1x1x128xf32>
    tpu.vector_store %arg9[%c0_251, %457, %c0_252], %460 {strides = array<i32>} : memref<1x8x128xf32, #tpu.memory_space<vmem>>, vector<1x1x128xf32>,
    %c6_i32 = arith.constant 6 : i32
    %c0_253 = arith.constant 0 : index
    %c0_254 = arith.constant 0 : index
    %461 = vector.load %arg11[%c0_253, %c0_254] : memref<32x128xf32, #tpu.memory_space<vmem>>, vector<32x128xf32>
    %c0_255 = arith.constant 0 : index
    %c0_256 = arith.constant 0 : index
    %462 = vector.load %arg12[%c0_255, %c0_256] : memref<32x128xf32, #tpu.memory_space<vmem>>, vector<32x128xf32>
    %c0_257 = arith.constant 0 : index
    %c0_258 = arith.constant 0 : index
    %463 = vector.load %arg13[%c0_257, %c0_258] : memref<32x128xf32, #tpu.memory_space<vmem>>, vector<32x128xf32>
    %c0_259 = arith.constant 0 : index
    %c0_260 = arith.constant 0 : index
    %464 = vector.load %arg14[%c0_259, %c0_260] : memref<32x128xf32, #tpu.memory_space<vmem>>, vector<32x128xf32>
    %c0_261 = arith.constant 0 : index
    %c0_262 = arith.constant 0 : index
    %465 = vector.load %arg16[%c0_261, %c0_262] : memref<32x128xf32, #tpu.memory_space<vmem>>, vector<32x128xf32>
    %c1_i32_263 = arith.constant 1 : i32
    %466 = tpu.dynamic_rotate %441 by %c1_i32_263 dim 1 : vector<32x128xf32>, i32 -> vector<32x128xf32>
    %467 = arith.subf %441, %466 : vector<32x128xf32>
    %468 = arith.mulf %465, %467 : vector<32x128xf32>
    %c0_264 = arith.constant 0 : index
    %c0_265 = arith.constant 0 : index
    %469 = vector.load %arg18[%c0_264, %c0_265] : memref<32x128xf32, #tpu.memory_space<vmem>>, vector<32x128xf32>
    %c1_i32_266 = arith.constant 1 : i32
    %470 = tpu.dynamic_rotate %455 by %c1_i32_266 dim 0 : vector<32x128xf32>, i32 -> vector<32x128xf32>
    %471 = arith.subf %455, %470 : vector<32x128xf32>
    %472 = arith.mulf %469, %471 : vector<32x128xf32>
    %473 = arith.addf %468, %472 : vector<32x128xf32>
    %474 = arith.mulf %464, %473 : vector<32x128xf32>
    %475 = arith.addf %409, %474 : vector<32x128xf32>
    %c0_267 = arith.constant 0 : index
    %c0_268 = arith.constant 0 : index
    %476 = vector.load %arg17[%c0_267, %c0_268] : memref<32x128xf32, #tpu.memory_space<vmem>>, vector<32x128xf32>
    %c127_i32_269 = arith.constant 127 : i32
    %477 = tpu.dynamic_rotate %455 by %c127_i32_269 dim 1 : vector<32x128xf32>, i32 -> vector<32x128xf32>
    %478 = arith.subf %477, %455 : vector<32x128xf32>
    %479 = arith.mulf %476, %478 : vector<32x128xf32>
    %c0_270 = arith.constant 0 : index
    %c0_271 = arith.constant 0 : index
    %480 = vector.load %arg19[%c0_270, %c0_271] : memref<32x128xf32, #tpu.memory_space<vmem>>, vector<32x128xf32>
    %c31_i32_272 = arith.constant 31 : i32
    %481 = tpu.dynamic_rotate %444 by %c31_i32_272 dim 0 : vector<32x128xf32>, i32 -> vector<32x128xf32>
    %482 = arith.subf %481, %444 : vector<32x128xf32>
    %483 = arith.mulf %480, %482 : vector<32x128xf32>
    %484 = arith.addf %479, %483 : vector<32x128xf32>
    %485 = arith.mulf %464, %484 : vector<32x128xf32>
    %486 = arith.addf %420, %485 : vector<32x128xf32>
    %c0_273 = arith.constant 0 : index
    %c0_274 = arith.constant 0 : index
    %487 = vector.load %arg17[%c0_273, %c0_274] : memref<32x128xf32, #tpu.memory_space<vmem>>, vector<32x128xf32>
    %c127_i32_275 = arith.constant 127 : i32
    %488 = tpu.dynamic_rotate %475 by %c127_i32_275 dim 1 : vector<32x128xf32>, i32 -> vector<32x128xf32>
    %489 = arith.subf %488, %475 : vector<32x128xf32>
    %490 = arith.mulf %487, %489 : vector<32x128xf32>
    %c0_276 = arith.constant 0 : index
    %c0_277 = arith.constant 0 : index
    %491 = vector.load %arg18[%c0_276, %c0_277] : memref<32x128xf32, #tpu.memory_space<vmem>>, vector<32x128xf32>
    %c1_i32_278 = arith.constant 1 : i32
    %492 = tpu.dynamic_rotate %486 by %c1_i32_278 dim 0 : vector<32x128xf32>, i32 -> vector<32x128xf32>
    %493 = arith.subf %486, %492 : vector<32x128xf32>
    %494 = arith.mulf %491, %493 : vector<32x128xf32>
    %495 = arith.addf %490, %494 : vector<32x128xf32>
    %496 = arith.mulf %495, %495 : vector<32x128xf32>
    %497 = arith.addf %431, %496 : vector<32x128xf32>
    %498 = arith.mulf %461, %495 : vector<32x128xf32>
    %c0_279 = arith.constant 0 : index
    %c0_280 = arith.constant 0 : index
    %499 = vector.load %arg15[%c0_279, %c0_280] : memref<32x128xf32, #tpu.memory_space<vmem>>, vector<32x128xf32>
    %500 = arith.index_cast %c6_i32 : i32 to index
    %501 = memref.load %arg1[%500] : memref<8xf32, #tpu.memory_space<smem>>
    %502 = vector.broadcast %501 : f32 to vector<32x128xf32>
    %503 = arith.mulf %499, %502 : vector<32x128xf32>
    %504 = arith.addf %498, %503 : vector<32x128xf32>
    %505 = arith.addf %441, %504 : vector<32x128xf32>
    %506 = arith.mulf %462, %490 : vector<32x128xf32>
    %507 = arith.addf %505, %506 : vector<32x128xf32>
    %508 = arith.addf %444, %504 : vector<32x128xf32>
    %509 = arith.mulf %462, %494 : vector<32x128xf32>
    %510 = arith.addf %508, %509 : vector<32x128xf32>
    %c0_281 = arith.constant 0 : index
    %c0_282 = arith.constant 0 : index
    %511 = vector.load %arg19[%c0_281, %c0_282] : memref<32x128xf32, #tpu.memory_space<vmem>>, vector<32x128xf32>
    %c31_i32_283 = arith.constant 31 : i32
    %512 = tpu.dynamic_rotate %475 by %c31_i32_283 dim 0 : vector<32x128xf32>, i32 -> vector<32x128xf32>
    %513 = arith.subf %512, %475 : vector<32x128xf32>
    %514 = arith.mulf %511, %513 : vector<32x128xf32>
    %c0_284 = arith.constant 0 : index
    %c0_285 = arith.constant 0 : index
    %515 = vector.load %arg16[%c0_284, %c0_285] : memref<32x128xf32, #tpu.memory_space<vmem>>, vector<32x128xf32>
    %c1_i32_286 = arith.constant 1 : i32
    %516 = tpu.dynamic_rotate %486 by %c1_i32_286 dim 1 : vector<32x128xf32>, i32 -> vector<32x128xf32>
    %517 = arith.subf %486, %516 : vector<32x128xf32>
    %518 = arith.mulf %515, %517 : vector<32x128xf32>
    %519 = arith.addf %514, %518 : vector<32x128xf32>
    %520 = arith.mulf %463, %519 : vector<32x128xf32>
    %521 = arith.addf %455, %520 : vector<32x128xf32>
    %522 = vector.extract_strided_slice %486 {offsets = [2, 0], sizes = [1, 128], strides = [1, 1]} : vector<32x128xf32> to vector<1x128xf32>
    %c0_287 = arith.constant 0 : index
    %523 = arith.index_cast %c6_i32 : i32 to index
    %c0_288 = arith.constant 0 : index
    %524 = vector.load %arg9[%c0_287, %523, %c0_288] : memref<1x8x128xf32, #tpu.memory_space<vmem>>, vector<1x1x128xf32>
    %525 = vector.shape_cast %524 : vector<1x1x128xf32> to vector<1x128xf32>
    %526 = vector.shape_cast %522 : vector<1x128xf32> to vector<1x1x128xf32>
    tpu.vector_store %arg9[%c0_287, %523, %c0_288], %526 {strides = array<i32>} : memref<1x8x128xf32, #tpu.memory_space<vmem>>, vector<1x1x128xf32>,
    %c7_i32 = arith.constant 7 : i32
    %c0_289 = arith.constant 0 : index
    %c0_290 = arith.constant 0 : index
    %527 = vector.load %arg11[%c0_289, %c0_290] : memref<32x128xf32, #tpu.memory_space<vmem>>, vector<32x128xf32>
    %c0_291 = arith.constant 0 : index
    %c0_292 = arith.constant 0 : index
    %528 = vector.load %arg12[%c0_291, %c0_292] : memref<32x128xf32, #tpu.memory_space<vmem>>, vector<32x128xf32>
    %c0_293 = arith.constant 0 : index
    %c0_294 = arith.constant 0 : index
    %529 = vector.load %arg13[%c0_293, %c0_294] : memref<32x128xf32, #tpu.memory_space<vmem>>, vector<32x128xf32>
    %c0_295 = arith.constant 0 : index
    %c0_296 = arith.constant 0 : index
    %530 = vector.load %arg14[%c0_295, %c0_296] : memref<32x128xf32, #tpu.memory_space<vmem>>, vector<32x128xf32>
    %c0_297 = arith.constant 0 : index
    %c0_298 = arith.constant 0 : index
    %531 = vector.load %arg16[%c0_297, %c0_298] : memref<32x128xf32, #tpu.memory_space<vmem>>, vector<32x128xf32>
    %c1_i32_299 = arith.constant 1 : i32
    %532 = tpu.dynamic_rotate %507 by %c1_i32_299 dim 1 : vector<32x128xf32>, i32 -> vector<32x128xf32>
    %533 = arith.subf %507, %532 : vector<32x128xf32>
    %534 = arith.mulf %531, %533 : vector<32x128xf32>
    %c0_300 = arith.constant 0 : index
    %c0_301 = arith.constant 0 : index
    %535 = vector.load %arg18[%c0_300, %c0_301] : memref<32x128xf32, #tpu.memory_space<vmem>>, vector<32x128xf32>
    %c1_i32_302 = arith.constant 1 : i32
    %536 = tpu.dynamic_rotate %521 by %c1_i32_302 dim 0 : vector<32x128xf32>, i32 -> vector<32x128xf32>
    %537 = arith.subf %521, %536 : vector<32x128xf32>
    %538 = arith.mulf %535, %537 : vector<32x128xf32>
    %539 = arith.addf %534, %538 : vector<32x128xf32>
    %540 = arith.mulf %530, %539 : vector<32x128xf32>
    %541 = arith.addf %475, %540 : vector<32x128xf32>
    %c0_303 = arith.constant 0 : index
    %c0_304 = arith.constant 0 : index
    %542 = vector.load %arg17[%c0_303, %c0_304] : memref<32x128xf32, #tpu.memory_space<vmem>>, vector<32x128xf32>
    %c127_i32_305 = arith.constant 127 : i32
    %543 = tpu.dynamic_rotate %521 by %c127_i32_305 dim 1 : vector<32x128xf32>, i32 -> vector<32x128xf32>
    %544 = arith.subf %543, %521 : vector<32x128xf32>
    %545 = arith.mulf %542, %544 : vector<32x128xf32>
    %c0_306 = arith.constant 0 : index
    %c0_307 = arith.constant 0 : index
    %546 = vector.load %arg19[%c0_306, %c0_307] : memref<32x128xf32, #tpu.memory_space<vmem>>, vector<32x128xf32>
    %c31_i32_308 = arith.constant 31 : i32
    %547 = tpu.dynamic_rotate %510 by %c31_i32_308 dim 0 : vector<32x128xf32>, i32 -> vector<32x128xf32>
    %548 = arith.subf %547, %510 : vector<32x128xf32>
    %549 = arith.mulf %546, %548 : vector<32x128xf32>
    %550 = arith.addf %545, %549 : vector<32x128xf32>
    %551 = arith.mulf %530, %550 : vector<32x128xf32>
    %552 = arith.addf %486, %551 : vector<32x128xf32>
    %c0_309 = arith.constant 0 : index
    %c0_310 = arith.constant 0 : index
    %553 = vector.load %arg17[%c0_309, %c0_310] : memref<32x128xf32, #tpu.memory_space<vmem>>, vector<32x128xf32>
    %c127_i32_311 = arith.constant 127 : i32
    %554 = tpu.dynamic_rotate %541 by %c127_i32_311 dim 1 : vector<32x128xf32>, i32 -> vector<32x128xf32>
    %555 = arith.subf %554, %541 : vector<32x128xf32>
    %556 = arith.mulf %553, %555 : vector<32x128xf32>
    %c0_312 = arith.constant 0 : index
    %c0_313 = arith.constant 0 : index
    %557 = vector.load %arg18[%c0_312, %c0_313] : memref<32x128xf32, #tpu.memory_space<vmem>>, vector<32x128xf32>
    %c1_i32_314 = arith.constant 1 : i32
    %558 = tpu.dynamic_rotate %552 by %c1_i32_314 dim 0 : vector<32x128xf32>, i32 -> vector<32x128xf32>
    %559 = arith.subf %552, %558 : vector<32x128xf32>
    %560 = arith.mulf %557, %559 : vector<32x128xf32>
    %561 = arith.addf %556, %560 : vector<32x128xf32>
    %562 = arith.mulf %561, %561 : vector<32x128xf32>
    %563 = arith.addf %497, %562 : vector<32x128xf32>
    %564 = arith.mulf %527, %561 : vector<32x128xf32>
    %c0_315 = arith.constant 0 : index
    %c0_316 = arith.constant 0 : index
    %565 = vector.load %arg15[%c0_315, %c0_316] : memref<32x128xf32, #tpu.memory_space<vmem>>, vector<32x128xf32>
    %566 = arith.index_cast %c7_i32 : i32 to index
    %567 = memref.load %arg1[%566] : memref<8xf32, #tpu.memory_space<smem>>
    %568 = vector.broadcast %567 : f32 to vector<32x128xf32>
    %569 = arith.mulf %565, %568 : vector<32x128xf32>
    %570 = arith.addf %564, %569 : vector<32x128xf32>
    %571 = arith.addf %507, %570 : vector<32x128xf32>
    %572 = arith.mulf %528, %556 : vector<32x128xf32>
    %573 = arith.addf %571, %572 : vector<32x128xf32>
    %574 = arith.addf %510, %570 : vector<32x128xf32>
    %575 = arith.mulf %528, %560 : vector<32x128xf32>
    %576 = arith.addf %574, %575 : vector<32x128xf32>
    %c0_317 = arith.constant 0 : index
    %c0_318 = arith.constant 0 : index
    %577 = vector.load %arg19[%c0_317, %c0_318] : memref<32x128xf32, #tpu.memory_space<vmem>>, vector<32x128xf32>
    %c31_i32_319 = arith.constant 31 : i32
    %578 = tpu.dynamic_rotate %541 by %c31_i32_319 dim 0 : vector<32x128xf32>, i32 -> vector<32x128xf32>
    %579 = arith.subf %578, %541 : vector<32x128xf32>
    %580 = arith.mulf %577, %579 : vector<32x128xf32>
    %c0_320 = arith.constant 0 : index
    %c0_321 = arith.constant 0 : index
    %581 = vector.load %arg16[%c0_320, %c0_321] : memref<32x128xf32, #tpu.memory_space<vmem>>, vector<32x128xf32>
    %c1_i32_322 = arith.constant 1 : i32
    %582 = tpu.dynamic_rotate %552 by %c1_i32_322 dim 1 : vector<32x128xf32>, i32 -> vector<32x128xf32>
    %583 = arith.subf %552, %582 : vector<32x128xf32>
    %584 = arith.mulf %581, %583 : vector<32x128xf32>
    %585 = arith.addf %580, %584 : vector<32x128xf32>
    %586 = arith.mulf %529, %585 : vector<32x128xf32>
    %587 = arith.addf %521, %586 : vector<32x128xf32>
    %588 = vector.extract_strided_slice %552 {offsets = [2, 0], sizes = [1, 128], strides = [1, 1]} : vector<32x128xf32> to vector<1x128xf32>
    %c0_323 = arith.constant 0 : index
    %589 = arith.index_cast %c7_i32 : i32 to index
    %c0_324 = arith.constant 0 : index
    %590 = vector.load %arg9[%c0_323, %589, %c0_324] : memref<1x8x128xf32, #tpu.memory_space<vmem>>, vector<1x1x128xf32>
    %591 = vector.shape_cast %590 : vector<1x1x128xf32> to vector<1x128xf32>
    %592 = vector.shape_cast %588 : vector<1x128xf32> to vector<1x1x128xf32>
    tpu.vector_store %arg9[%c0_323, %589, %c0_324], %592 {strides = array<i32>} : memref<1x8x128xf32, #tpu.memory_space<vmem>>, vector<1x1x128xf32>,
    %c8_i32 = arith.constant 8 : i32
    %c0_325 = arith.constant 0 : index
    %c0_326 = arith.constant 0 : index
    %c0_327 = arith.constant 0 : index
    %593 = vector.load %arg8[%c0_325, %c0_326, %c0_327] : memref<1x32x128xf32, #tpu.memory_space<vmem>>, vector<1x32x128xf32>
    %594 = vector.shape_cast %593 : vector<1x32x128xf32> to vector<32x128xf32>
    %595 = vector.shape_cast %552 : vector<32x128xf32> to vector<1x32x128xf32>
    tpu.vector_store %arg8[%c0_325, %c0_326, %c0_327], %595 {strides = array<i32>} : memref<1x32x128xf32, #tpu.memory_space<vmem>>, vector<1x32x128xf32>,
    %c0_328 = arith.constant 0 : index
    %c0_329 = arith.constant 0 : index
    %c0_330 = arith.constant 0 : index
    %596 = vector.load %arg10[%c0_328, %c0_329, %c0_330] : memref<1x32x128xf32, #tpu.memory_space<vmem>>, vector<1x32x128xf32>
    %597 = vector.shape_cast %596 : vector<1x32x128xf32> to vector<32x128xf32>
    %598 = vector.shape_cast %563 : vector<32x128xf32> to vector<1x32x128xf32>
    tpu.vector_store %arg10[%c0_328, %c0_329, %c0_330], %598 {strides = array<i32>} : memref<1x32x128xf32, #tpu.memory_space<vmem>>, vector<1x32x128xf32>,
    return
  }
  func.func @transform_0(%arg0: i32) -> i32 {
    %c0_i32 = arith.constant 0 : i32
    %c0_i32_0 = arith.constant 0 : i32
    return %c0_i32 : i32
  }
  func.func @transform_1(%arg0: i32) -> i32 {
    %c0_i32 = arith.constant 0 : i32
    %c0_i32_0 = arith.constant 0 : i32
    return %c0_i32 : i32
  }
  func.func @transform_2(%arg0: i32) -> (i32, i32) {
    %c0_i32 = arith.constant 0 : i32
    %c0_i32_0 = arith.constant 0 : i32
    %c0_i32_1 = arith.constant 0 : i32
    return %c0_i32, %c0_i32_0 : i32, i32
  }
  func.func @transform_3(%arg0: i32) -> (i32, i32) {
    %c0_i32 = arith.constant 0 : i32
    %c0_i32_0 = arith.constant 0 : i32
    %c0_i32_1 = arith.constant 0 : i32
    return %c0_i32, %c0_i32_0 : i32, i32
  }
  func.func @transform_4(%arg0: i32) -> (i32, i32) {
    %c0_i32 = arith.constant 0 : i32
    %c0_i32_0 = arith.constant 0 : i32
    %c0_i32_1 = arith.constant 0 : i32
    return %c0_i32, %c0_i32_0 : i32, i32
  }
  func.func @transform_5(%arg0: i32) -> (i32, i32) {
    %c0_i32 = arith.constant 0 : i32
    %c0_i32_0 = arith.constant 0 : i32
    %c0_i32_1 = arith.constant 0 : i32
    return %c0_i32, %c0_i32_0 : i32, i32
  }
  func.func @transform_6(%arg0: i32) -> (i32, i32) {
    %c0_i32 = arith.constant 0 : i32
    %c0_i32_0 = arith.constant 0 : i32
    %c0_i32_1 = arith.constant 0 : i32
    return %c0_i32, %c0_i32_0 : i32, i32
  }
  func.func @transform_7(%arg0: i32) -> (i32, i32, i32) {
    %c0_i32 = arith.constant 0 : i32
    %c0_i32_0 = arith.constant 0 : i32
    %c0_i32_1 = arith.constant 0 : i32
    return %arg0, %c0_i32, %c0_i32_0 : i32, i32, i32
  }
  func.func @transform_8(%arg0: i32) -> (i32, i32, i32) {
    %c0_i32 = arith.constant 0 : i32
    %c0_i32_0 = arith.constant 0 : i32
    %c0_i32_1 = arith.constant 0 : i32
    return %arg0, %c0_i32, %c0_i32_0 : i32, i32, i32
  }
  func.func @transform_9(%arg0: i32) -> (i32, i32, i32) {
    %c0_i32 = arith.constant 0 : i32
    %c0_i32_0 = arith.constant 0 : i32
    %c0_i32_1 = arith.constant 0 : i32
    return %arg0, %c0_i32, %c0_i32_0 : i32, i32, i32
  }
}

</mosaic_0001>

<bundles_post_ra>
// kernel: tpu_custom_call.1
= control target key start
LH: loop header
LB: loop body
LE: loop exit
PB: predicated region body
PF: predicated region fallthrough
CT: control target
= control target key end

     0   :  { %s5632_s0 = inlined_call_operand.hbm [shape: f32[8], index: 0, kind: input, shape index: {}]   ;;  %s5633_s1 = inlined_call_operand.vmem [shape: s32[4], index: 1, kind: input, shape index: {}]   ;;  %s5634_s2 = inlined_call_operand.hbm [shape: f32[32,128], index: 2, kind: input, shape index: {}]   ;;  %s5635_s3 = inlined_call_operand.hbm [shape: f32[32,128], index: 3, kind: input, shape index: {}]   ;;  %s5636_s4 = inlined_call_operand.hbm [shape: f32[32,128], index: 4, kind: input, shape index: {}]   ;;  %s5637_s5 = inlined_call_operand.hbm [shape: f32[32,128], index: 5, kind: input, shape index: {}]   ;;  %s5638_s6 = inlined_call_operand.hbm [shape: f32[32,128], index: 6, kind: input, shape index: {}]   ;;  %s5639_s7 = inlined_call_operand.hbm [shape: f32[4,32,128], index: 7, kind: output, shape index: {0}]   ;;  %s5640_s8 = inlined_call_operand.hbm [shape: f32[4,8,128], index: 8, kind: output, shape index: {1}]   ;;  %s5641_s9 = inlined_call_operand.hbm [shape: f32[4,32,128], index: 9, kind: output, shape index: {2}]  }
   0x1   :  { %5715 = sst [smem:[#allocation58_spill]] %s5632_s0 }
   0x2   :  { %15 = vsyncpa [#allocation14], 0 }
   0x3   :  { %16 = vsyncpa [#allocation15], 0 }
   0x4   :  { %17 = vsyncpa [#allocation12], 0 }
   0x5   :  { %18 = vsyncpa [#allocation19], 0 }
   0x6   :  { %19 = vsyncpa [#allocation22], 0 }
   0x7   :  { %20 = vsyncpa [#allocation13], 0 }
   0x8   :  { %22 = vsyncpa [#allocation13 + $0x1], 0 }
   0x9   :  { %23 = vsyncpa [#allocation26], 0 }
   0xa   :  { %25 = vsyncpa [#allocation26 + $0x1], 0  ;;  %s3272_s30 = smov 0   ;;  %s3274_s10 = smov 0  }
   0xb   :  { %s3276_s11 = smov 0   ;;  %s3278_s12 = smov 0  }
   0xc LB: > { %5716 = sst [smem:[#allocation35_spill]] %s3199_s11  ;;  %s3293_s13 = sadd.s32 4294967295, %s3203_s12   ;;  %s3203_s12 = sphi %s3278_s12, %s5853_s12   ;;  %s3199_s11 = sphi %s3276_s11, %s5855_s11   ;;  %s3195_s10 = sphi %s3274_s10, %s5857_s10   ;;  %s3191_s30 = sphi %s3272_s30, %s5856_s30  }
   0xd   : > { %s5642_s14 = sadd.s32 4294967294, %s3203_s12   ;;  %s3297_s15 = sadd.s32 1, %s3203_s12  }
   0xe   : > { %5717 = sst [smem:[#allocation36_spill]] %s3297_s15  ;;  %s185_s16 = sadd.s32 1, %s3199_s11 }
   0xf   : > { %s182_s17 = ssub.s32 %s3203_s12, %s3297_s15  ;;  %p195_p0 = scmp.ne.s32.totalorder %s3199_s11, %s3195_s10 }
  0x10   : > { %p183_p1 = scmp.eq.s32.totalorder %s182_s17, 0  ;;  %p196_p2 = scmp.eq.s32.totalorder %s3293_s13, 3 }
  0x11   : > { %p201_p3 = scmp.ne.s32.totalorder %s3195_s10, %s3191_s30  ;;  %p202_p4 = scmp.eq.s32.totalorder %s5642_s14, 3 }
  0x12   : > { %s3310_s18 = scalar_select %p183_p1, %s3199_s11, %s185_s16  }
  0x13   : > { %p3312_p5 = por %p196_p2, %p195_p0  ;;  %p3316_p6 = por %p202_p4, %p201_p3 }
  0x14   : > { %5718 = sst [smem:[#allocation37_spill]] %s3310_s18  ;;  %p2716_p7 = scmp.ge.s32.totalorder %s3203_s12, 1 }
  0x15   : > { %s5719_s19 = scalar_select %p3312_p5, 1, 0 }
  0x16   : > { %s5720_s20 = scalar_select %p3316_p6, 1, 0 }
  0x17   : > { %p261_p8 = scmp.lt.s32.totalorder %s3203_s12, 5  ;;  %p5644_p9 = scmp.eq.s32.totalorder %s3293_s13, 0 }
  0x18   : > { %5721 = sst [smem:[#allocation38_spill]] %s5720_s20  ;;  %s3205_s22 = smov [#allocation18]  }
  0x19   : > { %p3323_p10 = pnand %p2716_p7, %p261_p8  ;;  %s306_s23 = sshll.u32 %s3205_s22, 4  ;;  %s307_s23 = int_to_ptr.vmem [resolvable:$true] %s306_s23 }
  0x1a   : > { %s3206_s25 = smov [#allocation21]   ;;  %s2893_s14 = scalar_lea.hbm %s5635_s3, 512 }
  0x1b   : > { %s5722_s21 = scalar_select %p3323_p10, 1, 0 }
  0x1c   : > { %p2792_p11 = pneg %p3323_p10  ;;  %s332_s26 = sshll.u32 %s3206_s25, 4  ;;  %s3335_s26 = int_to_ptr.vmem [resolvable:$true] %s332_s26 }
  0x1d   : > { %p2894_p13 = scmp.ne.s32.totalorder %s5635_s3, %s2893_s14  ;;  %p2900_p3 = scmp.lt.u32.totalorder %s2893_s14, %s5635_s3 }
  0x1e   : > { %p3331_p12 = pnand %p5644_p9, %p2792_p11 }
  0x20   : > { %p3348_p0 = pneg %p3331_p12 }
  0x22   : > { %p2896_p1 = pnand %p3348_p0, %p2894_p13 }
  0x24   : > { %p2897_p2 = pneg %p2896_p1 }
  0x26   : > { %p2902_p4 = pnand %p2900_p3, %p2897_p2 }
  0x28   : > { %2905 = shalt.err (!%p2902_p4)
}
  0x29   : > { %s2906_s28 = scalar_lea.vmem %s307_s23, 512  ;;  %p2914_p9 = scmp.lt.s32.totalorder %s307_s23, %s307_s23 }
  0x2a   : > { %p2907_p7 = scmp.ne.s32.totalorder %s307_s23, %s2906_s28  ;;  %p2915_p6 = scmp.lt.s32.totalorder %s2906_s28, %s2906_s28 }
  0x2c   : > { %p2909_p8 = pnand %p2907_p7, %p3348_p0  ;;  %p2916_p5 = por %p2915_p6, %p2914_p9 }
  0x2e   : > { %p2910_p11 = pneg %p2909_p8 }
  0x30   : > { %p2917_p10 = pnand %p2916_p5, %p2910_p11 }
  0x32   : > { %2920 = shalt.err (!%p2917_p10)
}
  0x33   : > { %s5650_s18 = smov 128   ;;  %s3208_s16 = smov 8  }
  0x34   : > { %2804 = dma.hbm_to_vmem [thread:$0]  (!%p3331_p12), %s5635_s3, 512, %s307_s23, [#allocation19], %s5650_s18, %s5650_s18, %s3208_s16  }
  0x35   : > { %s2921_s27 = scalar_lea.hbm %s5637_s5, 512 }
  0x36   : > { %p2922_p5 = scmp.ne.s32.totalorder %s5637_s5, %s2921_s27  ;;  %p2928_p10 = scmp.lt.u32.totalorder %s2921_s27, %s5637_s5 }
  0x38   : > { %p2924_p6 = pnand %p2922_p5, %p3348_p0 }
  0x3a   : > { %p2925_p9 = pneg %p2924_p6 }
  0x3c   : > { %p2930_p13 = pnand %p2928_p10, %p2925_p9 }
  0x3e   : > { %2933 = shalt.err (!%p2930_p13)
}
  0x3f   : > { %s2934_s23 = scalar_lea.vmem %s3335_s26, 512  ;;  %p2942_p4 = scmp.lt.s32.totalorder %s3335_s26, %s3335_s26 }
  0x40   : > { %p2935_p1 = scmp.ne.s32.totalorder %s3335_s26, %s2934_s23  ;;  %p2943_p7 = scmp.lt.s32.totalorder %s2934_s23, %s2934_s23 }
  0x42   : > { %p2937_p2 = pnand %p2935_p1, %p3348_p0  ;;  %p2944_p8 = por %p2943_p7, %p2942_p4 }
  0x44   : > { %p2938_p3 = pneg %p2937_p2 }
  0x46   : > { %p2945_p11 = pnand %p2944_p8, %p2938_p3 }
  0x48   : > { %2948 = shalt.err (!%p2945_p11)
}
  0x49   : > { %2810 = dma.hbm_to_vmem [thread:$0]  (!%p3331_p12), %s5637_s5, 512, %s3335_s26, [#allocation22], %s5650_s18, %s5650_s18, %s3208_s16  }
  0x4a   : > { %s5725_s0 = sld [smem:[#allocation58_spill]] }
  0x50   : > { %s2949_s17 = scalar_lea.hbm %s5725_s0, 16 }
  0x51   : > { %p2950_p5 = scmp.ne.s32.totalorder %s5725_s0, %s2949_s17  ;;  %p2956_p10 = scmp.lt.u32.totalorder %s2949_s17, %s5725_s0 }
  0x53   : > { %p2952_p6 = pnand %p2950_p5, %p3348_p0 }
  0x55   : > { %p2953_p9 = pneg %p2952_p6 }
  0x57   : > { %p2958_p13 = pnand %p2956_p10, %p2953_p9 }
  0x59   : > { %2961 = shalt.err (!%p2958_p13)
}
  0x5a   : > { %s3209_s23 = smov [#allocation11]   ;;  %s5726_s14 = sshll.u32 %s5633_s1, 4  ;;  %s284_s14 = int_to_ptr.vmem [resolvable:$true] %s5726_s14 }
  0x5b   : > { %2795 = dma.hbm_to_smem (!%p3331_p12), %s5725_s0, 16, %s3209_s23, [#allocation14]  }
  0x5c   : > { %s2962_s22 = scalar_lea.vmem %s284_s14, 16  ;;  %p2970_p4 = scmp.lt.s32.totalorder %s284_s14, %s284_s14 }
  0x5d   : > { %p2963_p1 = scmp.ne.s32.totalorder %s284_s14, %s2962_s22  ;;  %p2971_p7 = scmp.lt.s32.totalorder %s2962_s22, %s2962_s22 }
  0x5f   : > { %p2965_p2 = pnand %p2963_p1, %p3348_p0  ;;  %p2972_p8 = por %p2971_p7, %p2970_p4 }
  0x61   : > { %p2966_p3 = pneg %p2965_p2 }
  0x63   : > { %p2973_p11 = pnand %p2972_p8, %p2966_p3 }
  0x65   : > { %2976 = shalt.err (!%p2973_p11)
}
  0x66   : > { %s3210_s17 = smov [#allocation16]   ;;  %s3211_s25 = smov [#allocation17]  }
  0x67   : > { %2798 = dma.vmem_to_smem (!%p3331_p12), %s284_s14, 16, %s3210_s17, [#allocation15]  }
  0x68   : > { %s293_s27 = sshll.u32 %s3211_s25, 4  ;;  %s3212_s28 = smov [#allocation20]   ;;  %s294_s27 = int_to_ptr.vmem [resolvable:$true] %s293_s27 }
  0x69   : > { %s319_s23 = sshll.u32 %s3212_s28, 4  ;;  %s2977_s20 = scalar_lea.hbm %s5634_s2, 512  ;;  %s3417_s23 = int_to_ptr.vmem [resolvable:$true] %s319_s23 }
  0x6a   : > { %p2978_p5 = scmp.ne.s32.totalorder %s5634_s2, %s2977_s20  ;;  %p2984_p10 = scmp.lt.u32.totalorder %s2977_s20, %s5634_s2 }
  0x6c   : > { %p2980_p6 = pnand %p2978_p5, %p3348_p0 }
  0x6e   : > { %p2981_p9 = pneg %p2980_p6 }
  0x70   : > { %p2986_p13 = pnand %p2984_p10, %p2981_p9 }
  0x72   : > { %2989 = shalt.err (!%p2986_p13)
}
  0x73   : > { %s2990_s17 = scalar_lea.vmem %s294_s27, 512  ;;  %p2998_p4 = scmp.lt.s32.totalorder %s294_s27, %s294_s27 }
  0x74   : > { %p2991_p1 = scmp.ne.s32.totalorder %s294_s27, %s2990_s17  ;;  %p2999_p7 = scmp.lt.s32.totalorder %s2990_s17, %s2990_s17 }
  0x76   : > { %p2993_p2 = pnand %p2991_p1, %p3348_p0  ;;  %p3000_p8 = por %p2999_p7, %p2998_p4 }
  0x78   : > { %p2994_p3 = pneg %p2993_p2 }
  0x7a   : > { %p3001_p11 = pnand %p3000_p8, %p2994_p3 }
  0x7c   : > { %3004 = shalt.err (!%p3001_p11)
}
  0x7d   : > { %s5727_s25 = smov 128   ;;  %s3005_s20 = scalar_lea.hbm %s5636_s4, 512 }
  0x7e   : > { %2801 = dma.hbm_to_vmem [thread:$0]  (!%p3331_p12), %s5634_s2, 512, %s294_s27, [#allocation12], %s5727_s25, %s5727_s25, %s3208_s16  }
  0x7f   : > { %p3006_p5 = scmp.ne.s32.totalorder %s5636_s4, %s3005_s20  ;;  %p3012_p10 = scmp.lt.u32.totalorder %s3005_s20, %s5636_s4 }
  0x81   : > { %p3008_p6 = pnand %p3006_p5, %p3348_p0 }
  0x83   : > { %p3009_p9 = pneg %p3008_p6 }
  0x85   : > { %p3014_p13 = pnand %p3012_p10, %p3009_p9 }
  0x87   : > { %3017 = shalt.err (!%p3014_p13)
}
  0x88   : > { %s3018_s27 = scalar_lea.vmem %s3417_s23, 512  ;;  %p3026_p4 = scmp.lt.s32.totalorder %s3417_s23, %s3417_s23 }
  0x89   : > { %p3019_p1 = scmp.ne.s32.totalorder %s3417_s23, %s3018_s27  ;;  %p3027_p7 = scmp.lt.s32.totalorder %s3018_s27, %s3018_s27 }
  0x8b   : > { %p3021_p2 = pnand %p3019_p1, %p3348_p0  ;;  %p3028_p8 = por %p3027_p7, %p3026_p4 }
  0x8d   : > { %p3022_p3 = pneg %p3021_p2 }
  0x8f   : > { %p3029_p11 = pnand %p3028_p8, %p3022_p3 }
  0x91   : > { %3032 = shalt.err (!%p3029_p11)
}
  0x92   : > { %2807 = dma.hbm_to_vmem [thread:$0]  (!%p3331_p12), %s5636_s4, 512, %s3417_s23, [#allocation19], %s5727_s25, %s5727_s25, %s3208_s16  }
  0x93   : > { %s3213_s26 = smov [#allocation23]   ;;  %s3033_s22 = scalar_lea.hbm %s5638_s6, 512 }
  0x94   : > { %s345_s15 = sshll.u32 %s3213_s26, 4  ;;  %p3034_p5 = scmp.ne.s32.totalorder %s5638_s6, %s3033_s22  ;;  %s346_s15 = int_to_ptr.vmem [resolvable:$true] %s345_s15 }
  0x95   : > { %p3040_p10 = scmp.lt.u32.totalorder %s3033_s22, %s5638_s6 }
  0x96   : > { %p3036_p6 = pnand %p3034_p5, %p3348_p0 }
  0x98   : > { %p3037_p9 = pneg %p3036_p6 }
  0x9a   : > { %p3042_p13 = pnand %p3040_p10, %p3037_p9 }
  0x9c   : > { %3045 = shalt.err (!%p3042_p13)
}
  0x9d   : > { %s3046_s23 = scalar_lea.vmem %s346_s15, 512  ;;  %p3054_p4 = scmp.lt.s32.totalorder %s346_s15, %s346_s15 }
  0x9e   : > { %p3047_p1 = scmp.ne.s32.totalorder %s346_s15, %s3046_s23  ;;  %p3055_p7 = scmp.lt.s32.totalorder %s3046_s23, %s3046_s23 }
  0xa0   : > { %p3049_p2 = pnand %p3047_p1, %p3348_p0  ;;  %p3056_p8 = por %p3055_p7, %p3054_p4 }
  0xa2   : > { %p3050_p3 = pneg %p3049_p2 }
  0xa4   : > { %p3057_p11 = pnand %p3056_p8, %p3050_p3 }
  0xa6   : > { %3060 = shalt.err (!%p3057_p11)
}
  0xa7   : > { %2813 = dma.hbm_to_vmem [thread:$0]  (!%p3331_p12), %s5638_s6, 512, %s346_s15, [#allocation22], %s5727_s25, %s5727_s25, %s3208_s16  }
  0xa8   : > { %p5728_p5 = scmp.ne.s32.totalorder %s5722_s21, 0 }
  0xaa   : > { %361 = sbr.rel (%p5728_p5) target bundleno = 2246 (0x8c6), region = 48 }
  0xb1   : > { %p5729_p0 = scmp.eq.s32.totalorder %s3293_s13, 0 }
  0xb3   : > { %3162 = dma.done.wait (%p5729_p0), [#allocation14], 16   ;;  %p5730_p6 = pmov %p5729_p0 }
  0xb4   : > { %p5731_p9 = pmov %p5729_p0 }
  0xb5   : > { %3164 = vsyncadd (%p5730_p6), [#allocation14], 4294967280 }
  0xb6   : > { %3166 = dma.done.wait (%p5731_p9), [#allocation15], 16   ;;  %p5732_p10 = pmov %p5729_p0 }
  0xb7   : > { %p5733_p13 = pmov %p5729_p0 }
  0xb8   : > { %3168 = vsyncadd (%p5732_p10), [#allocation15], 4294967280 }
  0xb9   : > { %3170 = dma.done.wait (%p5733_p13), [#allocation12], 512   ;;  %p5734_p12 = pmov %p5729_p0 }
  0xba   : > { %p5735_p1 = pmov %p5729_p0 }
  0xbb   : > { %3172 = vsyncadd (%p5734_p12), [#allocation12], 4294966784 }
  0xbc   : > { %3174 = dma.done.wait (%p5735_p1), [#allocation19], 1024   ;;  %p5736_p2 = pmov %p5729_p0 }
  0xbd   : > { %p5737_p3 = pmov %p5729_p0 }
  0xbe   : > { %3176 = vsyncadd (%p5736_p2), [#allocation19], 4294966272 }
  0xbf   : > { %3178 = dma.done.wait (%p5737_p3), [#allocation22], 1024   ;;  %p5738_p4 = pmov %p5729_p0 }
  0xc1   : > { %3180 = vsyncadd (%p5738_p4), [#allocation22], 4294966272 }
  0xc2   : > { %391 = sfence }
  0xc3   : > { %v3214_v0 = vmov 0.0   ;;  %s3215_s11 = smov 1   ;;  %s3216_s21 = smov 127   ;;  %v3513_v1 = vld [vmem:[#allocation20 + $0x8] sm:$0xff]  ;;  %v3515_v2 = vld [vmem:[#allocation20 + $0x10] sm:$0xff]  ;;  %v3519_v3 = vld [vmem:[#allocation20] sm:$0xff]  ;;  %v471_v4 = vlaneseq }
  0xc4   : > { %623 = vrot.lane.b32.xlu0 %v3214_v0, %s3215_s11  ;;  %2885 = vrcp.f32 %v3513_v1  ;;  %v3521_v5 = vld [vmem:[#allocation20 + $0x18] sm:$0xff]  ;;  %v523_v15 = vld [vmem:[#allocation23 + $0x8] sm:$0xff]  ;;  %v524_v16 = vld [vmem:[#allocation23 + $0x10] sm:$0xff]  ;;  %s3545_s24 = sand.u32 1, %s3195_s10   ;;  %s3617_s28 = sld [smem:[#allocation16 + %s3293_s13]] }
  0xc5   : > { %2887 = vrcp.f32 %v3515_v2  ;;  %v3524_v6 = vshrl.u32 %v471_v4, 7  ;;  %v3527_v8 = vand.u32 127, %v471_v4  ;;  %v522_v25 = vld [vmem:[#allocation23] sm:$0xff]  ;;  %s2733_s16 = sshll.u32 %s3545_s24, 3  ;;  %v525_v35 = vld [vmem:[#allocation23 + $0x18] sm:$0xff]  ;;  %v432_v46 = vld [vmem:[#allocation18 + $0x8] sm:$0xff] }
  0xc6   : > { %2889 = vrcp.f32 %v3519_v3  ;;  %s3577_s25 = scalar_lea.vmem [#allocation25], %s2733_s16  ;;  %v448_v47 = vmul.f32 %v432_v46, %v432_v46  ;;  %v428_v48 = vld [vmem:[#allocation17 + $0x8] sm:$0xff]  ;;  %v433_v49 = vld [vmem:[#allocation18 + $0x10] sm:$0xff]  ;;  %v431_v50 = vld [vmem:[#allocation18] sm:$0xff]  ;;  %s3628_s26 = sld [smem:[#allocation11]] }
  0xc7   : > { %2891 = vrcp.f32 %v3521_v5  ;;  %vm571_vm0 = vcmp.gt.s32.totalorder %v3524_v6, 0  ;;  %v475_v10 = vadd.s32 24, %v3524_v6  ;;  %vm557_vm1 = vcmp.gt.s32.totalorder %v3527_v8, 0  ;;  %v434_v53 = vld [vmem:[#allocation18 + $0x18] sm:$0xff]  ;;  %v429_v56 = vld [vmem:[#allocation17 + $0x10] sm:$0xff]  ;;  %v427_v57 = vld [vmem:[#allocation17] sm:$0xff] }
  0xc8   : > { %656 = vrot.lane.b32.xlu0 %v3214_v0, %s3216_s21  ;;  %v3533_v11 = vsel %vm571_vm0, 1.0, %v3214_v0  ;;  %v3536_v17 = vsel %vm557_vm1, 1.0, %v3214_v0  ;;  %vm564_vm2 = vcmp.lt.s32.totalorder %v3527_v8, 127  ;;  %v440_v51 = vmul.f32 %v428_v48, %v428_v48  ;;  %v430_v60 = vld [vmem:[#allocation17 + $0x18] sm:$0xff]  ;;  %s3925_s15 = sld [smem:[#allocation11 + $0x1]]  ;;  %s4188_s20 = sld [smem:[#allocation11 + $0x2]] }
  0xc9   : > { %5739 = vst [vmem:[#allocation39_spill] sm:$0xff] %v3533_v11  ;;  %vm590_vm3 = vcmp.lt.s32.totalorder %v475_v10, 31  ;;  %v636_v19 = vmul.f32 0.0, %v3533_v11  ;;  %v3548_v26 = vsel %vm564_vm2, 1.0, %v3214_v0  ;;  %v3606_v52 = vmul.f32 %v448_v47, %v3513_v1  ;;  %s4447_s29 = sld [smem:[#allocation11 + $0x3]]  ;;  %s4706_s22 = sld [smem:[#allocation11 + $0x4]] }
  0xca   : > { %5742 = vst [vmem:[#allocation42_spill] sm:$0xff] %v3548_v26  ;;  %v3552_v28 = vsel %vm590_vm3, 1.0, %v3214_v0  ;;  %v449_v54 = vmul.f32 %v433_v49, %v433_v49  ;;  %v447_v55 = vmul.f32 %v431_v50, %v431_v50  ;;  %v444_v58 = vmul.f32 %v440_v51, %v3513_v1  ;;  %v464_v1 = vld [vmem:[#allocation21 + $0x8] sm:$0xff]  ;;  %v466_v49 = vld [vmem:[#allocation21 + $0x18] sm:$0xff]  ;;  %s4965_s14 = sld [smem:[#allocation11 + $0x5]]  ;;  %s5228_s17 = sld [smem:[#allocation11 + $0x6]] }
  0xcb   : > { %5743 = vst [vmem:[#allocation43_spill] sm:$0xff] %v3552_v28  ;;  %v670_v37 = vmul.f32 0.0, %v3552_v28  ;;  %v456_v59 = vmul.f32 2.0, %v3606_v52  ;;  %v450_v61 = vmul.f32 %v434_v53, %v434_v53  ;;  %v441_v62 = vmul.f32 %v429_v56, %v429_v56  ;;  %s2732_s27 = sshll.u32 %s3545_s24, 5  ;;  %s2482_s23 = sand.u32 1, %s3293_s13  }
  0xcc   : > { %v3611_v63 = vmul.f32 %v449_v54, %v3515_v2  ;;  %v3614_v4 = vmul.f32 %v447_v55, %v3519_v3  ;;  %vm634_vm4 = vcmp.lt.s32.totalorder %v3524_v6, 1  ;;  %vm478_vm5 = vcmp.eq.s32.totalorder %v3524_v6, 1  ;;  %s2751_s0 = sshll.u32 %s3293_s13, 7  ;;  %s2517_s18 = sshll.u32 %s3577_s25, 4  ;;  %s5469_s18 = int_to_ptr.vmem [resolvable:$true] %s2517_s18 }
  0xcd   : > { %v460_v10 = vsub.f32 %v444_v58, %v456_v59  ;;  %vm535_vm6 = vcmp.eq.s32.totalorder %v3524_v6, 2  ;;  %v736_v54 = vstv %s3628_s26  ;;  %vm666_vm8 = vcmp.lt.s32.totalorder %v3524_v6, 7  ;;  %s2756_s16 = sshll.u32 %s3293_s13, 9  ;;  %p5847_p8 = scmp.ne.s32.totalorder %s5719_s19, 0 }
  0xce   : > { %v2886_v7 = vpop.eup %2885 }
  0xcf   : > { %v2888_v9 = vpop.eup %2887  ;;  %v517_v12 = vmul.f32 5e-05, %v2886_v7  ;;  %v439_v7 = vmul.f32 %v427_v57, %v427_v57 }
  0xd0   : > { %v519_v13 = vmul.f32 5e-05, %v2888_v9  ;;  %v2890_v14 = vpop.eup %2889  ;;  %v442_v9 = vmul.f32 %v430_v60, %v430_v60 }
  0xd1   : > { %v2892_v20 = vpop.eup %2891  ;;  %v3540_v21 = vmul.f32 %v523_v15, %v517_v12  ;;  %v515_v24 = vmul.f32 5e-05, %v2890_v14  ;;  %v3620_v12 = vmul.f32 %v450_v61, %v3521_v5  ;;  %v457_v14 = vmul.f32 2.0, %v3611_v63 }
  0xd2   : > { %v3542_v22 = vmul.f32 %v524_v16, %v519_v13  ;;  %v521_v29 = vmul.f32 5e-05, %v2892_v20  ;;  %v3623_v13 = vmul.f32 %v441_v62, %v3515_v2  ;;  %v455_v15 = vmul.f32 2.0, %v3614_v4 }
  0xd3   : > { %5740 = vst [vmem:[#allocation40_spill] sm:$0xff] %v3540_v21  ;;  %v3561_v34 = vmul.f32 %v522_v25, %v515_v24  ;;  %v443_v16 = vmul.f32 %v439_v7, %v3519_v3  ;;  %v468_v20 = vmul.f32 %v464_v1, %v460_v10  ;;  %v458_v24 = vmul.f32 2.0, %v3620_v12 }
  0xd4   : > { %5741 = vst [vmem:[#allocation41_spill] sm:$0xff] %v3542_v22  ;;  %v3572_v39 = vmul.f32 %v525_v35, %v521_v29  ;;  %v461_v25 = vsub.f32 %v3623_v13, %v457_v14  ;;  %v539_v3 = vstv %s3617_s28  ;;  %v465_v29 = vld [vmem:[#allocation21 + $0x10] sm:$0xff]  ;;  %v738_v10 = vmul.f32 0.0, %v736_v54 }
  0xd5   : > { %5744 = vst [vmem:[#allocation44_spill] sm:$0xff] %v3561_v34  ;;  %vm540_vm7 = vcmp.eq.s32.totalorder %v3527_v8, %v539_v3  ;;  %v482_v53 = vsel %vm478_vm5, %v455_v15, %v443_v16  ;;  %v3654_v56 = vmul.f32 5e-05, %v468_v20 }
  0xd6   : > { %5745 = vst [vmem:[#allocation45_spill] sm:$0xff] %v3572_v39  ;;  %v469_v50 = vmul.f32 %v465_v29, %v461_v25  ;;  %vm541_vm9 = vmand %vm535_vm6, %vm540_vm7 }
  0xd7   : > { %5746 = vst [vmem:[#allocation46_spill] sm:$0xff] %v3654_v56  ;;  %v3685_v25 = vsel %vm541_vm9, 1.0, %v3214_v0 }
  0xd8   : > { %v3667_v62 = vmul.f32 5e-05, %v469_v50  ;;  %5750 = vst [vmem:[#allocation50_spill] sm:$0xff] %v3685_v25 }
  0xda   : > { %5747 = vst [vmem:[#allocation47_spill] sm:$0xff] %v3667_v62 }
 0x136   : > { %v624_v18 = vpop.permute.xlu0 %623 }
 0x137   : > { %v625_v23 = vsub.f32 0.0, %v624_v18  ;;  %v3631_v18 = vmul.f32 %v442_v9, %v3521_v5  ;;  %v463_v5 = vld [vmem:[#allocation21] sm:$0xff] }
 0x139   : > { %v626_v27 = vmul.f32 %v3536_v17, %v625_v23 }
 0x13a   : > { %v657_v30 = vpop.permute.xlu0 %656 }
 0x13b   : > { %v640_v31 = vadd.f32 %v636_v19, %v626_v27  ;;  %v3556_v32 = vmul.f32 %v626_v27, %v3540_v21  ;;  %v3559_v33 = vmul.f32 %v626_v27, %v3542_v22  ;;  %v658_v36 = vmul.f32 %v3548_v26, %v657_v30 }
 0x13c   : > { %v3589_v43 = vmul.f32 %v626_v27, %v3572_v39  ;;  %v459_v27 = vsub.f32 %v443_v16, %v455_v15 }
 0x13d   : > { %687 = vrot.lane.b32.xlu0 %v3559_v33, %s3216_s21  ;;  %685 = vrot.lane.b32.xlu1 %v3556_v32, %s3216_s21  ;;  %v3570_v38 = vmul.f32 %v658_v36, %v3561_v34  ;;  %v3575_v40 = vmul.f32 %v640_v31, %v3561_v34  ;;  %v674_v41 = vadd.f32 %v670_v37, %v658_v36 }
 0x13e   : > { %v3582_v42 = vmul.f32 %v658_v36, %v3540_v21  ;;  %v3599_v45 = vmul.f32 %v658_v36, %v3542_v22  ;;  %v495_v36 = vsub.f32 %v444_v58, %v468_v20  ;;  %v467_v51 = vmul.f32 %v463_v5, %v459_v27 }
 0x13f   : > { %809 = vst [vmem:[%s3577_s25 - $0x2] sm:$0x4] %v3570_v38  ;;  %v3592_v44 = vmul.f32 %v674_v41, %v3572_v39  ;;  %v699_v23 = vrot.slane %v3570_v38, 7  ;;  %v462_v41 = vsub.f32 %v3631_v18, %v458_v24  ;;  %v765_v14 = vrot.slane %v3575_v40, 1 }
 0x140   : > { %v700_v19 = vrot.slane %v3582_v42, 7  ;;  %v701_v30 = vrot.slane %v3599_v45, 7  ;;  %v3669_v7 = vmul.f32 5e-05, %v495_v36  ;;  %v494_v15 = vsub.f32 %v482_v53, %v467_v51 }
 0x141   : > { %781 = vrot.lane.b32.xlu0 %v3570_v38, %s3215_s11  ;;  %683 = vrot.lane.b32.xlu1 %v3575_v40, %s3216_s21  ;;  %v702_v2 = vrot.slane %v3592_v44, 7  ;;  %v470_v61 = vmul.f32 %v466_v49, %v462_v41  ;;  %v768_v24 = vrot.slane %v3589_v43, 1 }
 0x142   : > { %v705_v37 = vsel %vm634_vm4, %v699_v23, %v700_v19  ;;  %v704_v55 = vsel %vm634_vm4, %v700_v19, %v701_v30  ;;  %5748 = vst [vmem:[#allocation48_spill] sm:$0xff] %v3669_v7 }
 0x143   : > { %v706_v48 = vsel %vm634_vm4, %v702_v2, %v699_v23  ;;  %v3658_v58 = vsub.f32 %v3582_v42, %v705_v37  ;;  %v3675_v1 = vsub.f32 %v3599_v45, %v704_v55  ;;  %v3681_v23 = vmul.f32 5e-05, %v467_v51 }
 0x144   : > { %v707_v8 = vsub.f32 %v3570_v38, %v706_v48  ;;  %v703_v5 = vsel %vm634_vm4, %v701_v30, %v702_v2  ;;  %v737_v48 = vmul.f32 %v3685_v25, %v736_v54  ;;  %v3721_v51 = vmul.f32 5e-05, %v494_v15 }
 0x145   : > { %783 = vrot.lane.b32.xlu0 %v3582_v42, %s3215_s11  ;;  %689 = vrot.lane.b32.xlu1 %v3589_v43, %s3216_s21  ;;  %5749 = vst [vmem:[#allocation49_spill] sm:$0xff] %v3681_v23  ;;  %v3710_v2 = vsub.f32 %v3592_v44, %v703_v5  ;;  %v766_v55 = vrot.slane %v3556_v32, 1 }
 0x146   : > { %v3692_v3 = vmul.f32 %v3533_v11, %v707_v8 }
 0x147   : > { %v771_v5 = vsel %vm666_vm8, %v765_v14, %v766_v55 }
 0x149   : > { %787 = vrot.lane.b32.xlu1 %v3592_v44, %s3215_s11 }
 0x14d   : > { %785 = vrot.lane.b32.xlu1 %v3599_v45, %s3215_s11 }
 0x1af   : > { %v688_v31 = vpop.permute.xlu0 %687  ;;  %v686_v35 = vpop.permute.xlu1 %685 }
 0x1b0   : > { %v693_v46 = vsub.f32 %v688_v31, %v3559_v33  ;;  %v692_v47 = vsub.f32 %v686_v35, %v3556_v32  ;;  %v496_v35 = vsub.f32 %v3623_v13, %v469_v50  ;;  %v3712_v13 = vmul.f32 5e-05, %v470_v61 }
 0x1b2   : > { %v696_v57 = vmul.f32 %v3548_v26, %v692_v47  ;;  %v3662_v59 = vmul.f32 %v3548_v26, %v693_v46  ;;  %v497_v46 = vsub.f32 %v3631_v18, %v470_v61  ;;  %v772_v47 = vsel %vm666_vm8, %v768_v24, %v765_v14  ;;  %5751 = vst [vmem:[#allocation51_spill] sm:$0xff] %v3712_v13 }
 0x1b3   : > { %v684_v60 = vpop.permute.xlu1 %683  ;;  %v782_v20 = vpop.permute.xlu0 %781 }
 0x1b4   : > { %v3672_v9 = vadd.f32 %v3658_v58, %v696_v57  ;;  %v691_v16 = vsub.f32 %v684_v60, %v3575_v40  ;;  %v3689_v27 = vadd.f32 %v3675_v1, %v3662_v59  ;;  %v750_v36 = vmul.f32 %v696_v57, %v3669_v7 }
 0x1b5   : > { %v789_v18 = vsub.f32 %v3570_v38, %v782_v20  ;;  %v776_v60 = vsub.f32 %v772_v47, %v3589_v43 }
 0x1b6   : > { %v728_v19 = vmul.f32 %v3672_v9, %v3654_v56  ;;  %v695_v29 = vmul.f32 %v3548_v26, %v691_v16  ;;  %v729_v50 = vmul.f32 %v3689_v27, %v3667_v62  ;;  %v3733_v16 = vmul.f32 5e-05, %v496_v35 }
 0x1b7   : > { %v690_v31 = vpop.permute.xlu1 %689  ;;  %v784_v57 = vpop.permute.xlu0 %783  ;;  %v793_v47 = vmul.f32 %v3536_v17, %v789_v18  ;;  %v780_v14 = vmul.f32 %v3552_v28, %v776_v60 }
 0x1b8   : > { %v694_v0 = vsub.f32 %v690_v31, %v3589_v43  ;;  %v3700_v37 = vadd.f32 %v738_v10, %v728_v19  ;;  %v3703_v41 = vadd.f32 %v3692_v3, %v695_v29  ;;  %v749_v15 = vmul.f32 %v695_v29, %v3721_v51 }
 0x1b9   : > { %v767_v19 = vrot.slane %v3559_v33, 1  ;;  %v3739_v31 = vmul.f32 5e-05, %v497_v46  ;;  %v790_v35 = vsub.f32 %v3582_v42, %v784_v57  ;;  %v3748_v29 = vadd.f32 %v738_v10, %v729_v50 }
 0x1ba   : > { %v698_v30 = vmul.f32 %v3548_v26, %v694_v0  ;;  %v3716_v49 = vadd.f32 %v750_v36, %v3700_v37  ;;  %v727_v53 = vmul.f32 %v3703_v41, %v3681_v23 }
 0x1bb   : > { %v788_v54 = vpop.permute.xlu1 %787  ;;  %v770_v18 = vsel %vm666_vm8, %v766_v55, %v767_v19  ;;  %v769_v57 = vsel %vm666_vm8, %v767_v19, %v768_v24  ;;  %v794_v55 = vmul.f32 %v3536_v17, %v790_v35 }
 0x1bc   : > { %v3727_v8 = vadd.f32 %v3710_v2, %v698_v30  ;;  %v792_v61 = vsub.f32 %v3592_v44, %v788_v54  ;;  %832 = vrot.lane.b32.xlu1 %v3716_v49, %s3215_s11  ;;  %v741_v20 = vadd.f32 %v737_v48, %v727_v53  ;;  %v752_v48 = vmul.f32 %v698_v30, %v3739_v31 }
 0x1bd   : > { %v3763_v30 = vmul.f32 5e-05, %v3620_v12  ;;  %v775_v24 = vsub.f32 %v769_v57, %v3559_v33  ;;  %v774_v12 = vsub.f32 %v770_v18, %v3556_v32 }
 0x1be   : > { %v730_v36 = vmul.f32 %v3727_v8, %v3712_v13  ;;  %v796_v0 = vmul.f32 %v3536_v17, %v792_v61  ;;  %v3746_v62 = vadd.f32 %v749_v15, %v741_v20  ;;  %v751_v13 = vmul.f32 %v3662_v59, %v3733_v16 }
 0x1bf   : > { %v786_v54 = vpop.permute.xlu1 %785  ;;  %v773_v61 = vsub.f32 %v771_v5, %v3575_v40  ;;  %v3769_v59 = vmul.f32 5e-05, %v3614_v4  ;;  %v3785_v4 = vmul.f32 5e-05, %v3611_v63 }
 0x1c0   : > { %v791_v46 = vsub.f32 %v3599_v45, %v786_v54  ;;  %v744_v53 = vadd.f32 %v738_v10, %v730_v36  ;;  %830 = vrot.lane.b32.xlu0 %v3746_v62, %s3215_s11  ;;  %v800_v50 = vadd.f32 %v796_v0, %v780_v14  ;;  %v3773_v5 = vadd.f32 %v751_v13, %v3748_v29 }
 0x1c1   : > { %v797_v15 = vadd.f32 %v793_v47, %v773_v61  ;;  %v3791_v0 = vmul.f32 5e-05, %v3606_v52  ;;  %v798_v47 = vadd.f32 %v794_v55, %v774_v12  ;;  %v758_v12 = vmul.f32 %v3658_v58, %v3669_v7 }
 0x1c2   : > { %v795_v10 = vmul.f32 %v3536_v17, %v791_v46  ;;  %v3766_v60 = vadd.f32 %v752_v48, %v744_v53  ;;  %v3782_v19 = vmul.f32 %v800_v50, %v3763_v30  ;;  %v760_v48 = vmul.f32 %v3710_v2, %v3739_v31 }
 0x1c3   : > { %v3788_v13 = vmul.f32 %v797_v15, %v3769_v59  ;;  %5752 = vst [vmem:[#allocation52_spill] sm:$0xff] %v3791_v0  ;;  %v3801_v63 = vmul.f32 %v798_v47, %v3791_v0  ;;  %v757_v46 = vmul.f32 %v3692_v3, %v3721_v51 }
 0x1c4   : > { %836 = vrot.lane.b32.xlu1 %v3766_v60, %s3215_s11  ;;  %834 = vrot.lane.b32.xlu0 %v3773_v5, %s3215_s11  ;;  %v799_v36 = vadd.f32 %v795_v10, %v775_v24  ;;  %v853_v54 = vrot.slane %v3782_v19, 7  ;;  %v3814_v61 = vadd.f32 %v760_v48, %v744_v53 }
 0x1c5   : > { %v851_v52 = vrot.slane %v3801_v63, 7  ;;  %v850_v14 = vrot.slane %v3788_v13, 7  ;;  %v3821_v15 = vadd.f32 %v757_v46, %v741_v20  ;;  %v3835_v46 = vadd.f32 %v758_v12, %v3700_v37 }
 0x1c6   : > { %v3798_v35 = vmul.f32 %v799_v36, %v3785_v4  ;;  %v905_v24 = vrot.slane %v3814_v61, 1 }
 0x1c7   : > { %v856_v18 = vsel %vm634_vm4, %v850_v14, %v851_v52  ;;  %v857_v10 = vsel %vm634_vm4, %v853_v54, %v850_v14  ;;  %v902_v48 = vrot.slane %v3821_v15, 1  ;;  %v759_v14 = vmul.f32 %v3675_v1, %v3733_v16 }
 0x1c8   : > { %888 = vrot.lane.b32.xlu1 %v3782_v19, %s3216_s21  ;;  %882 = vrot.lane.b32.xlu0 %v3788_v13, %s3216_s21  ;;  %v859_v2 = vsub.f32 %v3801_v63, %v856_v18  ;;  %v858_v3 = vsub.f32 %v3788_v13, %v857_v10  ;;  %v852_v53 = vrot.slane %v3798_v35, 7 }
 0x1ca   : > { %v854_v58 = vsel %vm634_vm4, %v852_v53, %v853_v54  ;;  %v903_v54 = vrot.slane %v3835_v46, 1 }
 0x1cc   : > { %886 = vrot.lane.b32.xlu1 %v3798_v35, %s3216_s21  ;;  %884 = vrot.lane.b32.xlu0 %v3801_v63, %s3216_s21 }
 0x22e   : > { %v833_v57 = vpop.permute.xlu1 %832 }
 0x22f   : > { %v839_v50 = vsub.f32 %v3716_v49, %v833_v57  ;;  %v862_v57 = vmul.f32 %v3533_v11, %v858_v3  ;;  %v855_v3 = vsel %vm634_vm4, %v851_v52, %v852_v53 }
 0x231   : > { %v843_v55 = vmul.f32 %v3536_v17, %v839_v50 }
 0x232   : > { %v831_v47 = vpop.permute.xlu0 %830 }
 0x233   : > { %v867_v36 = vadd.f32 %v859_v2, %v843_v55  ;;  %v838_v20 = vsub.f32 %v3746_v62, %v831_v47  ;;  %v909_v2 = vsel %vm666_vm8, %v905_v24, %v902_v48  ;;  %v3845_v55 = vadd.f32 %v759_v14, %v3748_v29 }
 0x234   : > { %v860_v14 = vsub.f32 %v3798_v35, %v855_v3 }
 0x235   : > { %v871_v18 = vmul.f32 %v867_v36, %v3540_v21  ;;  %v842_v50 = vmul.f32 %v3536_v17, %v838_v20  ;;  %v861_v20 = vsub.f32 %v3782_v19, %v854_v58  ;;  %v908_v58 = vsel %vm666_vm8, %v902_v48, %v903_v54 }
 0x236   : > { %v837_v10 = vpop.permute.xlu1 %836  ;;  %v835_v12 = vpop.permute.xlu0 %834 }
 0x237   : > { %v3848_v1 = vadd.f32 %v871_v18, %v3556_v32  ;;  %v841_v37 = vsub.f32 %v3766_v60, %v837_v10  ;;  %v866_v36 = vadd.f32 %v862_v57, %v842_v50  ;;  %v840_v47 = vsub.f32 %v3773_v5, %v835_v12 }
 0x238   : > { %v913_v32 = vsub.f32 %v909_v2, %v3814_v61  ;;  %v904_v18 = vrot.slane %v3845_v55, 1 }
 0x239   : > { %v845_v0 = vmul.f32 %v3536_v17, %v841_v37  ;;  %932 = vrot.lane.b32.xlu1 %v3848_v1, %s3216_s21  ;;  %v870_v29 = vmul.f32 %v866_v36, %v3561_v34  ;;  %v844_v52 = vmul.f32 %v3536_v17, %v840_v47 }
 0x23a   : > { %v889_v53 = vpop.permute.xlu1 %888  ;;  %v883_v10 = vpop.permute.xlu0 %882  ;;  %v917_v47 = vmul.f32 %v3552_v28, %v913_v32  ;;  %v907_v32 = vsel %vm666_vm8, %v903_v54, %v904_v18 }
 0x23b   : > { %v869_v57 = vadd.f32 %v861_v20, %v845_v0  ;;  %v893_v50 = vsub.f32 %v889_v53, %v3782_v19  ;;  %v3868_v37 = vadd.f32 %v870_v29, %v3575_v40  ;;  %v868_v2 = vadd.f32 %v860_v14, %v844_v52 }
 0x23c   : > { %v890_v12 = vsub.f32 %v883_v10, %v3788_v13  ;;  %v910_v20 = vsub.f32 %v908_v58, %v3821_v15  ;;  %v906_v40 = vsel %vm666_vm8, %v904_v18, %v905_v24  ;;  %v911_v54 = vsub.f32 %v907_v32, %v3835_v46 }
 0x23d   : > { %v873_v3 = vmul.f32 %v869_v57, %v3572_v39  ;;  %v897_v36 = vmul.f32 %v3548_v26, %v893_v50  ;;  %v872_v0 = vmul.f32 %v868_v2, %v3542_v22  ;;  %930 = vrot.lane.b32.xlu0 %v3868_v37, %s3216_s21  ;;  %v912_v24 = vsub.f32 %v906_v40, %v3845_v55 }
 0x23e   : > { %v894_v53 = vmul.f32 %v3548_v26, %v890_v12  ;;  %v887_v48 = vpop.permute.xlu1 %886  ;;  %v885_v57 = vpop.permute.xlu0 %884  ;;  %v983_v32 = vstv %s3925_s15  ;;  %s5467_s15 = scalar_lea.hbm %s5640_s8, %s2751_s0 }
 0x23f   : > { %v3882_v29 = vadd.f32 %v873_v3, %v3589_v43  ;;  %v921_v14 = vadd.f32 %v917_v47, %v897_v36  ;;  %v892_v52 = vsub.f32 %v887_v48, %v3798_v35  ;;  %v3888_v50 = vadd.f32 %v872_v0, %v3559_v33 }
 0x240   : > { %v918_v58 = vadd.f32 %v910_v20, %v894_v53  ;;  %v891_v10 = vsub.f32 %v885_v57, %v3801_v63 }
 0x241   : > { %5753 = vst [vmem:[#allocation53_spill] sm:$0xff] %v3882_v29  ;;  %v925_v2 = vmul.f32 %v921_v14, %v3572_v39  ;;  %v896_v43 = vmul.f32 %v3548_v26, %v892_v52  ;;  %936 = vrot.lane.b32.xlu1 %v3882_v29, %s3216_s21  ;;  %934 = vrot.lane.b32.xlu0 %v3888_v50, %s3216_s21 }
 0x242   : > { %v922_v12 = vmul.f32 %v918_v58, %v3561_v34  ;;  %v895_v33 = vmul.f32 %v3548_v26, %v891_v10  ;;  %v1019_v10 = vrot.slane %v3882_v29, 1 }
 0x243   : > { %v3902_v18 = vadd.f32 %v925_v2, %v3592_v44  ;;  %v920_v3 = vadd.f32 %v912_v24, %v896_v43  ;;  %v721_v43 = vmul.f32 %v3689_v27, %v3689_v27 }
 0x244   : > { %v3905_v36 = vadd.f32 %v922_v12, %v3570_v38  ;;  %v919_v47 = vadd.f32 %v911_v54, %v895_v33  ;;  %v1016_v33 = vrot.slane %v3868_v37, 1 }
 0x245   : > { %5754 = vst [vmem:[#allocation54_spill] sm:$0xff] %v3902_v18  ;;  %v924_v0 = vmul.f32 %v920_v3, %v3542_v22  ;;  %1038 = vrot.lane.b32.xlu1 %v3902_v18, %s3215_s11  ;;  %v949_v48 = vrot.slane %v3902_v18, 7  ;;  %v3947_v3 = vmul.f32 0.0, %v983_v32 }
 0x246   : > { %5755 = vst [vmem:[#allocation55_spill] sm:$0xff] %v3905_v36  ;;  %v923_v20 = vmul.f32 %v919_v47, %v3540_v21  ;;  %1032 = vrot.lane.b32.xlu0 %v3905_v36, %s3215_s11  ;;  %1060 = vst [vmem:[%s3577_s25 - $0x1] sm:$0x4] %v3905_v36  ;;  %v946_v40 = vrot.slane %v3905_v36, 7  ;;  %v720_v47 = vmul.f32 %v3672_v9, %v3672_v9 }
 0x247   : > { %v3916_v44 = vadd.f32 %v924_v0, %v3599_v45  ;;  %v719_v0 = vmul.f32 %v3703_v41, %v3703_v41 }
 0x248   : > { %v3919_v53 = vadd.f32 %v923_v20, %v3582_v42  ;;  %v953_v52 = vsel %vm634_vm4, %v949_v48, %v946_v40  ;;  %v722_v20 = vmul.f32 %v3727_v8, %v3727_v8  ;;  %v984_v8 = vmul.f32 %v3685_v25, %v983_v32 }
 0x249   : > { %1036 = vrot.lane.b32.xlu1 %v3916_v44, %s3215_s11  ;;  %v954_v2 = vsub.f32 %v3905_v36, %v953_v52  ;;  %v948_v24 = vrot.slane %v3916_v44, 7 }
 0x24a   : > { %1034 = vrot.lane.b32.xlu0 %v3919_v53, %s3215_s11  ;;  %v947_v38 = vrot.slane %v3919_v53, 7 }
 0x24b   : > { %v3961_v52 = vmul.f32 %v3533_v11, %v954_v2  ;;  %v950_v41 = vsel %vm634_vm4, %v948_v24, %v949_v48  ;;  %v1018_v48 = vrot.slane %v3888_v50, 1 }
 0x24c   : > { %v952_v42 = vsel %vm634_vm4, %v946_v40, %v947_v38 }
 0x24d   : > { %v3938_v58 = vsub.f32 %v3919_v53, %v952_v42  ;;  %v1023_v42 = vsel %vm666_vm8, %v1019_v10, %v1016_v33 }
 0x24e   : > { %v1027_v11 = vsub.f32 %v1023_v42, %v3882_v29 }
 0x2ab   : > { %v933_v45 = vpop.permute.xlu1 %932 }
 0x2ac   : > { %v939_v14 = vsub.f32 %v933_v45, %v3848_v1 }
 0x2ae   : > { %v943_v57 = vmul.f32 %v3548_v26, %v939_v14  ;;  %v1017_v14 = vrot.slane %v3848_v1, 1 }
 0x2af   : > { %v931_v54 = vpop.permute.xlu0 %930 }
 0x2b0   : > { %v963_v12 = vadd.f32 %v3938_v58, %v943_v57  ;;  %v938_v40 = vsub.f32 %v931_v54, %v3868_v37  ;;  %v997_v32 = vmul.f32 %v943_v57, %v3669_v7 }
 0x2b2   : > { %v967_v45 = vmul.f32 %v963_v12, %v963_v12  ;;  %v975_v27 = vmul.f32 %v963_v12, %v3654_v56  ;;  %v942_v9 = vmul.f32 %v3548_v26, %v938_v40  ;;  %v951_v56 = vsel %vm634_vm4, %v947_v38, %v948_v24 }
 0x2b3   : > { %v937_v22 = vpop.permute.xlu1 %936  ;;  %v935_v39 = vpop.permute.xlu0 %934 }
 0x2b4   : > { %v3967_v54 = vadd.f32 %v967_v45, %v720_v47  ;;  %v941_v12 = vsub.f32 %v937_v22, %v3882_v29  ;;  %v3973_v34 = vadd.f32 %v3947_v3, %v975_v27  ;;  %v962_v2 = vadd.f32 %v3961_v52, %v942_v9  ;;  %v5758_v29 = vld [vmem:[#allocation51_spill] sm:$0xff] }
 0x2b5   : > { %v940_v40 = vsub.f32 %v935_v39, %v3888_v50  ;;  %v3982_v22 = vsub.f32 %v3902_v18, %v950_v41  ;;  %v3988_v27 = vsub.f32 %v3916_v44, %v951_v56  ;;  %v1022_v41 = vsel %vm666_vm8, %v1016_v33, %v1017_v14 }
 0x2b6   : > { %5756 = vst [vmem:[#allocation56_spill] sm:$0xff] %v3967_v54  ;;  %v945_v47 = vmul.f32 %v3548_v26, %v941_v12  ;;  %v993_v38 = vadd.f32 %v3973_v34, %v3716_v49  ;;  %v966_v24 = vmul.f32 %v962_v2, %v962_v2  ;;  %v974_v45 = vmul.f32 %v962_v2, %v3681_v23 }
 0x2b7   : > { %v944_v39 = vmul.f32 %v3548_v26, %v940_v40  ;;  %v1039_v42 = vpop.permute.xlu1 %1038  ;;  %v1020_v40 = vsel %vm666_vm8, %v1018_v48, %v1019_v10  ;;  %v996_v33 = vmul.f32 %v942_v9, %v3721_v51 }
 0x2b8   : > { %v965_v25 = vadd.f32 %v3982_v22, %v945_v47  ;;  %v1043_v57 = vsub.f32 %v3902_v18, %v1039_v42  ;;  %v1033_v12 = vpop.permute.xlu0 %1032  ;;  %v3995_v54 = vadd.f32 %v997_v32, %v993_v38  ;;  %v3997_v49 = vadd.f32 %v966_v24, %v719_v0  ;;  %v5759_v32 = vld [vmem:[#allocation47_spill] sm:$0xff] }
 0x2b9   : > { %v964_v2 = vadd.f32 %v3988_v27, %v944_v39  ;;  %v1040_v56 = vsub.f32 %v3905_v36, %v1033_v12  ;;  %v1031_v42 = vmul.f32 %v3552_v28, %v1027_v11  ;;  %v988_v12 = vadd.f32 %v984_v8, %v974_v45 }
 0x2ba   : > { %5757 = vst [vmem:[#allocation57_spill] sm:$0xff] %v3997_v49  ;;  %v969_v23 = vmul.f32 %v965_v25, %v965_v25  ;;  %v977_v26 = vmul.f32 %v965_v25, %v5758_v29  ;;  %v1047_v18 = vmul.f32 %v3536_v17, %v1043_v57  ;;  %1083 = vrot.lane.b32.xlu1 %v3995_v54, %s3215_s11 }
 0x2bb   : > { %v968_v0 = vmul.f32 %v964_v2, %v964_v2  ;;  %v976_v38 = vmul.f32 %v964_v2, %v5759_v32  ;;  %v1037_v24 = vpop.permute.xlu1 %1036  ;;  %v1044_v57 = vmul.f32 %v3536_v17, %v1040_v56  ;;  %v992_v9 = vadd.f32 %v988_v12, %v3746_v62 }
 0x2bc   : > { %v4010_v49 = vadd.f32 %v969_v23, %v722_v20  ;;  %v1051_v10 = vadd.f32 %v1047_v18, %v1031_v42  ;;  %v1042_v36 = vsub.f32 %v3916_v44, %v1037_v24  ;;  %v1035_v25 = vpop.permute.xlu0 %1034  ;;  %v991_v11 = vadd.f32 %v3947_v3, %v977_v26 }
 0x2bd   : > { %v4014_v29 = vadd.f32 %v968_v0, %v721_v43  ;;  %v1041_v28 = vsub.f32 %v3919_v53, %v1035_v25  ;;  %v999_v2 = vmul.f32 %v945_v47, %v3739_v31  ;;  %v1026_v8 = vsub.f32 %v1020_v40, %v3888_v50 }
 0x2be   : > { %v1046_v23 = vmul.f32 %v3536_v17, %v1042_v36  ;;  %v995_v18 = vadd.f32 %v991_v11, %v3766_v60  ;;  %v1024_v20 = vsub.f32 %v1022_v41, %v3868_v37  ;;  %v4024_v45 = vadd.f32 %v996_v33, %v992_v9 }
 0x2bf   : > { %v1055_v26 = vmul.f32 %v1051_v10, %v3763_v30  ;;  %v1021_v56 = vsel %vm666_vm8, %v1017_v14, %v1018_v48  ;;  %v1045_v47 = vmul.f32 %v3536_v17, %v1041_v28  ;;  %v990_v60 = vadd.f32 %v3947_v3, %v976_v38 }
 0x2c0   : > { %v1050_v43 = vadd.f32 %v1046_v23, %v1026_v8  ;;  %v4029_v42 = vadd.f32 %v999_v2, %v995_v18  ;;  %v1048_v62 = vadd.f32 %v1044_v57, %v1024_v20  ;;  %1081 = vrot.lane.b32.xlu0 %v4024_v45, %s3215_s11  ;;  %v998_v36 = vmul.f32 %v944_v39, %v3733_v16 }
 0x2c1   : > { %v1025_v41 = vsub.f32 %v1021_v56, %v3848_v1  ;;  %v994_v40 = vadd.f32 %v990_v60, %v3773_v5  ;;  %v4041_v14 = vadd.f32 %v1055_v26, %v3782_v19  ;;  %v5760_v19 = vld [vmem:[#allocation52_spill] sm:$0xff]  ;;  %v1004_v10 = vadd.f32 %v988_v12, %v3821_v15 }
 0x2c2   : > { %1087 = vrot.lane.b32.xlu1 %v4029_v42, %s3215_s11  ;;  %v1054_v48 = vmul.f32 %v1050_v43, %v3785_v4  ;;  %v1052_v28 = vmul.f32 %v1048_v62, %v3769_v59  ;;  %v1006_v23 = vadd.f32 %v990_v60, %v3845_v55  ;;  %v1010_v26 = vmul.f32 %v3988_v27, %v3733_v16 }
 0x2c3   : > { %v1049_v33 = vadd.f32 %v1045_v47, %v1025_v41  ;;  %v4045_v0 = vadd.f32 %v998_v36, %v994_v40  ;;  %v1104_v57 = vrot.slane %v4041_v14, 7  ;;  %v1005_v62 = vadd.f32 %v3973_v34, %v3835_v46  ;;  %v5761_v46 = vld [vmem:[#allocation39_spill] sm:$0xff] }
 0x2c4   : > { %v4052_v3 = vadd.f32 %v1054_v48, %v3798_v35  ;;  %v4055_v5 = vadd.f32 %v1052_v28, %v3788_v13  ;;  %v1007_v35 = vadd.f32 %v991_v11, %v3814_v61  ;;  %v1011_v13 = vmul.f32 %v3982_v22, %v3739_v31 }
 0x2c5   : > { %1085 = vrot.lane.b32.xlu0 %v4045_v0, %s3215_s11  ;;  %v1053_v39 = vmul.f32 %v1049_v33, %v5760_v19  ;;  %v4102_v27 = vadd.f32 %v1010_v26, %v1006_v23  ;;  %v1009_v48 = vmul.f32 %v3938_v58, %v3669_v7  ;;  %v5763_v23 = vld [vmem:[#allocation45_spill] sm:$0xff]  ;;  %v5764_v26 = vld [vmem:[#allocation42_spill] sm:$0xff] }
 0x2c6   : > { %1139 = vrot.lane.b32.xlu1 %v4041_v14, %s3216_s21  ;;  %v1101_v25 = vrot.slane %v4055_v5, 7  ;;  %v4076_v9 = vadd.f32 %v1011_v13, %v1007_v35 }
 0x2c7   : > { %v4063_v38 = vadd.f32 %v1053_v39, %v3801_v63  ;;  %v1008_v63 = vmul.f32 %v3961_v52, %v3721_v51  ;;  %v1103_v52 = vrot.slane %v4052_v3, 7  ;;  %v4112_v35 = vadd.f32 %v1009_v48, %v1005_v62  ;;  %v5765_v62 = vld [vmem:[#allocation43_spill] sm:$0xff] }
 0x2c8   : > { %v1108_v12 = vsel %vm634_vm4, %v1104_v57, %v1101_v25  ;;  %v1156_v18 = vrot.slane %v4076_v9, 1 }
 0x2c9   : > { %1133 = vrot.lane.b32.xlu0 %v4055_v5, %s3216_s21  ;;  %v1102_v24 = vrot.slane %v4063_v38, 7  ;;  %v4081_v8 = vadd.f32 %v1008_v63, %v1004_v10  ;;  %v1109_v43 = vsub.f32 %v4055_v5, %v1108_v12  ;;  %v1105_v60 = vsel %vm634_vm4, %v1103_v52, %v1104_v57 }
 0x2ca   : > { %1137 = vrot.lane.b32.xlu1 %v4052_v3, %s3216_s21  ;;  %v1112_v13 = vsub.f32 %v4041_v14, %v1105_v60  ;;  %v1155_v57 = vrot.slane %v4102_v27, 1 }
 0x2cb   : > { %v1107_v61 = vsel %vm634_vm4, %v1101_v25, %v1102_v24  ;;  %v1153_v56 = vrot.slane %v4081_v8, 1  ;;  %v1113_v33 = vmul.f32 %v5761_v46, %v1109_v43 }
 0x2cc   : > { %v1110_v15 = vsub.f32 %v4063_v38, %v1107_v61 }
 0x2cd   : > { %1135 = vrot.lane.b32.xlu0 %v4063_v38, %s3216_s21  ;;  %v1160_v40 = vsel %vm666_vm8, %v1156_v18, %v1153_v56 }
 0x2ce   : > { %v1164_v58 = vsub.f32 %v1160_v40, %v4076_v9  ;;  %v5767_v40 = vld [vmem:[#allocation53_spill] sm:$0xff] }
 0x32c   : > { %v1084_v2 = vpop.permute.xlu1 %1083 }
 0x32d   : > { %v1090_v11 = vsub.f32 %v3995_v54, %v1084_v2  ;;  %v1106_v2 = vsel %vm634_vm4, %v1102_v24, %v1103_v52 }
 0x32e   : > { %v1111_v24 = vsub.f32 %v4052_v3, %v1106_v2 }
 0x32f   : > { %v1094_v22 = vmul.f32 %v3536_v17, %v1090_v11 }
 0x331   : > { %v1118_v20 = vadd.f32 %v1110_v15, %v1094_v22  ;;  %v5762_v22 = vld [vmem:[#allocation44_spill] sm:$0xff] }
 0x332   : > { %v1082_v36 = vpop.permute.xlu0 %1081 }
 0x333   : > { %v1122_v47 = vmul.f32 %v1118_v20, %v3540_v21  ;;  %v1089_v55 = vsub.f32 %v4024_v45, %v1082_v36  ;;  %v1154_v36 = vrot.slane %v4112_v35, 1 }
 0x334   : > { %v1088_v41 = vpop.permute.xlu1 %1087 }
 0x335   : > { %v4107_v28 = vadd.f32 %v1122_v47, %v3848_v1  ;;  %v1092_v34 = vsub.f32 %v4029_v42, %v1088_v41  ;;  %v1093_v39 = vmul.f32 %v3536_v17, %v1089_v55  ;;  %v1168_v47 = vmul.f32 %v5765_v62, %v1164_v58 }
 0x336   : > { %v1157_v41 = vsel %vm666_vm8, %v1155_v57, %v1156_v18 }
 0x337   : > { %v1096_v10 = vmul.f32 %v3536_v17, %v1092_v34  ;;  %1183 = vrot.lane.b32.xlu1 %v4107_v28, %s3216_s21  ;;  %v1117_v25 = vadd.f32 %v1113_v33, %v1093_v39  ;;  %v1086_v61 = vpop.permute.xlu0 %1085  ;;  %v1159_v33 = vsel %vm666_vm8, %v1153_v56, %v1154_v36 }
 0x338   : > { %v1140_v1 = vpop.permute.xlu1 %1139  ;;  %v1091_v12 = vsub.f32 %v4045_v0, %v1086_v61  ;;  %v5770_v61 = vld [vmem:[#allocation54_spill] sm:$0xff] }
 0x339   : > { %v1120_v63 = vadd.f32 %v1112_v13, %v1096_v10  ;;  %v1144_v11 = vsub.f32 %v1140_v1, %v4041_v14  ;;  %v1121_v15 = vmul.f32 %v1117_v25, %v5762_v22  ;;  %v1163_v25 = vsub.f32 %v1157_v41, %v4102_v27  ;;  %v5769_v1 = vld [vmem:[#allocation41_spill] sm:$0xff] }
 0x33a   : > { %v1095_v52 = vmul.f32 %v3536_v17, %v1091_v12  ;;  %v1158_v12 = vsel %vm666_vm8, %v1154_v36, %v1155_v57  ;;  %v5771_v57 = vld [vmem:[#allocation55_spill] sm:$0xff] }
 0x33b   : > { %v1124_v20 = vmul.f32 %v1120_v63, %v5763_v23  ;;  %v1148_v43 = vmul.f32 %v5764_v26, %v1144_v11  ;;  %v4130_v55 = vadd.f32 %v1121_v15, %v3868_v37  ;;  %v1134_v39 = vpop.permute.xlu0 %1133  ;;  %v1161_v63 = vsub.f32 %v1159_v33, %v4081_v8 }
 0x33c   : > { %v1138_v60 = vpop.permute.xlu1 %1137  ;;  %v1119_v37 = vadd.f32 %v1111_v24, %v1095_v52  ;;  %v1141_v10 = vsub.f32 %v1134_v39, %v4055_v5  ;;  %v1162_v41 = vsub.f32 %v1158_v12, %v4112_v35 }
 0x33d   : > { %5766 = vst [vmem:[#allocation47_spill] sm:$0xff] %v4130_v55  ;;  %v4137_v48 = vadd.f32 %v1124_v20, %v5767_v40  ;;  %v1172_v34 = vadd.f32 %v1168_v47, %v1148_v43  ;;  %v1143_v13 = vsub.f32 %v1138_v60, %v4052_v3  ;;  %1181 = vrot.lane.b32.xlu0 %v4130_v55, %s3216_s21  ;;  %v1267_v12 = vrot.slane %v4130_v55, 1 }
 0x33e   : > { %v1123_v56 = vmul.f32 %v1119_v37, %v5769_v1  ;;  %v1145_v2 = vmul.f32 %v5764_v26, %v1141_v10 }
 0x33f   : > { %5768 = vst [vmem:[#allocation52_spill] sm:$0xff] %v4137_v48  ;;  %v1176_v58 = vmul.f32 %v1172_v34, %v5763_v23  ;;  %v1147_v18 = vmul.f32 %v5764_v26, %v1143_v13  ;;  %1187 = vrot.lane.b32.xlu1 %v4137_v48, %s3216_s21  ;;  %v1136_v20 = vpop.permute.xlu0 %1135 }
 0x340   : > { %v4159_v43 = vadd.f32 %v1123_v56, %v3888_v50  ;;  %v1169_v47 = vadd.f32 %v1161_v63, %v1145_v2  ;;  %v1142_v24 = vsub.f32 %v1136_v20, %v4063_v38  ;;  %v1270_v2 = vrot.slane %v4137_v48, 1 }
 0x341   : > { %v4154_v11 = vadd.f32 %v1176_v58, %v5770_v61  ;;  %v1171_v15 = vadd.f32 %v1163_v25, %v1147_v18 }
 0x342   : > { %v1173_v60 = vmul.f32 %v1169_v47, %v5762_v22  ;;  %v1146_v40 = vmul.f32 %v5764_v26, %v1142_v24  ;;  %1185 = vrot.lane.b32.xlu0 %v4159_v43, %s3216_s21 }
 0x343   : > { %v1175_v52 = vmul.f32 %v1171_v15, %v5769_v1  ;;  %1289 = vrot.lane.b32.xlu1 %v4154_v11, %s3215_s11  ;;  %v1200_v37 = vrot.slane %v4154_v11, 7 }
 0x344   : > { %v4174_v36 = vadd.f32 %v1173_v60, %v5771_v57  ;;  %v1170_v34 = vadd.f32 %v1162_v41, %v1146_v40  ;;  %v1274_v40 = vsel %vm666_vm8, %v1270_v2, %v1267_v12  ;;  %v1268_v57 = vrot.slane %v4107_v28, 1 }
 0x345   : > { %v4171_v50 = vadd.f32 %v1175_v52, %v3916_v44  ;;  %v5773_v52 = vld [vmem:[#allocation46_spill] sm:$0xff]  ;;  %v1278_v1 = vsub.f32 %v1274_v40, %v4137_v48 }
 0x346   : > { %v1174_v33 = vmul.f32 %v1170_v34, %v3540_v21  ;;  %1283 = vrot.lane.b32.xlu0 %v4174_v36, %s3215_s11  ;;  %1311 = vst [vmem:[%s3577_s25] sm:$0x4] %v4174_v36  ;;  %v1197_v13 = vrot.slane %v4174_v36, 7 }
 0x347   : > { %1287 = vrot.lane.b32.xlu1 %v4171_v50, %s3215_s11  ;;  %v1199_v61 = vrot.slane %v4171_v50, 7 }
 0x348   : > { %v4184_v39 = vadd.f32 %v1174_v33, %v3919_v53  ;;  %v1234_v53 = vstv %s4188_s20  ;;  %v1204_v63 = vsel %vm634_vm4, %v1200_v37, %v1197_v13 }
 0x349   : > { %v4207_v20 = vmul.f32 0.0, %v1234_v53  ;;  %v1205_v47 = vsub.f32 %v4174_v36, %v1204_v63  ;;  %v1201_v33 = vsel %vm634_vm4, %v1199_v61, %v1200_v37  ;;  %v1273_v63 = vsel %vm666_vm8, %v1267_v12, %v1268_v57 }
 0x34a   : > { %1285 = vrot.lane.b32.xlu0 %v4184_v39, %s3215_s11  ;;  %v1198_v44 = vrot.slane %v4184_v39, 7  ;;  %v1269_v37 = vrot.slane %v4159_v43, 1 }
 0x34c   : > { %v1203_v58 = vsel %vm634_vm4, %v1197_v13, %v1198_v44 }
 0x34d   : > { %v4199_v56 = vsub.f32 %v4184_v39, %v1203_v58 }
 0x34f   : > { %5772 = vst [vmem:[#allocation42_spill] sm:$0xff] %v4199_v56 }
 0x3a9   : > { %v1184_v10 = vpop.permute.xlu1 %1183 }
 0x3aa   : > { %v1190_v18 = vsub.f32 %v1184_v10, %v4107_v28  ;;  %v5774_v10 = vld [vmem:[#allocation56_spill] sm:$0xff] }
 0x3ac   : > { %v1194_v25 = vmul.f32 %v5764_v26, %v1190_v18 }
 0x3ae   : > { %v1214_v15 = vadd.f32 %v4199_v56, %v1194_v25 }
 0x3af   : > { %v1182_v41 = vpop.permute.xlu0 %1181 }
 0x3b0   : > { %v1218_v24 = vmul.f32 %v1214_v15, %v1214_v15  ;;  %v1226_v60 = vmul.f32 %v1214_v15, %v5773_v52  ;;  %v1189_v34 = vsub.f32 %v1182_v41, %v4130_v55  ;;  %v4227_v52 = vmul.f32 %v5761_v46, %v1205_v47  ;;  %v5777_v46 = vld [vmem:[#allocation49_spill] sm:$0xff] }
 0x3b1   : > { %v1188_v13 = vpop.permute.xlu1 %1187 }
 0x3b2   : > { %v4218_v58 = vadd.f32 %v1218_v24, %v5774_v10  ;;  %v1192_v18 = vsub.f32 %v1188_v13, %v4137_v48  ;;  %v4224_v15 = vadd.f32 %v4207_v20, %v1226_v60  ;;  %v1193_v41 = vmul.f32 %v5764_v26, %v1189_v34  ;;  %v5776_v34 = vld [vmem:[#allocation50_spill] sm:$0xff] }
 0x3b3   : > { %v1248_v24 = vmul.f32 %v1194_v25, %v3669_v7  ;;  %v4234_v10 = vsub.f32 %v4154_v11, %v1201_v33  ;;  %v1235_v23 = vmul.f32 %v5776_v34, %v1234_v53  ;;  %v1202_v25 = vsel %vm634_vm4, %v1198_v44, %v1199_v61  ;;  %v5779_v61 = vld [vmem:[#allocation57_spill] sm:$0xff] }
 0x3b4   : > { %5775 = vst [vmem:[#allocation43_spill] sm:$0xff] %v4218_v58  ;;  %v1196_v13 = vmul.f32 %v5764_v26, %v1192_v18  ;;  %v1244_v12 = vadd.f32 %v4224_v15, %v3995_v54  ;;  %v1213_v60 = vadd.f32 %v4227_v52, %v1193_v41  ;;  %v1275_v58 = vsub.f32 %v1273_v63, %v4130_v55  ;;  %v1186_v48 = vpop.permute.xlu0 %1185  ;;  %v5778_v55 = vld [vmem:[#allocation51_spill] sm:$0xff] }
 0x3b5   : > { %v1290_v47 = vpop.permute.xlu1 %1289  ;;  %v1191_v56 = vsub.f32 %v1186_v48, %v4159_v43  ;;  %v1282_v7 = vmul.f32 %v5765_v62, %v1278_v1  ;;  %v1271_v44 = vsel %vm666_vm8, %v1269_v37, %v1270_v2  ;;  %v1247_v2 = vmul.f32 %v1193_v41, %v3721_v51 }
 0x3b6   : > { %v1216_v40 = vadd.f32 %v4234_v10, %v1196_v13  ;;  %v1294_v33 = vsub.f32 %v4154_v11, %v1290_v47  ;;  %v4246_v22 = vadd.f32 %v1248_v24, %v1244_v12  ;;  %v1217_v18 = vmul.f32 %v1213_v60, %v1213_v60 }
 0x3b7   : > { %v1225_v54 = vmul.f32 %v1213_v60, %v5777_v46  ;;  %v4261_v12 = vsub.f32 %v4171_v50, %v1202_v25  ;;  %v1195_v48 = vmul.f32 %v5764_v26, %v1191_v56  ;;  %v1250_v56 = vmul.f32 %v1196_v13, %v3739_v31 }
 0x3b8   : > { %v1220_v63 = vmul.f32 %v1216_v40, %v1216_v40  ;;  %v1228_v53 = vmul.f32 %v1216_v40, %v5778_v55  ;;  %v1298_v34 = vmul.f32 %v3536_v17, %v1294_v33  ;;  %1334 = vrot.lane.b32.xlu1 %v4246_v22, %s3215_s11  ;;  %v4258_v24 = vadd.f32 %v1217_v18, %v5779_v61  ;;  %v1284_v33 = vpop.permute.xlu0 %1283 }
 0x3b9   : > { %v1288_v1 = vpop.permute.xlu1 %1287  ;;  %v1239_v60 = vadd.f32 %v1235_v23, %v1225_v54  ;;  %v1215_v18 = vadd.f32 %v4261_v12, %v1195_v48  ;;  %v1291_v25 = vsub.f32 %v4174_v36, %v1284_v33  ;;  %v1277_v23 = vsub.f32 %v1271_v44, %v4159_v43 }
 0x3ba   : > { %v4265_v47 = vadd.f32 %v1220_v63, %v4010_v49  ;;  %v1302_v40 = vadd.f32 %v1298_v34, %v1282_v7  ;;  %v1293_v55 = vsub.f32 %v4171_v50, %v1288_v1  ;;  %v1242_v46 = vadd.f32 %v4207_v20, %v1228_v53 }
 0x3bb   : > { %v1243_v61 = vadd.f32 %v1239_v60, %v4024_v45  ;;  %v1219_v34 = vmul.f32 %v1215_v18, %v1215_v18  ;;  %v1227_v54 = vmul.f32 %v1215_v18, %v5759_v32  ;;  %v1295_v63 = vmul.f32 %v3536_v17, %v1291_v25 }
 0x3bc   : > { %v1297_v49 = vmul.f32 %v3536_v17, %v1293_v55  ;;  %v1246_v7 = vadd.f32 %v1242_v46, %v4029_v42  ;;  %v1306_v53 = vmul.f32 %v1302_v40, %v3763_v30  ;;  %v1272_v45 = vsel %vm666_vm8, %v1268_v57, %v1269_v37  ;;  %v1286_v13 = vpop.permute.xlu0 %1285 }
 0x3bd   : > { %v4279_v41 = vadd.f32 %v1247_v2, %v1243_v61  ;;  %v4287_v55 = vadd.f32 %v1219_v34, %v4014_v29  ;;  %v1292_v42 = vsub.f32 %v4184_v39, %v1286_v13  ;;  %v1299_v44 = vadd.f32 %v1295_v63, %v1275_v58 }
 0x3be   : > { %v1301_v1 = vadd.f32 %v1297_v49, %v1277_v23  ;;  %v4284_v33 = vadd.f32 %v1250_v56, %v1246_v7  ;;  %v1241_v40 = vadd.f32 %v4207_v20, %v1227_v54  ;;  %v1276_v2 = vsub.f32 %v1272_v45, %v4107_v28 }
 0x3bf   : > { %1332 = vrot.lane.b32.xlu0 %v4279_v41, %s3215_s11  ;;  %v1296_v57 = vmul.f32 %v3536_v17, %v1292_v42  ;;  %v1249_v37 = vmul.f32 %v1195_v48, %v3733_v16  ;;  %v4299_v29 = vadd.f32 %v1306_v53, %v4041_v14  ;;  %v1303_v58 = vmul.f32 %v1299_v44, %v3769_v59 }
 0x3c0   : > { %1338 = vrot.lane.b32.xlu1 %v4284_v33, %s3215_s11  ;;  %v1305_v18 = vmul.f32 %v1301_v1, %v3785_v4  ;;  %v1245_v25 = vadd.f32 %v1241_v40, %v4045_v0  ;;  %v1255_v49 = vadd.f32 %v1239_v60, %v4081_v8  ;;  %v1259_v34 = vmul.f32 %v4227_v52, %v3721_v51 }
 0x3c1   : > { %v1300_v61 = vadd.f32 %v1296_v57, %v1276_v2  ;;  %v4314_v14 = vadd.f32 %v1303_v58, %v4055_v5  ;;  %v1262_v5 = vmul.f32 %v4234_v10, %v3739_v31  ;;  %v1257_v10 = vadd.f32 %v1241_v40, %v4102_v27  ;;  %v5781_v58 = vld [vmem:[#allocation42_spill] sm:$0xff] }
 0x3c2   : > { %v4304_v56 = vadd.f32 %v1249_v37, %v1245_v25  ;;  %v4309_v20 = vadd.f32 %v1305_v18, %v4052_v3  ;;  %v1258_v3 = vadd.f32 %v1242_v46, %v4076_v9  ;;  %v4339_v46 = vadd.f32 %v1259_v34, %v1255_v49  ;;  %v5780_v25 = vld [vmem:[#allocation48_spill] sm:$0xff]  ;;  %v5782_v49 = vld [vmem:[#allocation39_spill] sm:$0xff] }
 0x3c3   : > { %v1304_v48 = vmul.f32 %v1300_v61, %v5760_v19  ;;  %v1352_v7 = vrot.slane %v4314_v14, 7  ;;  %v1261_v13 = vmul.f32 %v4261_v12, %v3733_v16  ;;  %v1256_v27 = vadd.f32 %v4224_v15, %v4112_v35 }
 0x3c4   : > { %1390 = vrot.lane.b32.xlu1 %v4299_v29, %s3216_s21  ;;  %1336 = vrot.lane.b32.xlu0 %v4304_v56, %s3215_s11  ;;  %v4334_v54 = vadd.f32 %v1262_v5, %v1258_v3  ;;  %v1354_v45 = vrot.slane %v4309_v20, 7  ;;  %v1404_v44 = vrot.slane %v4339_v46, 1  ;;  %v1260_v61 = vmul.f32 %v5781_v58, %v5780_v25 }
 0x3c5   : > { %v4322_v0 = vadd.f32 %v1304_v48, %v4063_v38  ;;  %v1355_v38 = vrot.slane %v4299_v29, 7  ;;  %v4358_v18 = vadd.f32 %v1261_v13, %v1257_v10  ;;  %v5783_v13 = vld [vmem:[#allocation44_spill] sm:$0xff] }
 0x3c6   : > { %v1407_v1 = vrot.slane %v4334_v54, 1  ;;  %v4369_v5 = vadd.f32 %v1260_v61, %v1256_v27 }
 0x3c7   : > { %v1353_v23 = vrot.slane %v4322_v0, 7  ;;  %v1359_v52 = vsel %vm634_vm4, %v1355_v38, %v1352_v7  ;;  %v1356_v48 = vsel %vm634_vm4, %v1354_v45, %v1355_v38 }
 0x3c8   : > { %1388 = vrot.lane.b32.xlu1 %v4309_v20, %s3216_s21  ;;  %1384 = vrot.lane.b32.xlu0 %v4314_v14, %s3216_s21  ;;  %v1360_v40 = vsub.f32 %v4314_v14, %v1359_v52  ;;  %v1411_v37 = vsel %vm666_vm8, %v1407_v1, %v1404_v44 }
 0x3c9   : > { %v1358_v9 = vsel %vm634_vm4, %v1352_v7, %v1353_v23 }
 0x3ca   : > { %v1361_v60 = vsub.f32 %v4322_v0, %v1358_v9  ;;  %v1364_v7 = vmul.f32 %v5782_v49, %v1360_v40  ;;  %v1363_v9 = vsub.f32 %v4299_v29, %v1356_v48  ;;  %v5785_v48 = vld [vmem:[#allocation47_spill] sm:$0xff] }
 0x3cc   : > { %1386 = vrot.lane.b32.xlu0 %v4322_v0, %s3216_s21 }
 0x42a   : > { %v1335_v63 = vpop.permute.xlu1 %1334 }
 0x42b   : > { %v1341_v53 = vsub.f32 %v4246_v22, %v1335_v63  ;;  %v1415_v63 = vsub.f32 %v1411_v37, %v4334_v54 }
 0x42d   : > { %v1345_v8 = vmul.f32 %v3536_v17, %v1341_v53  ;;  %v1419_v40 = vmul.f32 %v5765_v62, %v1415_v63 }
 0x42f   : > { %v1369_v42 = vadd.f32 %v1361_v60, %v1345_v8  ;;  %v1357_v60 = vsel %vm634_vm4, %v1353_v23, %v1354_v45 }
 0x430   : > { %v1362_v45 = vsub.f32 %v4309_v20, %v1357_v60 }
 0x431   : > { %v1373_v2 = vmul.f32 %v1369_v42, %v3540_v21  ;;  %v1333_v57 = vpop.permute.xlu0 %1332 }
 0x432   : > { %v1340_v12 = vsub.f32 %v4279_v41, %v1333_v57  ;;  %v1339_v3 = vpop.permute.xlu1 %1338  ;;  %v5784_v57 = vld [vmem:[#allocation45_spill] sm:$0xff] }
 0x433   : > { %v4366_v35 = vadd.f32 %v1373_v2, %v4107_v28  ;;  %v1343_v15 = vsub.f32 %v4284_v33, %v1339_v3  ;;  %v1406_v28 = vrot.slane %v4358_v18, 1  ;;  %v1405_v2 = vrot.slane %v4369_v5, 1 }
 0x434   : > { %v1344_v34 = vmul.f32 %v3536_v17, %v1340_v12 }
 0x435   : > { %v1347_v53 = vmul.f32 %v3536_v17, %v1343_v15  ;;  %1434 = vrot.lane.b32.xlu1 %v4366_v35, %s3216_s21  ;;  %v1408_v12 = vsel %vm666_vm8, %v1406_v28, %v1407_v1  ;;  %v1410_v3 = vsel %vm666_vm8, %v1404_v44, %v1405_v2 }
 0x436   : > { %v1368_v38 = vadd.f32 %v1364_v7, %v1344_v34  ;;  %v1391_v10 = vpop.permute.xlu1 %1390  ;;  %v1337_v27 = vpop.permute.xlu0 %1336  ;;  %v5786_v7 = vld [vmem:[#allocation52_spill] sm:$0xff]  ;;  %v1414_v1 = vsub.f32 %v1408_v12, %v4358_v18 }
 0x437   : > { %v1371_v8 = vadd.f32 %v1363_v9, %v1347_v53  ;;  %v1395_v52 = vsub.f32 %v1391_v10, %v4299_v29  ;;  %v1342_v58 = vsub.f32 %v4304_v56, %v1337_v27 }
 0x438   : > { %v1372_v42 = vmul.f32 %v1368_v38, %v5783_v13 }
 0x439   : > { %v1375_v37 = vmul.f32 %v1371_v8, %v5784_v57  ;;  %v1399_v61 = vmul.f32 %v5764_v26, %v1395_v52  ;;  %v1346_v63 = vmul.f32 %v3536_v17, %v1342_v58  ;;  %v1412_v52 = vsub.f32 %v1410_v3, %v4339_v46 }
 0x43a   : > { %v4391_v23 = vadd.f32 %v1372_v42, %v5785_v48  ;;  %v1389_v15 = vpop.permute.xlu1 %1388  ;;  %v1385_v38 = vpop.permute.xlu0 %1384  ;;  %v5788_v42 = vld [vmem:[#allocation41_spill] sm:$0xff] }
 0x43b   : > { %v4397_v34 = vadd.f32 %v1375_v37, %v5786_v7  ;;  %v1423_v9 = vadd.f32 %v1419_v40, %v1399_v61  ;;  %v1394_v53 = vsub.f32 %v1389_v15, %v4309_v20  ;;  %v1370_v10 = vadd.f32 %v1362_v45, %v1346_v63 }
 0x43c   : > { %1432 = vrot.lane.b32.xlu0 %v4391_v23, %s3216_s21  ;;  %v1392_v44 = vsub.f32 %v1385_v38, %v4314_v14  ;;  %v1409_v61 = vsel %vm666_vm8, %v1405_v2, %v1406_v28 }
 0x43d   : > { %5787 = vst [vmem:[#allocation53_spill] sm:$0xff] %v4397_v34  ;;  %v1427_v8 = vmul.f32 %v1423_v9, %v5784_v57  ;;  %v1398_v60 = vmul.f32 %v5764_v26, %v1394_v53  ;;  %1438 = vrot.lane.b32.xlu1 %v4397_v34, %s3216_s21  ;;  %v1374_v27 = vmul.f32 %v1370_v10, %v5788_v42 }
 0x43e   : > { %v1396_v37 = vmul.f32 %v5764_v26, %v1392_v44  ;;  %v1387_v12 = vpop.permute.xlu0 %1386  ;;  %v1413_v28 = vsub.f32 %v1409_v61, %v4369_v5 }
 0x43f   : > { %v4412_v40 = vadd.f32 %v1427_v8, %v4154_v11  ;;  %v1422_v58 = vadd.f32 %v1414_v1, %v1398_v60  ;;  %v4418_v48 = vadd.f32 %v1374_v27, %v4159_v43  ;;  %v1393_v3 = vsub.f32 %v1387_v12, %v4322_v0 }
 0x440   : > { %v1420_v45 = vadd.f32 %v1412_v52, %v1396_v37 }
 0x441   : > { %v1426_v15 = vmul.f32 %v1422_v58, %v5788_v42  ;;  %1540 = vrot.lane.b32.xlu1 %v4412_v40, %s3215_s11  ;;  %v1397_v2 = vmul.f32 %v5764_v26, %v1393_v3  ;;  %1436 = vrot.lane.b32.xlu0 %v4418_v48, %s3216_s21  ;;  %v1451_v38 = vrot.slane %v4412_v40, 7  ;;  %v1521_v58 = vrot.slane %v4397_v34, 1 }
 0x442   : > { %v1424_v11 = vmul.f32 %v1420_v45, %v5783_v13  ;;  %v1520_v42 = vrot.slane %v4418_v48, 1 }
 0x443   : > { %v4426_v7 = vadd.f32 %v1426_v15, %v4171_v50  ;;  %v1421_v63 = vadd.f32 %v1413_v28, %v1397_v2  ;;  %v5790_v15 = vld [vmem:[#allocation46_spill] sm:$0xff]  ;;  %v1518_v28 = vrot.slane %v4391_v23, 1 }
 0x444   : > { %v4433_v43 = vadd.f32 %v1424_v11, %v4174_v36 }
 0x445   : > { %1538 = vrot.lane.b32.xlu1 %v4426_v7, %s3215_s11  ;;  %v1425_v9 = vmul.f32 %v1421_v63, %v3540_v21  ;;  %v1450_v27 = vrot.slane %v4426_v7, 7  ;;  %v5796_v21 = vld [vmem:[#allocation51_spill] sm:$0xff] }
 0x446   : > { %1534 = vrot.lane.b32.xlu0 %v4433_v43, %s3215_s11  ;;  %1562 = vst [vmem:[%s3577_s25 + $0x1] sm:$0x4] %v4433_v43  ;;  %v1448_v53 = vrot.slane %v4433_v43, 7 }
 0x447   : > { %v4443_v50 = vadd.f32 %v1425_v9, %v4184_v39  ;;  %v1485_v39 = vstv %s4447_s29  ;;  %v1452_v63 = vsel %vm634_vm4, %v1450_v27, %v1451_v38 }
 0x448   : > { %v1455_v52 = vsel %vm634_vm4, %v1451_v38, %v1448_v53  ;;  %v4465_v61 = vmul.f32 0.0, %v1485_v39 }
 0x449   : > { %v1449_v36 = vrot.slane %v4443_v50, 7  ;;  %v1456_v12 = vsub.f32 %v4433_v43, %v1455_v52 }
 0x44a   : > { %1536 = vrot.lane.b32.xlu0 %v4443_v50, %s3215_s11 }
 0x44b   : > { %v1454_v10 = vsel %vm634_vm4, %v1448_v53, %v1449_v36  ;;  %v5791_v53 = vld [vmem:[#allocation43_spill] sm:$0xff] }
 0x44c   : > { %v4458_v60 = vsub.f32 %v4443_v50, %v1454_v10 }
 0x44e   : > { %5789 = vst [vmem:[#allocation54_spill] sm:$0xff] %v4458_v60 }
 0x4a7   : > { %v1435_v1 = vpop.permute.xlu1 %1434 }
 0x4a8   : > { %v1441_v8 = vsub.f32 %v1435_v1, %v4366_v35 }
 0x4aa   : > { %v1445_v44 = vmul.f32 %v5764_v26, %v1441_v8  ;;  %v1525_v8 = vsel %vm666_vm8, %v1521_v58, %v1518_v28 }
 0x4ac   : > { %v1465_v37 = vadd.f32 %v4458_v60, %v1445_v44  ;;  %v1499_v38 = vmul.f32 %v1445_v44, %v5780_v25 }
 0x4ae   : > { %v1469_v45 = vmul.f32 %v1465_v37, %v1465_v37  ;;  %v1477_v3 = vmul.f32 %v1465_v37, %v5790_v15  ;;  %v1433_v11 = vpop.permute.xlu0 %1432  ;;  %v4483_v37 = vmul.f32 %v5782_v49, %v1456_v12  ;;  %v1519_v15 = vrot.slane %v4366_v35, 1 }
 0x4af   : > { %v1440_v2 = vsub.f32 %v1433_v11, %v4391_v23  ;;  %v1439_v9 = vpop.permute.xlu1 %1438  ;;  %v1529_v12 = vsub.f32 %v1525_v8, %v4397_v34 }
 0x4b0   : > { %v4474_v1 = vadd.f32 %v1469_v45, %v5791_v53  ;;  %v1443_v10 = vsub.f32 %v1439_v9, %v4397_v34  ;;  %v4480_v52 = vadd.f32 %v4465_v61, %v1477_v3  ;;  %v4489_v45 = vsub.f32 %v4412_v40, %v1452_v63 }
 0x4b1   : > { %v1444_v11 = vmul.f32 %v5764_v26, %v1440_v2  ;;  %v5794_v2 = vld [vmem:[#allocation50_spill] sm:$0xff]  ;;  %v1524_v8 = vsel %vm666_vm8, %v1518_v28, %v1519_v15 }
 0x4b2   : > { %5792 = vst [vmem:[#allocation55_spill] sm:$0xff] %v4474_v1  ;;  %5793 = vst [vmem:[#allocation56_spill] sm:$0xff] %v4480_v52  ;;  %v1447_v9 = vmul.f32 %v5764_v26, %v1443_v10  ;;  %v1495_v53 = vadd.f32 %v4480_v52, %v4246_v22  ;;  %v1486_v57 = vmul.f32 %v5794_v2, %v1485_v39  ;;  %v5795_v10 = vld [vmem:[#allocation49_spill] sm:$0xff] }
 0x4b3   : > { %v1464_v3 = vadd.f32 %v4483_v37, %v1444_v11  ;;  %v1541_v1 = vpop.permute.xlu1 %1540  ;;  %v1453_v22 = vsel %vm634_vm4, %v1449_v36, %v1450_v27  ;;  %v1437_v25 = vpop.permute.xlu0 %1436  ;;  %v1522_v27 = vsel %vm666_vm8, %v1520_v42, %v1521_v58 }
 0x4b4   : > { %v1467_v13 = vadd.f32 %v4489_v45, %v1447_v9  ;;  %v1545_v44 = vsub.f32 %v4412_v40, %v1541_v1  ;;  %v4500_v63 = vadd.f32 %v1499_v38, %v1495_v53  ;;  %v1442_v39 = vsub.f32 %v1437_v25, %v4418_v48 }
 0x4b5   : > { %v1468_v49 = vmul.f32 %v1464_v3, %v1464_v3  ;;  %v1476_v60 = vmul.f32 %v1464_v3, %v5795_v10  ;;  %v1533_v38 = vmul.f32 %v5765_v62, %v1529_v12  ;;  %v4522_v25 = vsub.f32 %v4426_v7, %v1453_v22 }
 0x4b6   : > { %v1471_v34 = vmul.f32 %v1467_v13, %v1467_v13  ;;  %v1479_v52 = vmul.f32 %v1467_v13, %v5796_v21  ;;  %v1549_v2 = vmul.f32 %v3536_v17, %v1545_v44  ;;  %1585 = vrot.lane.b32.xlu1 %v4500_v63, %s3215_s11  ;;  %v1446_v13 = vmul.f32 %v5764_v26, %v1442_v39 }
 0x4b7   : > { %v4513_v1 = vadd.f32 %v1468_v49, %v4258_v24  ;;  %v1539_v36 = vpop.permute.xlu1 %1538  ;;  %v1490_v28 = vadd.f32 %v1486_v57, %v1476_v60  ;;  %v1498_v24 = vmul.f32 %v1444_v11, %v3721_v51  ;;  %v1501_v60 = vmul.f32 %v1447_v9, %v3739_v31 }
 0x4b8   : > { %v4519_v53 = vadd.f32 %v1471_v34, %v4265_v47  ;;  %v1544_v3 = vsub.f32 %v4426_v7, %v1539_v36  ;;  %v1553_v49 = vadd.f32 %v1549_v2, %v1533_v38  ;;  %v1535_v44 = vpop.permute.xlu0 %1534  ;;  %v1493_v21 = vadd.f32 %v4465_v61, %v1479_v52 }
 0x4b9   : > { %v1494_v12 = vadd.f32 %v1490_v28, %v4279_v41  ;;  %v1466_v57 = vadd.f32 %v4522_v25, %v1446_v13  ;;  %v1542_v47 = vsub.f32 %v4433_v43, %v1535_v44  ;;  %v1528_v34 = vsub.f32 %v1522_v27, %v4418_v48 }
 0x4ba   : > { %v1548_v58 = vmul.f32 %v3536_v17, %v1544_v3  ;;  %v1497_v11 = vadd.f32 %v1493_v21, %v4284_v33  ;;  %v1526_v41 = vsub.f32 %v1524_v8, %v4391_v23  ;;  %v1557_v38 = vmul.f32 %v1553_v49, %v3763_v30 }
 0x4bb   : > { %v4534_v22 = vadd.f32 %v1498_v24, %v1494_v12  ;;  %v1470_v2 = vmul.f32 %v1466_v57, %v1466_v57  ;;  %v1478_v39 = vmul.f32 %v1466_v57, %v5759_v32  ;;  %v1546_v52 = vmul.f32 %v3536_v17, %v1542_v47 }
 0x4bc   : > { %v1552_v36 = vadd.f32 %v1548_v58, %v1528_v34  ;;  %v1523_v27 = vsel %vm666_vm8, %v1519_v15, %v1520_v42  ;;  %v1537_v9 = vpop.permute.xlu0 %1536  ;;  %v4545_v3 = vadd.f32 %v1501_v60, %v1497_v11  ;;  %v1500_v49 = vmul.f32 %v1446_v13, %v3733_v16 }
 0x4bd   : > { %1583 = vrot.lane.b32.xlu0 %v4534_v22, %s3215_s11  ;;  %v4548_v33 = vadd.f32 %v1470_v2, %v4287_v55  ;;  %v1550_v24 = vadd.f32 %v1546_v52, %v1526_v41  ;;  %v1543_v8 = vsub.f32 %v4443_v50, %v1537_v9  ;;  %v1492_v44 = vadd.f32 %v4465_v61, %v1478_v39 }
 0x4be   : > { %1589 = vrot.lane.b32.xlu1 %v4545_v3, %s3215_s11  ;;  %v1527_v42 = vsub.f32 %v1523_v27, %v4366_v35  ;;  %v4559_v57 = vadd.f32 %v1557_v38, %v4299_v29  ;;  %v1556_v55 = vmul.f32 %v1552_v36, %v3785_v4  ;;  %v1509_v58 = vadd.f32 %v1493_v21, %v4334_v54 }
 0x4bf   : > { %v1547_v15 = vmul.f32 %v3536_v17, %v1543_v8  ;;  %v1496_v12 = vadd.f32 %v1492_v44, %v4304_v56  ;;  %v1554_v47 = vmul.f32 %v1550_v24, %v3769_v59  ;;  %v1513_v11 = vmul.f32 %v4489_v45, %v3739_v31 }
 0x4c0   : > { %v4570_v13 = vadd.f32 %v1556_v55, %v4309_v20  ;;  %v1506_v2 = vadd.f32 %v1490_v28, %v4339_v46  ;;  %v1606_v39 = vrot.slane %v4559_v57, 7  ;;  %v1510_v52 = vmul.f32 %v4483_v37, %v3721_v51 }
 0x4c1   : > { %v1551_v34 = vadd.f32 %v1547_v15, %v1527_v42  ;;  %v4563_v61 = vadd.f32 %v1500_v49, %v1496_v12  ;;  %v4573_v56 = vadd.f32 %v1554_v47, %v4314_v14  ;;  %v4596_v38 = vadd.f32 %v1513_v11, %v1509_v58  ;;  %v5797_v49 = vld [vmem:[#allocation56_spill] sm:$0xff] }
 0x4c2   : > { %1641 = vrot.lane.b32.xlu1 %v4559_v57, %s3216_s21  ;;  %v4599_v54 = vadd.f32 %v1510_v52, %v1506_v2  ;;  %v1508_v28 = vadd.f32 %v1492_v44, %v4358_v18  ;;  %v1605_v9 = vrot.slane %v4570_v13, 7  ;;  %v1512_v8 = vmul.f32 %v4522_v25, %v3733_v16  ;;  %v5798_v15 = vld [vmem:[#allocation40_spill] sm:$0xff]  ;;  %v5800_v18 = vld [vmem:[#allocation54_spill] sm:$0xff]  ;;  %v5801_v2 = vld [vmem:[#allocation39_spill] sm:$0xff] }
 0x4c3   : > { %1587 = vrot.lane.b32.xlu0 %v4563_v61, %s3215_s11  ;;  %v1555_v29 = vmul.f32 %v1551_v34, %v5760_v19  ;;  %v1603_v14 = vrot.slane %v4573_v56, 7  ;;  %v1658_v37 = vrot.slane %v4596_v38, 1  ;;  %v1507_v42 = vadd.f32 %v5797_v49, %v4369_v5  ;;  %v5799_v34 = vld [vmem:[#allocation48_spill] sm:$0xff] }
 0x4c4   : > { %v1655_v47 = vrot.slane %v4599_v54, 1  ;;  %v1511_v44 = vmul.f32 %v5800_v18, %v5799_v34  ;;  %v4625_v11 = vadd.f32 %v1512_v8, %v1508_v28 }
 0x4c5   : > { %v4581_v60 = vadd.f32 %v1555_v29, %v4322_v0  ;;  %v1610_v46 = vsel %vm634_vm4, %v1606_v39, %v1603_v14 }
 0x4c6   : > { %1639 = vrot.lane.b32.xlu1 %v4570_v13, %s3216_s21  ;;  %v1611_v24 = vsub.f32 %v4573_v56, %v1610_v46  ;;  %v1662_v5 = vsel %vm666_vm8, %v1658_v37, %v1655_v47  ;;  %v1657_v28 = vrot.slane %v4625_v11, 1 }
 0x4c7   : > { %1635 = vrot.lane.b32.xlu0 %v4573_v56, %s3216_s21  ;;  %v1604_v20 = vrot.slane %v4581_v60, 7 }
 0x4c9   : > { %v1609_v0 = vsel %vm634_vm4, %v1603_v14, %v1604_v20  ;;  %v1607_v14 = vsel %vm634_vm4, %v1605_v9, %v1606_v39  ;;  %v1608_v49 = vsel %vm634_vm4, %v1604_v20, %v1605_v9 }
 0x4ca   : > { %v1612_v45 = vsub.f32 %v4581_v60, %v1609_v0  ;;  %v1614_v39 = vsub.f32 %v4559_v57, %v1607_v14 }
 0x4cb   : > { %1637 = vrot.lane.b32.xlu0 %v4581_v60, %s3216_s21 }
 0x528   : > { %v1586_v41 = vpop.permute.xlu1 %1585 }
 0x529   : > { %v1592_v21 = vsub.f32 %v4500_v63, %v1586_v41  ;;  %v1615_v41 = vmul.f32 %v5801_v2, %v1611_v24 }
 0x52b   : > { %v1596_v36 = vmul.f32 %v3536_v17, %v1592_v21  ;;  %v4630_v21 = vadd.f32 %v1511_v44, %v1507_v42 }
 0x52d   : > { %v1620_v27 = vadd.f32 %v1612_v45, %v1596_v36  ;;  %v1666_v45 = vsub.f32 %v1662_v5, %v4596_v38  ;;  %v1656_v18 = vrot.slane %v4630_v21, 1 }
 0x52f   : > { %v1624_v12 = vmul.f32 %v1620_v27, %v5798_v15  ;;  %v1584_v55 = vpop.permute.xlu0 %1583  ;;  %v5802_v27 = vld [vmem:[#allocation44_spill] sm:$0xff]  ;;  %v1670_v5 = vmul.f32 %v5765_v62, %v1666_v45 }
 0x530   : > { %v1591_v29 = vsub.f32 %v4534_v22, %v1584_v55  ;;  %v1590_v25 = vpop.permute.xlu1 %1589 }
 0x531   : > { %v4619_v58 = vadd.f32 %v1624_v12, %v4366_v35  ;;  %v1594_v52 = vsub.f32 %v4545_v3, %v1590_v25 }
 0x532   : > { %v1595_v0 = vmul.f32 %v3536_v17, %v1591_v29  ;;  %v5803_v29 = vld [vmem:[#allocation45_spill] sm:$0xff] }
 0x533   : > { %1685 = vrot.lane.b32.xlu1 %v4619_v58, %s3216_s21  ;;  %v1598_v36 = vmul.f32 %v3536_v17, %v1594_v52  ;;  %v5804_v52 = vld [vmem:[#allocation53_spill] sm:$0xff] }
 0x534   : > { %v1619_v35 = vadd.f32 %v1615_v41, %v1595_v0  ;;  %v1642_v46 = vpop.permute.xlu1 %1641  ;;  %v1613_v41 = vsub.f32 %v4570_v13, %v1608_v49  ;;  %v1659_v0 = vsel %vm666_vm8, %v1657_v28, %v1658_v37 }
 0x535   : > { %v1622_v8 = vadd.f32 %v1614_v39, %v1598_v36  ;;  %v1588_v42 = vpop.permute.xlu0 %1587  ;;  %v1646_v12 = vsub.f32 %v1642_v46, %v4559_v57  ;;  %v1665_v49 = vsub.f32 %v1659_v0, %v4625_v11 }
 0x536   : > { %v1623_v24 = vmul.f32 %v1619_v35, %v5802_v27  ;;  %v1593_v55 = vsub.f32 %v4563_v61, %v1588_v42  ;;  %v5806_v42 = vld [vmem:[#allocation41_spill] sm:$0xff] }
 0x537   : > { %v1626_v14 = vmul.f32 %v1622_v8, %v5803_v29  ;;  %v1650_v25 = vmul.f32 %v5764_v26, %v1646_v12 }
 0x538   : > { %v4645_v44 = vadd.f32 %v1623_v24, %v4391_v23  ;;  %v1597_v20 = vmul.f32 %v3536_v17, %v1593_v55  ;;  %v1640_v9 = vpop.permute.xlu1 %1639  ;;  %v1661_v23 = vsel %vm666_vm8, %v1655_v47, %v1656_v18 }
 0x539   : > { %v4655_v35 = vadd.f32 %v1626_v14, %v5804_v52  ;;  %v1674_v39 = vadd.f32 %v1670_v5, %v1650_v25  ;;  %v1636_v36 = vpop.permute.xlu0 %1635  ;;  %v1645_v45 = vsub.f32 %v1640_v9, %v4570_v13  ;;  %v1663_v12 = vsub.f32 %v1661_v23, %v4599_v54 }
 0x53a   : > { %1683 = vrot.lane.b32.xlu0 %v4645_v44, %s3216_s21  ;;  %v1621_v46 = vadd.f32 %v1613_v41, %v1597_v20  ;;  %v1643_v24 = vsub.f32 %v1636_v36, %v4573_v56  ;;  %v1660_v5 = vsel %vm666_vm8, %v1656_v18, %v1657_v28 }
 0x53b   : > { %5805 = vst [vmem:[#allocation57_spill] sm:$0xff] %v4655_v35  ;;  %v1678_v8 = vmul.f32 %v1674_v39, %v5803_v29  ;;  %v1649_v37 = vmul.f32 %v5764_v26, %v1645_v45  ;;  %1689 = vrot.lane.b32.xlu1 %v4655_v35, %s3216_s21  ;;  %v1664_v39 = vsub.f32 %v1660_v5, %v4630_v21  ;;  %v1770_v29 = vrot.slane %v4619_v58, 1 }
 0x53c   : > { %v1625_v47 = vmul.f32 %v1621_v46, %v5806_v42  ;;  %v1647_v55 = vmul.f32 %v5764_v26, %v1643_v24 }
 0x53d   : > { %v4672_v14 = vadd.f32 %v1678_v8, %v4412_v40  ;;  %v1673_v25 = vadd.f32 %v1665_v49, %v1649_v37  ;;  %v1638_v41 = vpop.permute.xlu0 %1637 }
 0x53e   : > { %v4677_v20 = vadd.f32 %v1625_v47, %v4418_v48  ;;  %v1671_v9 = vadd.f32 %v1663_v12, %v1647_v55  ;;  %v1644_v0 = vsub.f32 %v1638_v41, %v4581_v60 }
 0x53f   : > { %5807 = vst [vmem:[#allocation42_spill] sm:$0xff] %v4672_v14  ;;  %v1677_v52 = vmul.f32 %v1673_v25, %v5806_v42  ;;  %1791 = vrot.lane.b32.xlu1 %v4672_v14, %s3215_s11  ;;  %v1702_v46 = vrot.slane %v4672_v14, 7 }
 0x540   : > { %v1675_v40 = vmul.f32 %v1671_v9, %v5802_v27  ;;  %v1648_v23 = vmul.f32 %v5764_v26, %v1644_v0  ;;  %1687 = vrot.lane.b32.xlu0 %v4677_v20, %s3216_s21  ;;  %v1772_v9 = vrot.slane %v4655_v35, 1 }
 0x541   : > { %v4689_v48 = vadd.f32 %v1677_v52, %v4426_v7  ;;  %v5809_v52 = vld [vmem:[#allocation46_spill] sm:$0xff] }
 0x542   : > { %v4692_v28 = vadd.f32 %v1675_v40, %v4433_v43  ;;  %v1672_v18 = vadd.f32 %v1664_v39, %v1648_v23 }
 0x543   : > { %1789 = vrot.lane.b32.xlu1 %v4689_v48, %s3215_s11  ;;  %v1701_v25 = vrot.slane %v4689_v48, 7 }
 0x544   : > { %v1676_v36 = vmul.f32 %v1672_v18, %v5798_v15  ;;  %1785 = vrot.lane.b32.xlu0 %v4692_v28, %s3215_s11  ;;  %1813 = vst [vmem:[%s3577_s25 + $0x2] sm:$0x4] %v4692_v28  ;;  %v1699_v43 = vrot.slane %v4692_v28, 7  ;;  %v1769_v18 = vrot.slane %v4645_v44, 1 }
 0x546   : > { %v4702_v45 = vadd.f32 %v1676_v36, %v4443_v50  ;;  %v1736_v50 = vstv %s4706_s22  ;;  %v1706_v12 = vsel %vm634_vm4, %v1702_v46, %v1699_v43  ;;  %v5810_v36 = vld [vmem:[#allocation55_spill] sm:$0xff]  ;;  %s5485_s22 = scalar_lea.hbm %s5639_s7, %s2756_s16 }
 0x547   : > { %v4723_v5 = vmul.f32 0.0, %v1736_v50  ;;  %v1707_v41 = vsub.f32 %v4692_v28, %v1706_v12 }
 0x548   : > { %1787 = vrot.lane.b32.xlu0 %v4702_v45, %s3215_s11  ;;  %v1700_v7 = vrot.slane %v4702_v45, 7 }
 0x549   : > { %v4739_v12 = vmul.f32 %v5801_v2, %v1707_v41 }
 0x54a   : > { %v1705_v8 = vsel %vm634_vm4, %v1699_v43, %v1700_v7 }
 0x54b   : > { %v4717_v47 = vsub.f32 %v4702_v45, %v1705_v8 }
 0x54d   : > { %5808 = vst [vmem:[#allocation47_spill] sm:$0xff] %v4717_v47 }
 0x5a5   : > { %v1686_v24 = vpop.permute.xlu1 %1685 }
 0x5a6   : > { %v1692_v37 = vsub.f32 %v1686_v24, %v4619_v58  ;;  %v1703_v24 = vsel %vm634_vm4, %v1701_v25, %v1702_v46 }
 0x5a8   : > { %v1696_v49 = vmul.f32 %v5764_v26, %v1692_v37 }
 0x5aa   : > { %v1716_v55 = vadd.f32 %v4717_v47, %v1696_v49 }
 0x5ac   : > { %v1720_v0 = vmul.f32 %v1716_v55, %v1716_v55  ;;  %v1728_v40 = vmul.f32 %v1716_v55, %v5809_v52  ;;  %v1684_v39 = vpop.permute.xlu0 %1683 }
 0x5ad   : > { %v1691_v23 = vsub.f32 %v1684_v39, %v4645_v44  ;;  %v1690_v8 = vpop.permute.xlu1 %1689  ;;  %v1776_v39 = vsel %vm666_vm8, %v1772_v9, %v1769_v18 }
 0x5ae   : > { %v4731_v43 = vadd.f32 %v1720_v0, %v5810_v36  ;;  %v4736_v37 = vadd.f32 %v4723_v5, %v1728_v40  ;;  %v1694_v52 = vsub.f32 %v1690_v8, %v4655_v35  ;;  %v1750_v0 = vmul.f32 %v1696_v49, %v5799_v34 }
 0x5af   : > { %v1695_v55 = vmul.f32 %v5764_v26, %v1691_v23  ;;  %v4750_v40 = vsub.f32 %v4672_v14, %v1703_v24  ;;  %v1780_v8 = vsub.f32 %v1776_v39, %v4655_v35  ;;  %v1704_v24 = vsel %vm634_vm4, %v1700_v7, %v1701_v25 }
 0x5b0   : > { %5811 = vst [vmem:[#allocation52_spill] sm:$0xff] %v4731_v43  ;;  %v1746_v36 = vadd.f32 %v4736_v37, %v4500_v63  ;;  %v1698_v41 = vmul.f32 %v5764_v26, %v1694_v52  ;;  %v5812_v43 = vld [vmem:[#allocation50_spill] sm:$0xff]  ;;  %v1775_v39 = vsel %vm666_vm8, %v1769_v18, %v1770_v29  ;;  %v4774_v25 = vsub.f32 %v4689_v48, %v1704_v24 }
 0x5b1   : > { %v1715_v46 = vadd.f32 %v4739_v12, %v1695_v55  ;;  %v1737_v42 = vmul.f32 %v5812_v43, %v1736_v50  ;;  %v1792_v23 = vpop.permute.xlu1 %1791  ;;  %v1749_v35 = vmul.f32 %v1695_v55, %v3721_v51 }
 0x5b2   : > { %v4756_v27 = vadd.f32 %v1750_v0, %v1746_v36  ;;  %v1718_v63 = vadd.f32 %v4750_v40, %v1698_v41  ;;  %v1688_v34 = vpop.permute.xlu0 %1687  ;;  %v1796_v50 = vsub.f32 %v4672_v14, %v1792_v23  ;;  %v1771_v0 = vrot.slane %v4677_v20, 1 }
 0x5b3   : > { %v1719_v49 = vmul.f32 %v1715_v46, %v1715_v46  ;;  %v1727_v47 = vmul.f32 %v1715_v46, %v5795_v10  ;;  %v1693_v52 = vsub.f32 %v1688_v34, %v4677_v20  ;;  %v5813_v10 = vld [vmem:[#allocation51_spill] sm:$0xff]  ;;  %v1784_v23 = vmul.f32 %v5765_v62, %v1780_v8 }
 0x5b4   : > { %1836 = vrot.lane.b32.xlu1 %v4756_v27, %s3215_s11  ;;  %v1722_v46 = vmul.f32 %v1718_v63, %v1718_v63  ;;  %v1730_v43 = vmul.f32 %v1718_v63, %v5813_v10  ;;  %v1800_v18 = vmul.f32 %v3536_v17, %v1796_v50  ;;  %v1773_v8 = vsel %vm666_vm8, %v1771_v0, %v1772_v9 }
 0x5b5   : > { %v4770_v36 = vadd.f32 %v1719_v49, %v4513_v1  ;;  %v1741_v7 = vadd.f32 %v1737_v42, %v1727_v47  ;;  %v1697_v34 = vmul.f32 %v5764_v26, %v1693_v52  ;;  %v1790_v14 = vpop.permute.xlu1 %1789 }
 0x5b6   : > { %v4781_v2 = vadd.f32 %v1722_v46, %v4519_v53  ;;  %v1786_v1 = vpop.permute.xlu0 %1785  ;;  %v1795_v49 = vsub.f32 %v4689_v48, %v1790_v14  ;;  %v1804_v63 = vadd.f32 %v1800_v18, %v1784_v23  ;;  %v1744_v53 = vadd.f32 %v4723_v5, %v1730_v43 }
 0x5b7   : > { %v1745_v42 = vadd.f32 %v1741_v7, %v4534_v22  ;;  %v1717_v47 = vadd.f32 %v4774_v25, %v1697_v34  ;;  %v1793_v24 = vsub.f32 %v4692_v28, %v1786_v1  ;;  %v1752_v22 = vmul.f32 %v1698_v41, %v3739_v31 }
 0x5b8   : > { %v1799_v52 = vmul.f32 %v3536_v17, %v1795_v49  ;;  %v1777_v23 = vsub.f32 %v1775_v39, %v4645_v44  ;;  %v1779_v18 = vsub.f32 %v1773_v8, %v4677_v20  ;;  %v1808_v43 = vmul.f32 %v1804_v63, %v3763_v30 }
 0x5b9   : > { %v4790_v50 = vadd.f32 %v1749_v35, %v1745_v42  ;;  %v1721_v55 = vmul.f32 %v1717_v47, %v1717_v47  ;;  %v1729_v46 = vmul.f32 %v1717_v47, %v5759_v32  ;;  %v1797_v14 = vmul.f32 %v3536_v17, %v1793_v24 }
 0x5ba   : > { %v1788_v1 = vpop.permute.xlu0 %1787  ;;  %v1748_v35 = vadd.f32 %v1744_v53, %v4545_v3  ;;  %v1774_v49 = vsel %vm666_vm8, %v1770_v29, %v1771_v0  ;;  %v1803_v39 = vadd.f32 %v1799_v52, %v1779_v18  ;;  %v1751_v3 = vmul.f32 %v1697_v34, %v3733_v16 }
 0x5bb   : > { %1834 = vrot.lane.b32.xlu0 %v4790_v50, %s3215_s11  ;;  %v4802_v9 = vadd.f32 %v1721_v55, %v4548_v33  ;;  %v1794_v41 = vsub.f32 %v4702_v45, %v1788_v1  ;;  %v1801_v42 = vadd.f32 %v1797_v14, %v1777_v23  ;;  %v1743_v24 = vadd.f32 %v4723_v5, %v1729_v46 }
 0x5bc   : > { %v4808_v47 = vadd.f32 %v1752_v22, %v1748_v35  ;;  %v1778_v33 = vsub.f32 %v1774_v49, %v4619_v58  ;;  %v4818_v29 = vadd.f32 %v1808_v43, %v4559_v57  ;;  %v1807_v52 = vmul.f32 %v1803_v39, %v3785_v4 }
 0x5bd   : > { %v1798_v8 = vmul.f32 %v3536_v17, %v1794_v41  ;;  %v1747_v63 = vadd.f32 %v1743_v24, %v4563_v61  ;;  %v1805_v0 = vmul.f32 %v1801_v42, %v3769_v59  ;;  %v1760_v14 = vadd.f32 %v1744_v53, %v4596_v38 }
 0x5be   : > { %1840 = vrot.lane.b32.xlu1 %v4808_v47, %s3215_s11  ;;  %v4832_v61 = vadd.f32 %v1807_v52, %v4570_v13  ;;  %v1857_v22 = vrot.slane %v4818_v29, 7  ;;  %v1764_v23 = vmul.f32 %v4750_v40, %v3739_v31  ;;  %v1757_v18 = vadd.f32 %v1741_v7, %v4599_v54 }
 0x5bf   : > { %v1802_v55 = vadd.f32 %v1798_v8, %v1778_v33  ;;  %v4822_v5 = vadd.f32 %v1751_v3, %v1747_v63  ;;  %v4829_v34 = vadd.f32 %v1805_v0, %v4573_v56  ;;  %v1761_v43 = vmul.f32 %v4739_v12, %v3721_v51 }
 0x5c0   : > { %v4856_v49 = vadd.f32 %v1764_v23, %v1760_v14  ;;  %v1759_v39 = vadd.f32 %v1743_v24, %v4625_v11  ;;  %v1856_v3 = vrot.slane %v4832_v61, 7  ;;  %v1763_v0 = vmul.f32 %v4774_v25, %v3733_v16  ;;  %v5816_v23 = vld [vmem:[#allocation47_spill] sm:$0xff] }
 0x5c1   : > { %1838 = vrot.lane.b32.xlu0 %v4822_v5, %s3215_s11  ;;  %v1806_v57 = vmul.f32 %v1802_v55, %v5760_v19  ;;  %v1854_v13 = vrot.slane %v4829_v34, 7  ;;  %v4862_v41 = vadd.f32 %v1761_v43, %v1757_v18  ;;  %v1758_v52 = vadd.f32 %v4736_v37, %v4630_v21  ;;  %v5817_v43 = vld [vmem:[#allocation44_spill] sm:$0xff] }
 0x5c2   : > { %1892 = vrot.lane.b32.xlu1 %v4818_v29, %s3216_s21  ;;  %v1909_v42 = vrot.slane %v4856_v49, 1  ;;  %v4888_v21 = vadd.f32 %v1763_v0, %v1759_v39 }
 0x5c3   : > { %v4840_v46 = vadd.f32 %v1806_v57, %v4581_v60  ;;  %v1861_v40 = vsel %vm634_vm4, %v1857_v22, %v1854_v13  ;;  %v1906_v63 = vrot.slane %v4862_v41, 1  ;;  %v5814_v57 = vld [vmem:[#allocation39_spill] sm:$0xff] }
 0x5c4   : > { %v1862_v7 = vsub.f32 %v4829_v34, %v1861_v40  ;;  %v1908_v39 = vrot.slane %v4888_v21, 1 }
 0x5c5   : > { %1886 = vrot.lane.b32.xlu0 %v4829_v34, %s3216_s21  ;;  %v1855_v56 = vrot.slane %v4840_v46, 7  ;;  %v1913_v14 = vsel %vm666_vm8, %v1909_v42, %v1906_v63 }
 0x5c6   : > { %1890 = vrot.lane.b32.xlu1 %v4832_v61, %s3216_s21  ;;  %v1866_v11 = vmul.f32 %v5814_v57, %v1862_v7 }
 0x5c7   : > { %v1860_v60 = vsel %vm634_vm4, %v1854_v13, %v1855_v56  ;;  %v5815_v13 = vld [vmem:[#allocation48_spill] sm:$0xff] }
 0x5c8   : > { %v1863_v53 = vsub.f32 %v4840_v46, %v1860_v60  ;;  %v1762_v18 = vmul.f32 %v5816_v23, %v5815_v13 }
 0x5c9   : > { %1888 = vrot.lane.b32.xlu0 %v4840_v46, %s3216_s21 }
 0x5ca   : > { %v4891_v60 = vadd.f32 %v1762_v18, %v1758_v52 }
 0x626   : > { %v1837_v1 = vpop.permute.xlu1 %1836 }
 0x627   : > { %v1843_v35 = vsub.f32 %v4756_v27, %v1837_v1  ;;  %v1858_v1 = vsel %vm634_vm4, %v1856_v3, %v1857_v22  ;;  %v1859_v22 = vsel %vm634_vm4, %v1855_v56, %v1856_v3 }
 0x628   : > { %v1864_v56 = vsub.f32 %v4832_v61, %v1859_v22  ;;  %v5820_v22 = vld [vmem:[#allocation41_spill] sm:$0xff] }
 0x629   : > { %v1847_v38 = vmul.f32 %v3536_v17, %v1843_v35  ;;  %v1917_v35 = vsub.f32 %v1913_v14, %v4856_v49 }
 0x62b   : > { %v1871_v54 = vadd.f32 %v1863_v53, %v1847_v38  ;;  %v1865_v53 = vsub.f32 %v4818_v29, %v1858_v1  ;;  %v1921_v52 = vmul.f32 %v5765_v62, %v1917_v35 }
 0x62d   : > { %v1875_v12 = vmul.f32 %v1871_v54, %v5798_v15  ;;  %v1835_v8 = vpop.permute.xlu0 %1834 }
 0x62e   : > { %v1842_v33 = vsub.f32 %v4790_v50, %v1835_v8 }
 0x62f   : > { %v4876_v55 = vadd.f32 %v1875_v12, %v4619_v58 }
 0x630   : > { %v1846_v24 = vmul.f32 %v3536_v17, %v1842_v33  ;;  %v1841_v25 = vpop.permute.xlu1 %1840 }
 0x631   : > { %1936 = vrot.lane.b32.xlu1 %v4876_v55, %s3216_s21  ;;  %v1845_v37 = vsub.f32 %v4808_v47, %v1841_v25  ;;  %v1910_v25 = vsel %vm666_vm8, %v1908_v39, %v1909_v42 }
 0x632   : > { %v1870_v58 = vadd.f32 %v1866_v11, %v1846_v24  ;;  %v1907_v11 = vrot.slane %v4891_v60, 1  ;;  %v5818_v24 = vld [vmem:[#allocation45_spill] sm:$0xff] }
 0x633   : > { %v1849_v40 = vmul.f32 %v3536_v17, %v1845_v37  ;;  %v1839_v54 = vpop.permute.xlu0 %1838 }
 0x634   : > { %v1874_v38 = vmul.f32 %v1870_v58, %v5817_v43  ;;  %v1893_v7 = vpop.permute.xlu1 %1892  ;;  %v1844_v33 = vsub.f32 %v4822_v5, %v1839_v54  ;;  %v5819_v58 = vld [vmem:[#allocation57_spill] sm:$0xff] }
 0x635   : > { %v1873_v8 = vadd.f32 %v1865_v53, %v1849_v40  ;;  %v1897_v0 = vsub.f32 %v1893_v7, %v4818_v29 }
 0x636   : > { %v4901_v12 = vadd.f32 %v1874_v38, %v4645_v44  ;;  %v1848_v3 = vmul.f32 %v3536_v17, %v1844_v33  ;;  %v1912_v44 = vsel %vm666_vm8, %v1906_v63, %v1907_v11  ;;  %v1916_v33 = vsub.f32 %v1910_v25, %v4888_v21 }
 0x637   : > { %v1877_v14 = vmul.f32 %v1873_v8, %v5818_v24  ;;  %v1901_v23 = vmul.f32 %v5764_v26, %v1897_v0  ;;  %v1887_v18 = vpop.permute.xlu0 %1886  ;;  %v1914_v63 = vsub.f32 %v1912_v44, %v4862_v41  ;;  %v1911_v0 = vsel %vm666_vm8, %v1907_v11, %v1908_v39 }
 0x638   : > { %1934 = vrot.lane.b32.xlu0 %v4901_v12, %s3216_s21  ;;  %v1891_v1 = vpop.permute.xlu1 %1890  ;;  %v1872_v35 = vadd.f32 %v1864_v56, %v1848_v3  ;;  %v1894_v53 = vsub.f32 %v1887_v18, %v4829_v34  ;;  %v5821_v56 = vld [vmem:[#allocation42_spill] sm:$0xff] }
 0x639   : > { %v4918_v37 = vadd.f32 %v1877_v14, %v5819_v58  ;;  %v1925_v38 = vadd.f32 %v1921_v52, %v1901_v23  ;;  %v1896_v40 = vsub.f32 %v1891_v1, %v4832_v61  ;;  %v1915_v58 = vsub.f32 %v1911_v0, %v4891_v60 }
 0x63a   : > { %v1876_v54 = vmul.f32 %v1872_v35, %v5820_v22  ;;  %v1898_v8 = vmul.f32 %v5764_v26, %v1894_v53 }
 0x63b   : > { %v1929_v7 = vmul.f32 %v1925_v38, %v5818_v24  ;;  %1940 = vrot.lane.b32.xlu1 %v4918_v37, %s3216_s21  ;;  %v1900_v42 = vmul.f32 %v5764_v26, %v1896_v40  ;;  %v1889_v52 = vpop.permute.xlu0 %1888 }
 0x63c   : > { %v4933_v14 = vadd.f32 %v1876_v54, %v4677_v20  ;;  %v1922_v23 = vadd.f32 %v1914_v63, %v1898_v8  ;;  %v1895_v44 = vsub.f32 %v1889_v52, %v4840_v46 }
 0x63d   : > { %v4936_v3 = vadd.f32 %v1929_v7, %v5821_v56  ;;  %v1924_v18 = vadd.f32 %v1916_v33, %v1900_v42 }
 0x63e   : > { %v1926_v1 = vmul.f32 %v1922_v23, %v5817_v43  ;;  %v1899_v25 = vmul.f32 %v5764_v26, %v1895_v44  ;;  %1938 = vrot.lane.b32.xlu0 %v4933_v14, %s3216_s21  ;;  %v5824_v44 = vld [vmem:[#allocation46_spill] sm:$0xff] }
 0x63f   : > { %5822 = vst [vmem:[#allocation43_spill] sm:$0xff] %v4936_v3  ;;  %2042 = vrot.lane.b32.xlu1 %v4936_v3, %s3215_s11  ;;  %v1928_v20 = vmul.f32 %v1924_v18, %v5820_v22  ;;  %v1953_v40 = vrot.slane %v4936_v3, 7 }
 0x640   : > { %v4948_v39 = vadd.f32 %v1926_v1, %v4692_v28  ;;  %v1923_v11 = vadd.f32 %v1915_v58, %v1899_v25 }
 0x641   : > { %v4951_v35 = vadd.f32 %v1928_v20, %v4689_v48  ;;  %v2023_v20 = vrot.slane %v4918_v37, 1 }
 0x642   : > { %v1927_v38 = vmul.f32 %v1923_v11, %v5798_v15  ;;  %2036 = vrot.lane.b32.xlu0 %v4948_v39, %s3215_s11  ;;  %2064 = vst [vmem:[%s3577_s25 + $0x3] sm:$0x4] %v4948_v39  ;;  %v1950_v28 = vrot.slane %v4948_v39, 7  ;;  %v5825_v11 = vld [vmem:[#allocation52_spill] sm:$0xff] }
 0x643   : > { %2040 = vrot.lane.b32.xlu1 %v4951_v35, %s3215_s11  ;;  %v1952_v58 = vrot.slane %v4951_v35, 7 }
 0x644   : > { %v4961_v53 = vadd.f32 %v1927_v38, %v4702_v45  ;;  %v1987_v45 = vstv %s4965_s14  ;;  %v1957_v33 = vsel %vm634_vm4, %v1953_v40, %v1950_v28  ;;  %s3061_s14 = scalar_lea.vmem %s5469_s18, 128 }
 0x645   : > { %v4981_v52 = vmul.f32 0.0, %v1987_v45  ;;  %v1958_v56 = vsub.f32 %v4948_v39, %v1957_v33  ;;  %p3062_p7 = scmp.ne.s32.totalorder %s5469_s18, %s3061_s14 }
 0x646   : > { %2038 = vrot.lane.b32.xlu0 %v4961_v53, %s3215_s11  ;;  %v1951_v48 = vrot.slane %v4961_v53, 7 }
 0x647   : > { %p3063_p11 = pnand %p3062_p7, %p5847_p8 }
 0x648   : > { %v1956_v7 = vsel %vm634_vm4, %v1950_v28, %v1951_v48 }
 0x649   : > { %v4976_v42 = vsub.f32 %v4961_v53, %v1956_v7  ;;  %p3064_p5 = pneg %p3063_p11 }
 0x64b   : > { %5823 = vst [vmem:[#allocation56_spill] sm:$0xff] %v4976_v42 }
 0x6a3   : > { %v1937_v54 = vpop.permute.xlu1 %1936 }
 0x6a4   : > { %v1943_v63 = vsub.f32 %v1937_v54, %v4876_v55  ;;  %v4995_v54 = vmul.f32 %v5814_v57, %v1958_v56 }
 0x6a6   : > { %v1947_v8 = vmul.f32 %v5764_v26, %v1943_v63  ;;  %v2020_v63 = vrot.slane %v4901_v12, 1 }
 0x6a8   : > { %v1967_v0 = vadd.f32 %v4976_v42, %v1947_v8  ;;  %v2001_v33 = vmul.f32 %v1947_v8, %v5815_v13  ;;  %v2027_v56 = vsel %vm666_vm8, %v2023_v20, %v2020_v63  ;;  %v5828_v8 = vld [vmem:[#allocation49_spill] sm:$0xff] }
 0x6a9   : > { %v2031_v13 = vsub.f32 %v2027_v56, %v4918_v37 }
 0x6aa   : > { %v1971_v23 = vmul.f32 %v1967_v0, %v1967_v0  ;;  %v1979_v18 = vmul.f32 %v1967_v0, %v5824_v44  ;;  %v1935_v1 = vpop.permute.xlu0 %1934  ;;  %v1954_v0 = vsel %vm634_vm4, %v1952_v58, %v1953_v40 }
 0x6ab   : > { %v1942_v25 = vsub.f32 %v1935_v1, %v4901_v12  ;;  %v5013_v40 = vsub.f32 %v4936_v3, %v1954_v0 }
 0x6ac   : > { %v4989_v38 = vadd.f32 %v1971_v23, %v5825_v11  ;;  %v4992_v28 = vadd.f32 %v4981_v52, %v1979_v18 }
 0x6ad   : > { %v1946_v7 = vmul.f32 %v5764_v26, %v1942_v25  ;;  %v1941_v1 = vpop.permute.xlu1 %1940  ;;  %v5827_v25 = vld [vmem:[#allocation50_spill] sm:$0xff] }
 0x6ae   : > { %5826 = vst [vmem:[#allocation40_spill] sm:$0xff] %v4989_v38  ;;  %v1997_v23 = vadd.f32 %v4992_v28, %v4756_v27  ;;  %v1945_v18 = vsub.f32 %v1941_v1, %v4918_v37  ;;  %v1988_v44 = vmul.f32 %v5827_v25, %v1987_v45  ;;  %v1955_v27 = vsel %vm634_vm4, %v1951_v48, %v1952_v58 }
 0x6af   : > { %v1966_v11 = vadd.f32 %v4995_v54, %v1946_v7  ;;  %v5035_v25 = vsub.f32 %v4951_v35, %v1955_v27 }
 0x6b0   : > { %v5008_v38 = vadd.f32 %v2001_v33, %v1997_v23  ;;  %v1949_v43 = vmul.f32 %v5764_v26, %v1945_v18  ;;  %v1939_v42 = vpop.permute.xlu0 %1938  ;;  %v2021_v33 = vrot.slane %v4876_v55, 1 }
 0x6b1   : > { %v1970_v22 = vmul.f32 %v1966_v11, %v1966_v11  ;;  %v1978_v24 = vmul.f32 %v1966_v11, %v5828_v8  ;;  %v2043_v1 = vpop.permute.xlu1 %2042  ;;  %v1944_v23 = vsub.f32 %v1939_v42, %v4933_v14  ;;  %v2022_v11 = vrot.slane %v4933_v14, 1 }
 0x6b2   : > { %2087 = vrot.lane.b32.xlu1 %v5008_v38, %s3215_s11  ;;  %v1969_v0 = vadd.f32 %v5013_v40, %v1949_v43  ;;  %v2047_v48 = vsub.f32 %v4936_v3, %v2043_v1  ;;  %v2026_v58 = vsel %vm666_vm8, %v2020_v63, %v2021_v33  ;;  %v2035_v42 = vmul.f32 %v5765_v62, %v2031_v13 }
 0x6b3   : > { %v5023_v45 = vadd.f32 %v1970_v22, %v4770_v36  ;;  %v5031_v18 = vadd.f32 %v1988_v44, %v1978_v24  ;;  %v1948_v36 = vmul.f32 %v5764_v26, %v1944_v23  ;;  %v2000_v22 = vmul.f32 %v1946_v7, %v3721_v51 }
 0x6b4   : > { %v1973_v56 = vmul.f32 %v1969_v0, %v1969_v0  ;;  %v1981_v8 = vmul.f32 %v1969_v0, %v5813_v10  ;;  %v2037_v1 = vpop.permute.xlu0 %2036  ;;  %v2024_v23 = vsel %vm666_vm8, %v2022_v11, %v2023_v20  ;;  %v2025_v20 = vsel %vm666_vm8, %v2021_v33, %v2022_v11 }
 0x6b5   : > { %5829 = vst [vmem:[#allocation54_spill] sm:$0xff] %v5023_v45  ;;  %v2051_v45 = vmul.f32 %v3536_v17, %v2047_v48  ;;  %v1996_v63 = vadd.f32 %v5031_v18, %v4790_v50  ;;  %v1968_v44 = vadd.f32 %v5035_v25, %v1948_v36  ;;  %v2044_v27 = vsub.f32 %v4948_v39, %v2037_v1  ;;  %v2041_v0 = vpop.permute.xlu1 %2040 }
 0x6b6   : > { %v5044_v24 = vadd.f32 %v1973_v56, %v4781_v2  ;;  %v2046_v13 = vsub.f32 %v4951_v35, %v2041_v0  ;;  %v1995_v2 = vadd.f32 %v4981_v52, %v1981_v8  ;;  %v2028_v56 = vsub.f32 %v2026_v58, %v4901_v12 }
 0x6b7   : > { %v2055_v7 = vadd.f32 %v2051_v45, %v2035_v42  ;;  %v5051_v10 = vadd.f32 %v2000_v22, %v1996_v63  ;;  %v1972_v48 = vmul.f32 %v1968_v44, %v1968_v44  ;;  %v1980_v3 = vmul.f32 %v1968_v44, %v5759_v32 }
 0x6b8   : > { %5830 = vst [vmem:[#allocation53_spill] sm:$0xff] %v5044_v24  ;;  %v2048_v50 = vmul.f32 %v3536_v17, %v2044_v27  ;;  %v2030_v1 = vsub.f32 %v2024_v23, %v4933_v14  ;;  %v2050_v24 = vmul.f32 %v3536_v17, %v2046_v13  ;;  %v2039_v45 = vpop.permute.xlu0 %2038  ;;  %v2003_v22 = vmul.f32 %v1949_v43, %v3739_v31 }
 0x6b9   : > { %2085 = vrot.lane.b32.xlu0 %v5051_v10, %s3215_s11  ;;  %v5065_v42 = vadd.f32 %v1972_v48, %v4802_v9  ;;  %v2045_v8 = vsub.f32 %v4961_v53, %v2039_v45  ;;  %v1999_v58 = vadd.f32 %v1995_v2, %v4808_v47  ;;  %v1994_v44 = vadd.f32 %v4981_v52, %v1980_v3 }
 0x6ba   : > { %v2052_v63 = vadd.f32 %v2048_v50, %v2028_v56  ;;  %v2059_v27 = vmul.f32 %v2055_v7, %v3763_v30  ;;  %v2054_v0 = vadd.f32 %v2050_v24, %v2030_v1  ;;  %v2002_v23 = vmul.f32 %v1948_v36, %v3733_v16 }
 0x6bb   : > { %v2049_v33 = vmul.f32 %v3536_v17, %v2045_v8  ;;  %v5072_v11 = vadd.f32 %v2003_v22, %v1999_v58  ;;  %v2029_v43 = vsub.f32 %v2025_v20, %v4876_v55  ;;  %v1998_v9 = vadd.f32 %v1994_v44, %v4822_v5 }
 0x6bc   : > { %v2056_v47 = vmul.f32 %v2052_v63, %v3769_v59  ;;  %v5083_v52 = vadd.f32 %v2059_v27, %v4818_v29  ;;  %v2058_v24 = vmul.f32 %v2054_v0, %v3785_v4  ;;  %v2011_v1 = vadd.f32 %v1995_v2, %v4856_v49 }
 0x6bd   : > { %2091 = vrot.lane.b32.xlu1 %v5072_v11, %s3215_s11  ;;  %v2053_v13 = vadd.f32 %v2049_v33, %v2029_v43  ;;  %v5080_v3 = vadd.f32 %v2002_v23, %v1998_v9  ;;  %v2008_v45 = vadd.f32 %v5031_v18, %v4862_v41  ;;  %v2012_v63 = vmul.f32 %v4995_v54, %v3721_v51 }
 0x6be   : > { %v5091_v5 = vadd.f32 %v2056_v47, %v4829_v34  ;;  %v5095_v7 = vadd.f32 %v2058_v24, %v4832_v61  ;;  %v2108_v56 = vrot.slane %v5083_v52, 7  ;;  %v2010_v41 = vadd.f32 %v1994_v44, %v4888_v21  ;;  %v5831_v44 = vld [vmem:[#allocation48_spill] sm:$0xff] }
 0x6bf   : > { %2089 = vrot.lane.b32.xlu0 %v5080_v3, %s3215_s11  ;;  %v2057_v36 = vmul.f32 %v2053_v13, %v5760_v19  ;;  %v5125_v2 = vadd.f32 %v2012_v63, %v2008_v45  ;;  %v2009_v9 = vadd.f32 %v4992_v28, %v4891_v60  ;;  %v2014_v47 = vmul.f32 %v5035_v25, %v3733_v16  ;;  %v5832_v24 = vld [vmem:[#allocation56_spill] sm:$0xff] }
 0x6c0   : > { %v2105_v48 = vrot.slane %v5091_v5, 7  ;;  %v2107_v43 = vrot.slane %v5095_v7, 7 }
 0x6c1   : > { %2143 = vrot.lane.b32.xlu1 %v5083_v52, %s3216_s21  ;;  %v5102_v29 = vadd.f32 %v2057_v36, %v4840_v46  ;;  %v2015_v46 = vmul.f32 %v5013_v40, %v3739_v31  ;;  %v2013_v36 = vmul.f32 %v5832_v24, %v5831_v44  ;;  %v5151_v25 = vadd.f32 %v2014_v47, %v2010_v41 }
 0x6c2   : > { %v2112_v58 = vsel %vm634_vm4, %v2108_v56, %v2105_v48 }
 0x6c3   : > { %2137 = vrot.lane.b32.xlu0 %v5091_v5, %s3216_s21  ;;  %v2106_v34 = vrot.slane %v5102_v29, 7  ;;  %v5123_v27 = vadd.f32 %v2015_v46, %v2011_v1  ;;  %v2113_v0 = vsub.f32 %v5091_v5, %v2112_v58 }
 0x6c5   : > { %2141 = vrot.lane.b32.xlu1 %v5095_v7, %s3216_s21  ;;  %v2111_v61 = vsel %vm634_vm4, %v2105_v48, %v2106_v34  ;;  %v2160_v54 = vrot.slane %v5123_v27, 1  ;;  %v2117_v13 = vmul.f32 %v5814_v57, %v2113_v0  ;;  %v2159_v0 = vrot.slane %v5151_v25, 1 }
 0x6c6   : > { %v2114_v8 = vsub.f32 %v5102_v29, %v2111_v61  ;;  %v5153_v61 = vadd.f32 %v2013_v36, %v2009_v9 }
 0x6c7   : > { %2139 = vrot.lane.b32.xlu0 %v5102_v29, %s3216_s21 }
 0x724   : > { %v2088_v50 = vpop.permute.xlu1 %2087 }
 0x725   : > { %v2094_v20 = vsub.f32 %v5008_v38, %v2088_v50  ;;  %v2109_v50 = vsel %vm634_vm4, %v2107_v43, %v2108_v56 }
 0x726   : > { %v2116_v45 = vsub.f32 %v5083_v52, %v2109_v50 }
 0x727   : > { %v2098_v22 = vmul.f32 %v3536_v17, %v2094_v20  ;;  %v5833_v20 = vld [vmem:[#allocation44_spill] sm:$0xff] }
 0x729   : > { %v2122_v49 = vadd.f32 %v2114_v8, %v2098_v22  ;;  %v2110_v8 = vsel %vm634_vm4, %v2106_v34, %v2107_v43  ;;  %v5834_v43 = vld [vmem:[#allocation45_spill] sm:$0xff] }
 0x72a   : > { %v2115_v9 = vsub.f32 %v5095_v7, %v2110_v8 }
 0x72b   : > { %v2126_v40 = vmul.f32 %v2122_v49, %v5798_v15  ;;  %v2086_v18 = vpop.permute.xlu0 %2085 }
 0x72c   : > { %v2093_v23 = vsub.f32 %v5051_v10, %v2086_v18 }
 0x72d   : > { %v5131_v33 = vadd.f32 %v2126_v40, %v4876_v55  ;;  %v2157_v55 = vrot.slane %v5125_v2, 1 }
 0x72e   : > { %v2097_v21 = vmul.f32 %v3536_v17, %v2093_v23  ;;  %v2158_v23 = vrot.slane %v5153_v61, 1 }
 0x72f   : > { %2187 = vrot.lane.b32.xlu1 %v5131_v33, %s3216_s21  ;;  %v2092_v60 = vpop.permute.xlu1 %2091  ;;  %v2164_v28 = vsel %vm666_vm8, %v2160_v54, %v2157_v55 }
 0x730   : > { %v2121_v48 = vadd.f32 %v2117_v13, %v2097_v21  ;;  %v2096_v1 = vsub.f32 %v5072_v11, %v2092_v60  ;;  %v2168_v58 = vsub.f32 %v2164_v28, %v5123_v27  ;;  %v2163_v21 = vsel %vm666_vm8, %v2157_v55, %v2158_v23 }
 0x731   : > { %v2090_v56 = vpop.permute.xlu0 %2089  ;;  %v2161_v60 = vsel %vm666_vm8, %v2159_v0, %v2160_v54  ;;  %v2165_v8 = vsub.f32 %v2163_v21, %v5125_v2  ;;  %v2162_v54 = vsel %vm666_vm8, %v2158_v23, %v2159_v0 }
 0x732   : > { %v2125_v46 = vmul.f32 %v2121_v48, %v5833_v20  ;;  %v2100_v22 = vmul.f32 %v3536_v17, %v2096_v1  ;;  %v2095_v49 = vsub.f32 %v5080_v3, %v2090_v56  ;;  %v2172_v13 = vmul.f32 %v5765_v62, %v2168_v58 }
 0x733   : > { %v2144_v40 = vpop.permute.xlu1 %2143 }
 0x734   : > { %v5163_v63 = vadd.f32 %v2125_v46, %v4901_v12  ;;  %v2124_v41 = vadd.f32 %v2116_v45, %v2100_v22  ;;  %v2148_v18 = vsub.f32 %v2144_v40, %v5083_v52  ;;  %v2099_v34 = vmul.f32 %v3536_v17, %v2095_v49  ;;  %v5835_v45 = vld [vmem:[#allocation41_spill] sm:$0xff] }
 0x735   : > { %v2138_v24 = vpop.permute.xlu0 %2137  ;;  %v2167_v49 = vsub.f32 %v2161_v60, %v5151_v25 }
 0x736   : > { %2185 = vrot.lane.b32.xlu0 %v5163_v63, %s3216_s21  ;;  %v2128_v12 = vmul.f32 %v2124_v41, %v5834_v43  ;;  %v2152_v47 = vmul.f32 %v5764_v26, %v2148_v18  ;;  %v2123_v36 = vadd.f32 %v2115_v9, %v2099_v34  ;;  %v2145_v48 = vsub.f32 %v2138_v24, %v5091_v5  ;;  %v5836_v9 = vld [vmem:[#allocation43_spill] sm:$0xff] }
 0x737   : > { %v2142_v50 = vpop.permute.xlu1 %2141 }
 0x738   : > { %v5182_v28 = vadd.f32 %v2128_v12, %v4918_v37  ;;  %v2176_v1 = vadd.f32 %v2172_v13, %v2152_v47  ;;  %v2147_v46 = vsub.f32 %v2142_v50, %v5095_v7  ;;  %v2127_v22 = vmul.f32 %v2123_v36, %v5835_v45 }
 0x739   : > { %v2149_v55 = vmul.f32 %v5764_v26, %v2145_v48  ;;  %v2140_v37 = vpop.permute.xlu0 %2139  ;;  %v2166_v13 = vsub.f32 %v2162_v54, %v5153_v61  ;;  %v2271_v54 = vrot.slane %v5163_v63, 1 }
 0x73a   : > { %v2180_v56 = vmul.f32 %v2176_v1, %v5834_v43  ;;  %v2151_v58 = vmul.f32 %v5764_v26, %v2147_v46  ;;  %2191 = vrot.lane.b32.xlu1 %v5182_v28, %s3216_s21  ;;  %v5196_v40 = vadd.f32 %v2127_v22, %v4933_v14  ;;  %v2146_v18 = vsub.f32 %v2140_v37, %v5102_v29 }
 0x73b   : > { %v2173_v41 = vadd.f32 %v2165_v8, %v2149_v55  ;;  %v2274_v55 = vrot.slane %v5182_v28, 1 }
 0x73c   : > { %v5200_v34 = vadd.f32 %v2180_v56, %v5836_v9  ;;  %v2175_v12 = vadd.f32 %v2167_v49, %v2151_v58  ;;  %v2150_v0 = vmul.f32 %v5764_v26, %v2146_v18  ;;  %2189 = vrot.lane.b32.xlu0 %v5196_v40, %s3216_s21  ;;  %v5837_v18 = vld [vmem:[#allocation46_spill] sm:$0xff] }
 0x73d   : > { %v2177_v47 = vmul.f32 %v2173_v41, %v5833_v20 }
 0x73e   : > { %v2179_v14 = vmul.f32 %v2175_v12, %v5835_v45  ;;  %2293 = vrot.lane.b32.xlu1 %v5200_v34, %s3215_s11  ;;  %v2174_v21 = vadd.f32 %v2166_v13, %v2150_v0  ;;  %v2204_v1 = vrot.slane %v5200_v34, 7  ;;  %v2272_v0 = vrot.slane %v5131_v33, 1 }
 0x73f   : > { %v5211_v23 = vadd.f32 %v2177_v47, %v4948_v39  ;;  %v2278_v47 = vsel %vm666_vm8, %v2274_v55, %v2271_v54 }
 0x740   : > { %v5214_v24 = vadd.f32 %v2179_v14, %v4951_v35  ;;  %v2178_v36 = vmul.f32 %v2174_v21, %v5798_v15  ;;  %v2273_v14 = vrot.slane %v5196_v40, 1  ;;  %v5838_v21 = vld [vmem:[#allocation40_spill] sm:$0xff] }
 0x741   : > { %2287 = vrot.lane.b32.xlu0 %v5211_v23, %s3215_s11  ;;  %2315 = vst [vmem:[%s3577_s25 + $0x4] sm:$0x4] %v5211_v23  ;;  %v2201_v35 = vrot.slane %v5211_v23, 7 }
 0x742   : > { %2291 = vrot.lane.b32.xlu1 %v5214_v24, %s3215_s11  ;;  %v5224_v48 = vadd.f32 %v2178_v36, %v4961_v53  ;;  %v2238_v53 = vstv %s5228_s17  ;;  %v2203_v37 = vrot.slane %v5214_v24, 7  ;;  %s3217_s17 = smov [#allocation25]  }
 0x743   : > { %v2208_v56 = vsel %vm634_vm4, %v2204_v1, %v2201_v35  ;;  %v5242_v58 = vmul.f32 0.0, %v2238_v53  ;;  %s3065_s0 = sshll.u32 %s3217_s17, 4  ;;  %s3066_s0 = int_to_ptr.vmem [resolvable:$false] %s3065_s0 }
 0x744   : > { %v2202_v39 = vrot.slane %v5224_v48, 7  ;;  %v2209_v12 = vsub.f32 %v5211_v23, %v2208_v56  ;;  %v5262_v56 = vsel %vm666_vm8, %v2271_v54, %v2272_v0  ;;  %p3068_p0 = scmp.lt.s32.totalorder %s5469_s18, %s3066_s0 }
 0x745   : > { %2289 = vrot.lane.b32.xlu0 %v5224_v48, %s3215_s11 }
 0x746   : > { %v2207_v60 = vsel %vm634_vm4, %v2201_v35, %v2202_v39 }
 0x747   : > { %v2210_v8 = vsub.f32 %v5224_v48, %v2207_v60  ;;  %v2205_v60 = vsel %vm634_vm4, %v2203_v37, %v2204_v1  ;;  %v5272_v1 = vsel %vm666_vm8, %v2273_v14, %v2274_v55  ;;  %v5841_v55 = vld [vmem:[#allocation49_spill] sm:$0xff] }
 0x748   : > { %v2212_v45 = vsub.f32 %v5200_v34, %v2205_v60 }
 0x7a1   : > { %v2188_v50 = vpop.permute.xlu1 %2187 }
 0x7a2   : > { %v2194_v46 = vsub.f32 %v2188_v50, %v5131_v33 }
 0x7a4   : > { %v2198_v22 = vmul.f32 %v5764_v26, %v2194_v46  ;;  %v2282_v46 = vsub.f32 %v2278_v47, %v5182_v28 }
 0x7a6   : > { %v2218_v49 = vadd.f32 %v2210_v8, %v2198_v22  ;;  %v2286_v60 = vmul.f32 %v5765_v62, %v2282_v46 }
 0x7a8   : > { %v2222_v41 = vmul.f32 %v2218_v49, %v2218_v49  ;;  %v2230_v9 = vmul.f32 %v2218_v49, %v5837_v18  ;;  %v2186_v13 = vpop.permute.xlu0 %2185  ;;  %v2252_v18 = vmul.f32 %v2198_v22, %v5831_v44  ;;  %v5279_v22 = vsel %vm666_vm8, %v2272_v0, %v2273_v14 }
 0x7a9   : > { %v2193_v50 = vsub.f32 %v2186_v13, %v5163_v63  ;;  %v5840_v13 = vld [vmem:[#allocation50_spill] sm:$0xff]  ;;  %v2281_v14 = vsub.f32 %v5272_v1, %v5196_v40 }
 0x7aa   : > { %v5253_v36 = vadd.f32 %v2222_v41, %v5838_v21  ;;  %v2244_v35 = vadd.f32 %v5242_v58, %v2230_v9  ;;  %v2213_v41 = vmul.f32 %v5814_v57, %v2209_v12  ;;  %v2264_v12 = vmul.f32 %v2210_v8, %v5831_v44 }
 0x7ab   : > { %v2197_v21 = vmul.f32 %v5764_v26, %v2193_v50 }
 0x7ac   : > { %5839 = vst [vmem:[#allocation55_spill] sm:$0xff] %v5253_v36  ;;  %v2248_v49 = vadd.f32 %v2244_v35, %v5008_v38  ;;  %v2260_v9 = vadd.f32 %v2244_v35, %v5153_v61  ;;  %v2239_v36 = vmul.f32 %v5840_v13, %v2238_v53  ;;  %v2192_v38 = vpop.permute.xlu1 %2191  ;;  %v2279_v53 = vsub.f32 %v5262_v56, %v5163_v63 }
 0x7ad   : > { %v2217_v54 = vadd.f32 %v2213_v41, %v2197_v21  ;;  %v2196_v61 = vsub.f32 %v2192_v38, %v5182_v28  ;;  %v2280_v56 = vsub.f32 %v5279_v22, %v5131_v33  ;;  %v2251_v22 = vmul.f32 %v2197_v21, %v3721_v51  ;;  %v5845_v21 = vld [vmem:[#allocation53_spill] sm:$0xff] }
 0x7ae   : > { %v5274_v47 = vadd.f32 %v2252_v18, %v2248_v49  ;;  %v2206_v49 = vsel %vm634_vm4, %v2202_v39, %v2203_v37  ;;  %v5291_v0 = vadd.f32 %v2264_v12, %v2260_v9  ;;  %v2190_v8 = vpop.permute.xlu0 %2189  ;;  %v5842_v18 = vld [vmem:[#allocation54_spill] sm:$0xff]  ;;  %v2266_v37 = vmul.f32 %v2212_v45, %v3739_v31 }
 0x7af   : > { %v2221_v35 = vmul.f32 %v2217_v54, %v2217_v54  ;;  %v2229_v50 = vmul.f32 %v2217_v54, %v5841_v55  ;;  %v2200_v44 = vmul.f32 %v5764_v26, %v2196_v61  ;;  %v2195_v46 = vsub.f32 %v2190_v8, %v5196_v40 }
 0x7b0   : > { %2326 = vrot.lane.b32.xlu1 %v5274_v47, %s3215_s11  ;;  %v2294_v54 = vpop.permute.xlu1 %2293  ;;  %v2263_v9 = vmul.f32 %v2213_v41, %v3721_v51  ;;  %v2211_v12 = vsub.f32 %v5214_v24, %v2206_v49 }
 0x7b1   : > { %v5299_v13 = vadd.f32 %v2221_v35, %v5842_v18  ;;  %v2243_v39 = vadd.f32 %v2239_v36, %v2229_v50  ;;  %v2220_v38 = vadd.f32 %v2212_v45, %v2200_v44  ;;  %v2298_v61 = vsub.f32 %v5200_v34, %v2294_v54  ;;  %v5844_v50 = vld [vmem:[#allocation51_spill] sm:$0xff] }
 0x7b2   : > { %v2199_v36 = vmul.f32 %v5764_v26, %v2195_v46  ;;  %v2397_v45 = vrot.slane %v5291_v0, 1 }
 0x7b3   : > { %5843 = vst [vmem:[#allocation39_spill] sm:$0xff] %v5299_v13  ;;  %v2247_v1 = vadd.f32 %v2243_v39, %v5051_v10  ;;  %v2259_v35 = vadd.f32 %v2243_v39, %v5125_v2  ;;  %v2224_v55 = vmul.f32 %v2220_v38, %v2220_v38  ;;  %v2232_v18 = vmul.f32 %v2220_v38, %v5844_v50  ;;  %v2288_v13 = vpop.permute.xlu0 %2287 }
 0x7b4   : > { %v2302_v8 = vmul.f32 %v3536_v17, %v2298_v61  ;;  %v2254_v10 = vmul.f32 %v2200_v44, %v3739_v31  ;;  %v2219_v54 = vadd.f32 %v2211_v12, %v2199_v36  ;;  %v2292_v51 = vpop.permute.xlu1 %2291  ;;  %v2295_v38 = vsub.f32 %v5211_v23, %v2288_v13 }
 0x7b5   : > { %v5313_v41 = vadd.f32 %v2251_v22, %v2247_v1  ;;  %v5315_v49 = vadd.f32 %v2263_v9, %v2259_v35  ;;  %v5319_v2 = vadd.f32 %v2224_v55, %v5845_v21  ;;  %v2246_v39 = vadd.f32 %v5242_v58, %v2232_v18 }
 0x7b6   : > { %v2306_v46 = vadd.f32 %v2302_v8, %v2286_v60  ;;  %v2223_v50 = vmul.f32 %v2219_v54, %v2219_v54  ;;  %v2231_v1 = vmul.f32 %v2219_v54, %v5759_v32  ;;  %v2297_v9 = vsub.f32 %v5214_v24, %v2292_v51 }
 0x7b7   : > { %v2396_v61 = vrot.slane %v5315_v49, 1  ;;  %2324 = vrot.lane.b32.xlu0 %v5313_v41, %s3215_s11  ;;  %v2250_v31 = vadd.f32 %v2246_v39, %v5072_v11  ;;  %v2262_v44 = vadd.f32 %v2246_v39, %v5123_v27  ;;  %v2253_v22 = vmul.f32 %v2199_v36, %v3733_v16  ;;  %v2290_v35 = vpop.permute.xlu0 %2289 }
 0x7b8   : > { %v2299_v60 = vmul.f32 %v3536_v17, %v2295_v38  ;;  %v5333_v13 = vadd.f32 %v2223_v50, %v5065_v42  ;;  %v2245_v55 = vadd.f32 %v5242_v58, %v2231_v1  ;;  %v2301_v32 = vmul.f32 %v3536_v17, %v2297_v9 }
 0x7b9   : > { %v2296_v18 = vsub.f32 %v5224_v48, %v2290_v35  ;;  %v2258_v8 = vadd.f32 %v2254_v10, %v2250_v31  ;;  %v2310_v54 = vmul.f32 %v2306_v46, %v3763_v30  ;;  %v5339_v51 = vadd.f32 %v2266_v37, %v2262_v44 }
 0x7ba   : > { %v2303_v11 = vadd.f32 %v2299_v60, %v2279_v53  ;;  %v2249_v27 = vadd.f32 %v2245_v55, %v5080_v3  ;;  %v2305_v36 = vadd.f32 %v2301_v32, %v2281_v14  ;;  %v5345_v42 = vsel %vm666_vm8, %v2396_v61, %v2397_v45 }
 0x7bb   : > { %v2300_v21 = vmul.f32 %v3536_v17, %v2296_v18  ;;  %v2265_v58 = vmul.f32 %v2211_v12, %v3733_v16  ;;  %2330 = vrot.lane.b32.xlu1 %v2258_v8, %s3215_s11  ;;  %v2399_v10 = vrot.slane %v5339_v51, 1  ;;  %v2404_v30 = vsub.f32 %v5345_v42, %v5315_v49 }
 0x7bc   : > { %v2257_v53 = vadd.f32 %v2253_v22, %v2249_v27  ;;  %v2307_v37 = vmul.f32 %v2303_v11, %v3769_v59  ;;  %v2261_v14 = vadd.f32 %v2245_v55, %v5151_v25  ;;  %v2309_v39 = vmul.f32 %v2305_v36, %v3785_v4 }
 0x7bd   : > { %v2304_v3 = vadd.f32 %v2300_v21, %v2280_v56  ;;  %v2314_v46 = vadd.f32 %v2310_v54, %v5083_v52  ;;  %v2403_v16 = vsel %vm666_vm8, %v2399_v10, %v2396_v61 }
 0x7be   : > { %2328 = vrot.lane.b32.xlu0 %v2257_v53, %s3215_s11  ;;  %v2407_v12 = vsub.f32 %v2403_v16, %v5339_v51  ;;  %v5360_v38 = vadd.f32 %v2265_v58, %v2261_v14  ;;  %v2311_v56 = vadd.f32 %v2307_v37, %v5091_v5  ;;  %v2313_v4 = vadd.f32 %v2309_v39, %v5095_v7  ;;  %s5450_s11 = scalar_lea.vmem [#allocation24], %s2732_s27 }
 0x7bf   : > { %2382 = vrot.lane.b32.xlu1 %v2314_v46, %s3216_s21  ;;  %v2308_v59 = vmul.f32 %v2304_v3, %v5760_v19  ;;  %v2347_v44 = vrot.slane %v2314_v46, 7  ;;  %s2501_s28 = sshll.u32 %s5450_s11, 4  ;;  %s5487_s28 = int_to_ptr.vmem [resolvable:$true] %s2501_s28 }
 0x7c0   : > { %v2398_v25 = vrot.slane %v5360_v38, 1  ;;  %v2344_v1 = vrot.slane %v2311_v56, 7  ;;  %v2346_v11 = vrot.slane %v2313_v4, 7 }
 0x7c1   : > { %v5380_v5 = vadd.f32 %v2308_v59, %v5102_v29 }
 0x7c2   : > { %2376 = vrot.lane.b32.xlu0 %v2311_v56, %s3216_s21  ;;  %v5370_v52 = vsel %vm666_vm8, %v2398_v25, %v2399_v10  ;;  %v5377_v19 = vsel %vm666_vm8, %v2397_v45, %v2398_v25  ;;  %v2351_v60 = vsel %vm634_vm4, %v2347_v44, %v2344_v1  ;;  %v2348_v21 = vsel %vm634_vm4, %v2346_v11, %v2347_v44 }
 0x7c3   : > { %2380 = vrot.lane.b32.xlu1 %v2313_v4, %s3216_s21  ;;  %v2406_v61 = vsub.f32 %v5370_v52, %v5360_v38  ;;  %v2405_v7 = vsub.f32 %v5377_v19, %v5291_v0  ;;  %v2345_v50 = vrot.slane %v5380_v5, 7  ;;  %v2352_v32 = vsub.f32 %v2311_v56, %v2351_v60  ;;  %v5846_v60 = vld [vmem:[#allocation41_spill] sm:$0xff] }
 0x7c5   : > { %v2350_v31 = vsel %vm634_vm4, %v2344_v1, %v2345_v50 }
 0x7c6   : > { %2378 = vrot.lane.b32.xlu0 %v5380_v5, %s3216_s21  ;;  %v2353_v29 = vsub.f32 %v5380_v5, %v2350_v31 }
 0x822   : > { %v2327_v9 = vpop.permute.xlu1 %2326 }
 0x823   : > { %v2333_v45 = vsub.f32 %v5274_v47, %v2327_v9  ;;  %v2356_v47 = vmul.f32 %v5814_v57, %v2352_v32 }
 0x825   : > { %v2337_v22 = vmul.f32 %v3536_v17, %v2333_v45 }
 0x827   : > { %v2361_v35 = vadd.f32 %v2353_v29, %v2337_v22 }
 0x829   : > { %v2365_v55 = vmul.f32 %v2361_v35, %v5798_v15  ;;  %v2325_v18 = vpop.permute.xlu0 %2324 }
 0x82a   : > { %v2332_v54 = vsub.f32 %v5313_v41, %v2325_v18  ;;  %v2355_v41 = vsub.f32 %v2314_v46, %v2348_v21 }
 0x82b   : > { %v5397_v51 = vadd.f32 %v2365_v55, %v5131_v33  ;;  %v2349_v33 = vsel %vm634_vm4, %v2345_v50, %v2346_v11  ;;  %v2411_v50 = vmul.f32 %v5765_v62, %v2407_v12 }
 0x82c   : > { %v2336_v27 = vmul.f32 %v3536_v17, %v2332_v54  ;;  %v2354_v9 = vsub.f32 %v2313_v4, %v2349_v33 }
 0x82d   : > { %2426 = vrot.lane.b32.xlu1 %v5397_v51, %s3216_s21  ;;  %v2331_v58 = vpop.permute.xlu1 %2330 }
 0x82e   : > { %v2360_v36 = vadd.f32 %v2356_v47, %v2336_v27  ;;  %v2335_v10 = vsub.f32 %v2258_v8, %v2331_v58 }
 0x830   : > { %v2364_v37 = vmul.f32 %v2360_v36, %v5833_v20  ;;  %v2339_v3 = vmul.f32 %v3536_v17, %v2335_v10  ;;  %v2329_v14 = vpop.permute.xlu0 %2328 }
 0x831   : > { %v2334_v39 = vsub.f32 %v2257_v53, %v2329_v14  ;;  %v2383_v16 = vpop.permute.xlu1 %2382 }
 0x832   : > { %v5410_v59 = vadd.f32 %v2364_v37, %v5163_v63  ;;  %v2363_v25 = vadd.f32 %v2355_v41, %v2339_v3  ;;  %v2387_v1 = vsub.f32 %v2383_v16, %v2314_v46 }
 0x833   : > { %v2338_v8 = vmul.f32 %v3536_v17, %v2334_v39 }
 0x834   : > { %2424 = vrot.lane.b32.xlu0 %v5410_v59, %s3216_s21  ;;  %v2367_v31 = vmul.f32 %v2363_v25, %v5834_v43  ;;  %v2391_v44 = vmul.f32 %v5764_v26, %v2387_v1  ;;  %v2377_v53 = vpop.permute.xlu0 %2376 }
 0x835   : > { %v2362_v45 = vadd.f32 %v2354_v9, %v2338_v8  ;;  %v2384_v22 = vsub.f32 %v2377_v53, %v2311_v56  ;;  %v2381_v63 = vpop.permute.xlu1 %2380 }
 0x836   : > { %v2415_v46 = vadd.f32 %v2411_v50, %v2391_v44  ;;  %v2386_v29 = vsub.f32 %v2381_v63, %v2313_v4  ;;  %v5420_v17 = vadd.f32 %v2367_v31, %v5182_v28 }
 0x837   : > { %v2366_v35 = vmul.f32 %v2362_v45, %v5846_v60  ;;  %v2388_v55 = vmul.f32 %v5764_v26, %v2384_v22 }
 0x838   : > { %v2419_v32 = vmul.f32 %v2415_v46, %v5834_v43  ;;  %v2390_v62 = vmul.f32 %v5764_v26, %v2386_v29  ;;  %v2379_v12 = vpop.permute.xlu0 %2378  ;;  %2430 = vrot.lane.b32.xlu1 %v5420_v17, %s3216_s21 }
 0x839   : > { %v2412_v28 = vadd.f32 %v2404_v30, %v2388_v55  ;;  %v2385_v56 = vsub.f32 %v2379_v12, %v5380_v5  ;;  %v5434_v4 = vadd.f32 %v2366_v35, %v5196_v40 }
 0x83a   : > { %v5437_v18 = vadd.f32 %v2419_v32, %v5200_v34  ;;  %v2414_v43 = vadd.f32 %v2406_v61, %v2390_v62 }
 0x83b   : > { %v2416_v54 = vmul.f32 %v2412_v28, %v5833_v20  ;;  %v2389_v49 = vmul.f32 %v5764_v26, %v2385_v56  ;;  %2428 = vrot.lane.b32.xlu0 %v5434_v4, %s3216_s21  ;;  %s3067_s21 = scalar_lea.vmem %s3066_s0, 256 }
 0x83c   : > { %2472 = vst [vmem:[%s5450_s11 + $0x18] sm:$0xff] %v5437_v18  ;;  %v2418_v40 = vmul.f32 %v2414_v43, %v5846_v60  ;;  %v2443_v20 = vrot.slane %v5437_v18, 7  ;;  %p3069_p6 = scmp.lt.s32.totalorder %s3067_s21, %s3061_s14 }
 0x83d   : > { %v5459_v34 = vadd.f32 %v2416_v54, %v5211_v23  ;;  %v2413_v42 = vadd.f32 %v2405_v7, %v2389_v49 }
 0x83e   : > { %v5472_v30 = vadd.f32 %v2418_v40, %v5214_v24  ;;  %p3070_p9 = por %p3069_p6, %p3068_p0 }
 0x83f   : > { %2468 = vst [vmem:[%s3577_s25 + $0x5] sm:$0x4] %v5459_v34  ;;  %2469 = vst [vmem:[%s5450_s11] sm:$0xff] %v5459_v34  ;;  %v2417_v23 = vmul.f32 %v2413_v42, %v5798_v15  ;;  %v2440_v0 = vrot.slane %v5459_v34, 7  ;;  %s5492_s25 = scalar_lea.sflag [#allocation26], %s2482_s23 }
 0x840   : > { %2471 = vst [vmem:[%s5450_s11 + $0x10] sm:$0xff] %v5472_v30  ;;  %v2442_v24 = vrot.slane %v5472_v30, 7  ;;  %p3071_p10 = pnand %p3070_p9, %p3064_p5 }
 0x842   : > { %3074 = shalt.err (!%p3071_p10)
}
 0x843   : > { %s3075_s23 = scalar_lea.hbm %s5467_s15, 128  ;;  %s3079_s29 = scalar_lea.hbm %s5640_s8, 512 }
 0x844   : > { %p3076_p13 = scmp.ne.s32.totalorder %s5467_s15, %s3075_s23  ;;  %p3080_p2 = scmp.lt.u32.totalorder %s5467_s15, %s5640_s8 }
 0x845   : > { %p3081_p3 = scmp.lt.u32.totalorder %s3079_s29, %s3075_s23  ;;  %p3083_p7 = scmp.lt.u32.totalorder %s3075_s23, %s5467_s15 }
 0x846   : > { %p3077_p12 = pnand %p3076_p13, %p5847_p8 }
 0x847   : > { %p3082_p4 = por %p3081_p3, %p3080_p2 }
 0x848   : > { %p3078_p1 = pneg %p3077_p12 }
 0x849   : > { %p3084_p11 = por %p3083_p7, %p3082_p4 }
 0x84b   : > { %p3085_p5 = pnand %p3084_p11, %p3078_p1 }
 0x84d   : > { %3088 = shalt.err (!%p3085_p5)
}
 0x84e   : > { %2787 = dma.vmem_to_hbm [thread:$0]  (%p5847_p8), %s5469_s18, 128, %s5467_s15, %s5492_s25   ;;  %v2421_v15 = vadd.f32 %v2417_v23, %v5224_v48  ;;  %v2447_v38 = vsel %vm634_vm4, %v2443_v20, %v2440_v0  ;;  %v2444_v61 = vsel %vm634_vm4, %v2442_v24, %v2443_v20 }
 0x84f   : > { %v2448_v52 = vsub.f32 %v5459_v34, %v2447_v38  ;;  %v2451_v5 = vsub.f32 %v5437_v18, %v2444_v61  ;;  %s2478_s18 = scalar_lea.sflag [#allocation13], %s3545_s24  ;;  %s3089_s15 = scalar_lea.vmem %s5487_s28, 512 }
 0x850   : > { %2470 = vst [vmem:[%s5450_s11 + $0x8] sm:$0xff] %v2421_v15  ;;  %v2441_v19 = vrot.slane %v2421_v15, 7  ;;  %p3090_p0 = scmp.ne.s32.totalorder %s5487_s28, %s3089_s15  ;;  %s3218_s14 = smov [#allocation24]  }
 0x851   : > { %s3093_s21 = sshll.u32 %s3218_s14, 4  ;;  %s3094_s21 = int_to_ptr.vmem [resolvable:$false] %s3093_s21 }
 0x852   : > { %p3091_p6 = pnand %p3090_p0, %p5847_p8  ;;  %s3095_s23 = scalar_lea.vmem %s3094_s21, 1024 }
 0x853   : > { %p3096_p10 = scmp.lt.s32.totalorder %s5487_s28, %s3094_s21  ;;  %p3097_p13 = scmp.lt.s32.totalorder %s3095_s23, %s3089_s15 }
 0x854   : > { %p3092_p9 = pneg %p3091_p6 }
 0x855   : > { %p3098_p12 = por %p3097_p13, %p3096_p10 }
 0x857   : > { %p3099_p1 = pnand %p3098_p12, %p3092_p9 }
 0x859   : > { %3102 = shalt.err (!%p3099_p1)
}
 0x85a   : > { %s3103_s11 = scalar_lea.hbm %s5485_s22, 512  ;;  %s3107_s29 = scalar_lea.hbm %s5639_s7, 2048 }
 0x85b   : > { %p3104_p2 = scmp.ne.s32.totalorder %s5485_s22, %s3103_s11  ;;  %p3108_p7 = scmp.lt.u32.totalorder %s5485_s22, %s5639_s7 }
 0x85c   : > { %p3109_p11 = scmp.lt.u32.totalorder %s3107_s29, %s3103_s11  ;;  %p3111_p0 = scmp.lt.u32.totalorder %s3103_s11, %s5485_s22 }
 0x85d   : > { %p3105_p3 = pnand %p3104_p2, %p5847_p8 }
 0x85e   : > { %p3110_p5 = por %p3109_p11, %p3108_p7 }
 0x85f   : > { %p3106_p4 = pneg %p3105_p3 }
 0x860   : > { %p3112_p6 = por %p3111_p0, %p3110_p5 }
 0x862   : > { %p3113_p9 = pnand %p3112_p6, %p3106_p4 }
 0x864   : > { %3116 = shalt.err (!%p3113_p9)
}
 0x865   : > { %s3219_s15 = smov 128   ;;  %s3220_s14 = smov 8   ;;  %v2446_v48 = vsel %vm634_vm4, %v2440_v0, %v2441_v19  ;;  %v2445_v7 = vsel %vm634_vm4, %v2441_v19, %v2442_v24  ;;  %v5848_v41 = vld [vmem:[#allocation55_spill] sm:$0xff]  ;;  %v2452_v6 = vmul.f32 %v5814_v57, %v2448_v52 }
 0x866   : > { %2786 = dma.vmem_to_hbm [thread:$0]  (%p5847_p8), %s5487_s28, 512, %s5485_s22, %s2478_s18, %s3219_s15, %s3219_s15, %s3220_s14   ;;  %v2449_v11 = vsub.f32 %v2421_v15, %v2446_v48  ;;  %v2450_v47 = vsub.f32 %v5472_v30, %v2445_v7  ;;  %v5849_v8 = vld [vmem:[#allocation39_spill] sm:$0xff] }
 0x867   : > { %s426_s28 = scalar_lea.vmem [#allocation27], %s2732_s27  ;;  %s5586_s18 = scalar_lea.hbm %s5641_s9, %s2756_s16 }
 0x868   : > { %s2530_s24 = sshll.u32 %s426_s28, 4  ;;  %s3221_s23 = smov [#allocation27]   ;;  %s5578_s24 = int_to_ptr.vmem [resolvable:$true] %s2530_s24 }
 0x869   : > { %s3117_s21 = scalar_lea.vmem %s5578_s24, 512  ;;  %s3121_s11 = sshll.u32 %s3221_s23, 4  ;;  %s3122_s11 = int_to_ptr.vmem [resolvable:$false] %s3121_s11 }
 0x86a   : > { %p3118_p10 = scmp.ne.s32.totalorder %s5578_s24, %s3117_s21  ;;  %s3123_s26 = scalar_lea.vmem %s3122_s11, 1024 }
 0x86b   : > { %p3124_p1 = scmp.lt.s32.totalorder %s5578_s24, %s3122_s11  ;;  %p3125_p2 = scmp.lt.s32.totalorder %s3123_s26, %s3117_s21 }
 0x86c   : > { %p3119_p13 = pnand %p3118_p10, %p5847_p8 }
 0x86d   : > { %p3126_p3 = por %p3125_p2, %p3124_p1 }
 0x86e   : > { %p3120_p12 = pneg %p3119_p13 }
 0x870   : > { %p3127_p4 = pnand %p3126_p3, %p3120_p12 }
 0x89f   : > { %v2427_v27 = vpop.permute.xlu1 %2426 }
 0x8a0   : > { %v2433_v36 = vsub.f32 %v2427_v27, %v5397_v51 }
 0x8a2   : > { %v2437_v21 = vmul.f32 %v5764_v26, %v2433_v36 }
 0x8a4   : > { %v2457_v58 = vadd.f32 %v2449_v11, %v2437_v21 }
 0x8a6   : > { %v2461_v10 = vmul.f32 %v2457_v58, %v2457_v58  ;;  %v2425_v37 = vpop.permute.xlu0 %2424 }
 0x8a7   : > { %v2432_v33 = vsub.f32 %v2425_v37, %v5410_v59 }
 0x8a8   : > { %v2465_v3 = vadd.f32 %v2461_v10, %v5848_v41 }
 0x8a9   : > { %v2436_v14 = vmul.f32 %v5764_v26, %v2432_v33 }
 0x8aa   : > { %2474 = vst [vmem:[%s426_s28 + $0x8] sm:$0xff] %v2465_v3  ;;  %v2431_v16 = vpop.permute.xlu1 %2430 }
 0x8ab   : > { %v2456_v39 = vadd.f32 %v2452_v6, %v2436_v14  ;;  %v2435_v51 = vsub.f32 %v2431_v16, %v5420_v17 }
 0x8ad   : > { %v2460_v25 = vmul.f32 %v2456_v39, %v2456_v39  ;;  %v2439_v1 = vmul.f32 %v5764_v26, %v2435_v51  ;;  %v2429_v9 = vpop.permute.xlu0 %2428 }
 0x8ae   : > { %v2434_v59 = vsub.f32 %v2429_v9, %v5434_v4 }
 0x8af   : > { %v2464_v31 = vadd.f32 %v2460_v25, %v5849_v8  ;;  %v2459_v44 = vadd.f32 %v2451_v5, %v2439_v1 }
 0x8b0   : > { %v2438_v57 = vmul.f32 %v5764_v26, %v2434_v59 }
 0x8b1   : > { %2473 = vst [vmem:[%s426_s28] sm:$0xff] %v2464_v31  ;;  %v2463_v50 = vmul.f32 %v2459_v44, %v2459_v44 }
 0x8b2   : > { %v2458_v53 = vadd.f32 %v2450_v47, %v2438_v57 }
 0x8b3   : > { %v2467_v45 = vadd.f32 %v2463_v50, %v5319_v2 }
 0x8b4   : > { %v2462_v22 = vmul.f32 %v2458_v53, %v2458_v53 }
 0x8b5   : > { %2476 = vst [vmem:[%s426_s28 + $0x18] sm:$0xff] %v2467_v45 }
 0x8b6   : > { %v2466_v63 = vadd.f32 %v2462_v22, %v5333_v13 }
 0x8b8   : > { %2475 = vst [vmem:[%s426_s28 + $0x10] sm:$0xff] %v2466_v63 }
 0x8b9   : > { %3130 = shalt.err (!%p3127_p4)
}
 0x8ba   : > { %s3131_s13 = scalar_lea.hbm %s5586_s18, 512  ;;  %s3135_s29 = scalar_lea.hbm %s5641_s9, 2048 }
 0x8bb   : > { %p3132_p7 = scmp.ne.s32.totalorder %s5586_s18, %s3131_s13  ;;  %p3136_p0 = scmp.lt.u32.totalorder %s5586_s18, %s5641_s9 }
 0x8bc   : > { %p3137_p6 = scmp.lt.u32.totalorder %s3135_s29, %s3131_s13  ;;  %p3139_p10 = scmp.lt.u32.totalorder %s3131_s13, %s5586_s18 }
 0x8bd   : > { %p3133_p11 = pnand %p3132_p7, %p5847_p8 }
 0x8be   : > { %p3138_p9 = por %p3137_p6, %p3136_p0 }
 0x8bf   : > { %p3134_p5 = pneg %p3133_p11 }
 0x8c0   : > { %p3140_p13 = por %p3139_p10, %p3138_p9 }
 0x8c2   : > { %p3141_p12 = pnand %p3140_p13, %p3134_p5 }
 0x8c4   : > { %3144 = shalt.err (!%p3141_p12)
}
 0x8c5   : > { %2788 = dma.vmem_to_hbm [thread:$0]  (%p5847_p8), %s5578_s24, 512, %s5586_s18, %s5492_s25, %s3219_s15, %s3219_s15, %s3220_s14  }
 0x8c6 PF: > { %s5850_s28 = sld [smem:[#allocation38_spill]]  ;;  %p2838_p1 = scmp.ge.s32.totalorder %s3203_s12, 2 }
 0x8c7   : > { %s2545_s27 = sand.u32 1, %s3191_s30  }
 0x8c8   : > { %s2546_s22 = scalar_lea.sflag [#allocation13], %s2545_s27 }
 0x8cc   : > { %p5851_p2 = scmp.ne.s32.totalorder %s5850_s28, 0 }
 0x8ce   : > { %p2815_p3 = pnand %p2838_p1, %p5851_p2 }
 0x8d0   : > { %3182 = dma.done.wait (!%p2815_p3), %s2546_s22, 512  }
 0x8d1   : > { %3184 = vsyncadd (!%p2815_p3), %s2546_s22, 4294966784  ;;  %s5852_s19 = sadd.s32 4294967294, %s3203_s12  }
 0x8d2   : > { %s2554_s21 = sand.u32 1, %s5852_s19  }
 0x8d3   : > { %s2555_s23 = scalar_lea.sflag [#allocation26], %s2554_s21 }
 0x8d4   : > { %3186 = dma.done.wait (!%p2815_p3), %s2555_s23, 640  }
 0x8d5   : > { %3188 = vsyncadd (!%p2815_p3), %s2555_s23, 4294966656  ;;  %s5853_s12 = sld [smem:[#allocation36_spill]]  ;;  %s5854_s25 = sld [smem:[#allocation35_spill]] }
 0x8d6   : > { %s5855_s11 = sld [smem:[#allocation37_spill]]  ;;  %s5856_s30 = smov %s3195_s10 }
 0x8db   : > { %p28_p8 = scmp.ge.s32.totalorder %s5853_s12, 6   ;;  %s5857_s10 = smov %s5854_s25 }
 0x8dd   :  { %30 = sbr.rel (!%p28_p8) target bundleno = 12 (0xc), region = 143 }
 0x8e4   :  { %2569 = vsyncpa [#allocation12], 1 }
 0x8e5   :  { %2571 = vsyncpa [#allocation12 + $0x1], 1 }
 0x8e6   :  { %2572 = vsyncpa [#allocation19], 1 }
 0x8e7   :  { %2573 = vsyncpa [#allocation22], 1 }
 0x8e8   :  { %2574 = vsyncpa [#allocation13], 1 }
 0x8e9   :  { %2576 = vsyncpa [#allocation13 + $0x1], 1 }
 0x8ea   :  { %2577 = vsyncpa [#allocation26], 1 }
 0x8eb   :  { %2579 = vsyncpa [#allocation26 + $0x1], 1 }
 0x8ec   :  { %2580 = vsyncpa [#allocation14], 1 }
 0x8ed   :  { %2582 = vsyncpa [#allocation14 + $0x1], 1 }
 0x8ee   :  { %2583 = vsyncpa [#allocation15], 1 }
 0x8ef   :  { %2585 = vsyncpa [#allocation15 + $0x1], 1 }

</bundles_post_ra>
